<compile_context>
chip_gen: v5e
topology: v5e:2x2
jax: 0.10.0
libtpu: 0.0.40
codegen_flags: <defaults>
</compile_context>

<pallas_src>
import jax
import jax.numpy as jnp
from jax import lax
from jax.experimental import pallas as pl
from jax.experimental.pallas import tpu as pltpu

LANE = 128


def _round_up(n, m):
    return ((n + m - 1) // m) * m


def _pick_tile_h(h, w, target_rows):
    """Largest divisor of h with tile_h*w a multiple of 8 and <= target_rows."""
    divs = [d for d in range(1, h + 1) if h % d == 0]
    ok = [d for d in divs if (d * w) % 8 == 0] or [h]
    small = [d for d in ok if d * w <= max(target_rows, w)]
    return max(small) if small else min(ok)


# ------------------------------- wrapper ----------------------------------- #
def cot_layer_pallas(x_nchw, packed, *, tile_rows_target=1024):
    bs, c, h, w = x_nchw.shape
    cp, cap = packed["cp"], packed["cap"]
    hw = h * w
    tile_h = _pick_tile_h(h, w, tile_rows_target)
    n_t = h // tile_h
    tile_hw = tile_h * w
    hp2, wp2 = h + 2, w + 2

    # channels-last, zero-pad spatial (3x3 'same' conv) + channels (lane pad),
    # cast once to bf16 for the MXU path.
    x_nhwc = jnp.transpose(x_nchw, (0, 2, 3, 1))
    xpad = jnp.pad(x_nhwc, ((0, 0), (1, 1), (1, 1), (0, cp - c))).astype(jnp.bfloat16)

    weights = (packed["wk"], packed["ks"], packed["kb"],
               packed["wva1x"], packed["vs"], packed["vb"],
               packed["w1k"], packed["a1s"], packed["a1b"],
               packed["w2"], packed["b2"])

    def kernel(xpad_ref,
               wk_ref, ks_ref, kb_ref,
               wva1x_ref, vs_ref, vb_ref,
               w1k_ref, a1s_ref, a1b_ref,
               w2_ref, b2_ref,
               o_ref,
               k1_s, acc_s, mt_s, m_s, l_s):
        # One grid step == one image; reset online-softmax statistics here.
        m_s[...] = jnp.full(m_s.shape, -jnp.inf, m_s.dtype)
        l_s[...] = jnp.zeros(l_s.shape, l_s.dtype)

        # ---- pass 0: per row-tile compute + flash-style stash --------------- #
        @pl.loop(0, n_t)
        def _pass0(t):
            r0 = t * tile_h
            r0w = pl.multiple_of(t * tile_hw, tile_hw)

            # key_embed: 3x3 conv as 9 per-tap MXU matmuls accumulated in f32.
            # Each tap is a (tile_h, w, Cp) window of the resident padded image;
            # the (tile_h, w) -> tile_hw flatten is free when w % 8 == 0.
            k1 = None
            xf = None
            for ki in range(3):
                for kj in range(3):
                    tap = xpad_ref[pl.ds(r0 + ki, tile_h), pl.ds(kj, w), :]
                    tap = tap.reshape(tile_hw, cp)
                    if ki == 1 and kj == 1:
                        xf = tap                 # center tap == x (channels-last)
                    part = jnp.dot(tap, wk_ref[ki * 3 + kj],
                                   preferred_element_type=jnp.float32)
                    k1 = part if k1 is None else k1 + part
            k1 = jnp.maximum(k1 * ks_ref[...] + kb_ref[...], 0.0)   # folded BN+ReLU
            k1_bf = k1.astype(jnp.bfloat16)

            # Fused shared-LHS matmul: [value 1x1 conv | x-half of attention
            # conv1] -> one (Cp, Cp+Cap) weight, MXU N >= 256.
            va = jnp.dot(xf, wva1x_ref[...], preferred_element_type=jnp.float32)
            v = va[:, :cp] * vs_ref[...] + vb_ref[...]
            a1 = va[:, cp:] + jnp.dot(k1_bf, w1k_ref[...],
                                      preferred_element_type=jnp.float32)
            a1 = jnp.maximum(a1 * a1s_ref[...] + a1b_ref[...], 0.0)

            # attention conv2 with the k*k positional mean folded into weights.
            att = jnp.dot(a1.astype(jnp.bfloat16), w2_ref[...],
                          preferred_element_type=jnp.float32) + b2_ref[...]

            # Flash-style stash + online softmax stats (exp always on f32 att).
            m_t = jnp.max(att, axis=0, keepdims=True)               # (1, Cp)
            p = jnp.exp(att - m_t)
            s_t = jnp.sum(p, axis=0, keepdims=True)

            k1_s[pl.ds(r0w, tile_hw), :] = k1_bf
            acc_s[pl.ds(r0w, tile_hw), :] = (p * v).astype(jnp.bfloat16)
            mt_s[pl.ds(t, 1), :] = m_t

            m_old = m_s[...]
            m_new = jnp.maximum(m_old, m_t)
            l_s[...] = (l_s[...] * jnp.exp(m_old - m_new)
                        + s_t * jnp.exp(m_t - m_new))
            m_s[...] = m_new

        # ---- pass 1: normalize and write the lane-dense output tiles -------- #
        @pl.loop(0, n_t)
        def _pass1(t):
            sl = pl.ds(pl.multiple_of(t * tile_hw, tile_hw), tile_hw)
            inv_l = pl.reciprocal(l_s[...], approx=True)            # (1, Cp), EUP
            scale = jnp.exp(mt_s[pl.ds(t, 1), :] - m_s[...]) * inv_l
            o_ref[sl, :] = (k1_s[sl, :].astype(jnp.float32)
                            + acc_s[sl, :].astype(jnp.float32) * scale)

    def _wspec(arr):
        nd = arr.ndim
        return pl.BlockSpec(arr.shape, lambda b, _nd=nd: (0,) * _nd)

    in_specs = [pl.BlockSpec((None, hp2, wp2, cp), lambda b: (b, 0, 0, 0))]
    in_specs += [_wspec(a) for a in weights]
    out_specs = pl.BlockSpec((None, hw, cp), lambda b: (b, 0, 0))

    scratch_shapes = [
        pltpu.VMEM((hw, cp), jnp.bfloat16),   # k1 per image
        pltpu.VMEM((hw, cp), jnp.bfloat16),   # acc = exp(att - m_tile) * v
        pltpu.VMEM((n_t, cp), jnp.float32),   # per-tile max of att
        pltpu.VMEM((1, cp), jnp.float32),     # running max      (softmax)
        pltpu.VMEM((1, cp), jnp.float32),     # running sum-exp  (softmax)
    ]

    # Advisory cost estimate so XLA overlaps the surrounding layout ops.
    flops = 2 * bs * hw * (9 * cp * cp + cp * (cp + cap) + cp * cap + cap * cp)
    transcendentals = bs * hw * cp + 6 * bs * n_t * cp
    w_bytes = sum(int(a.size) * a.dtype.itemsize for a in weights)
    bytes_accessed = int(xpad.size) * 2 + bs * hw * cp * 4 + w_bytes
    cost = pl.CostEstimate(flops=int(flops), transcendentals=int(transcendentals),
                           bytes_accessed=int(bytes_accessed))

    # Generation-aware VMEM budget: double-buffered image/output blocks AND the
    # (default Buffered(2)) weight blocks, plus scratch and per-tile temporaries.
    xpad_blk = hp2 * wp2 * cp * 2
    out_blk = hw * cp * 4
    scr_bytes = 2 * hw * cp * 2 + (n_t + 2) * cp * 4
    tmp_bytes = tile_hw * (5 * cp + (cp + cap) + cap) * 4 + 3 * tile_hw * cp * 2
    need = 2 * (xpad_blk + out_blk + w_bytes) + scr_bytes + tmp_bytes + (8 << 20)
    try:
        phys_vmem = int(pltpu.get_tpu_info().vmem_capacity_bytes)
    except Exception:
        phys_vmem = 128 << 20
    vmem_cap = int(phys_vmem * 0.85)          # ~108 MiB on v5e/v6e, ~54 MiB on v7x
    vmem_limit = int(min(max(need, 32 << 20), vmem_cap))

    out = pl.pallas_call(
        kernel,
        out_shape=jax.ShapeDtypeStruct((bs, hw, cp), jnp.float32),
        grid=(bs,),
        in_specs=in_specs,
        out_specs=out_specs,
        scratch_shapes=scratch_shapes,
        compiler_params=pltpu.CompilerParams(
            dimension_semantics=("parallel",),
            vmem_limit_bytes=vmem_limit),
        cost_estimate=cost,
    )(xpad, *weights)

    out = out[:, :, :c].reshape(bs, h, w, c)
    return jnp.transpose(out, (0, 3, 1, 2))                         # back to NCHW


# --------------------- deterministic synthetic params ---------------------- #
def init_params(key, dim, kernel_size):
    c, ksz = dim, kernel_size
    keys = jax.random.split(key, 8)
    wk = jax.random.normal(keys[0], (c, c, ksz, ksz), jnp.float32) * 0.1      # OIHW
    wv = jax.random.normal(keys[1], (c, c, 1, 1), jnp.float32) * 0.1
    w1 = jax.random.normal(keys[2], (2 * c // 4, 2 * c, 1, 1), jnp.float32) * 0.1
    w2 = jax.random.normal(keys[3], (ksz * ksz * c, 2 * c // 4, 1, 1), jnp.float32) * 0.1
    b2 = jax.random.normal(keys[4], (ksz * ksz * c,), jnp.float32) * 0.1

    def bn_params(k, n):
        k1, k2, k3, k4 = jax.random.split(k, 4)
        gamma = 1.0 + 0.1 * jax.random.normal(k1, (n,), jnp.float32)
        beta = 0.1 * jax.random.normal(k2, (n,), jnp.float32)
        mean = 0.1 * jax.random.normal(k3, (n,), jnp.float32)
        var = 1.0 + 0.5 * jax.random.uniform(k4, (n,), jnp.float32)
        return gamma, beta, mean, var

    return dict(wk=wk, wv=wv, w1=w1, w2=w2, b2=b2,
                bn_k=bn_params(keys[5], c),
                bn_v=bn_params(keys[6], c),
                bn_a=bn_params(keys[7], 2 * c // 4))


def fold_params(p, dim, kernel_size, eps=1e-5):
    """Exact f32 folds: eval-mode BN -> scale/shift, k*k mean -> conv2 weights."""
    c, ksz = dim, kernel_size
    c2 = 2 * c // 4

    def bn_scale_shift(bn):
        g, b, m, v = bn
        scale = g / jnp.sqrt(v + eps)
        return scale, b - m * scale

    wk9 = jnp.transpose(p['wk'], (2, 3, 1, 0)).reshape(ksz * ksz, c, c)  # (tap, in, out)
    wv = p['wv'][:, :, 0, 0].T                                           # (c, c)
    w1 = p['w1'][:, :, 0, 0].T                                           # (2c, c2)
    w1k, w1x = w1[:c], w1[c:]
    w2 = p['w2'][:, :, 0, 0].T                                           # (c2, k*k*c)
    w2_avg = w2.reshape(c2, c, ksz * ksz).mean(-1)                       # (c2, c)
    b2_avg = p['b2'].reshape(c, ksz * ksz).mean(-1)                      # (c,)

    ks, kb = bn_scale_shift(p['bn_k'])
    vs, vb = bn_scale_shift(p['bn_v'])
    a1s, a1b = bn_scale_shift(p['bn_a'])
    return dict(wk9=wk9, ks=ks, kb=kb, wv=wv, vs=vs, vb=vb,
                w1k=w1k, w1x=w1x, a1s=a1s, a1b=a1b, w2=w2_avg, b2=b2_avg)


def pack_params(f, dim):
    """Lane-pad channels to multiples of 128, cast matmul weights to bf16."""
    c = dim
    c2 = f['w1k'].shape[1]
    cp = _round_up(c, LANE)
    cap = _round_up(c2, LANE)

    def pad2(a, r, k):
        return jnp.pad(a, ((0, r - a.shape[0]), (0, k - a.shape[1])))

    def padrow(a, k):
        return jnp.pad(a, (0, k - a.shape[0])).reshape(1, k)

    # per-tap key-embed weights, kept as (9, Cp, Cp) for per-tap MXU matmuls
    wk = jnp.pad(f['wk9'], ((0, 0), (0, cp - c), (0, cp - c))).astype(jnp.bfloat16)
    wva1x = jnp.concatenate([pad2(f['wv'], cp, cp), pad2(f['w1x'], cp, cap)],
                            axis=1).astype(jnp.bfloat16)
    return dict(
        cp=cp, cap=cap,
        wk=wk,
        ks=padrow(f['ks'], cp).astype(jnp.float32),
        kb=padrow(f['kb'], cp).astype(jnp.float32),
        wva1x=wva1x,
        vs=padrow(f['vs'], cp).astype(jnp.float32),
        vb=padrow(f['vb'], cp).astype(jnp.float32),
        w1k=pad2(f['w1k'], cp, cap).astype(jnp.bfloat16),
        a1s=padrow(f['a1s'], cap).astype(jnp.float32),
        a1b=padrow(f['a1b'], cap).astype(jnp.float32),
        w2=pad2(f['w2'], cap, cp).astype(jnp.bfloat16),
        b2=padrow(f['b2'], cp).astype(jnp.float32),
    )


# ------------------------- pure-JAX reference (f32) ------------------------ #
def ref_forward(x, p, dim, kernel_size, eps=1e-5):
    c, ksz = dim, kernel_size
    bs, _, h, w = x.shape
    dn = ('NCHW', 'OIHW', 'NCHW')

    def bn(y, bnp):
        g, b, m, v = bnp
        return ((y - m[None, :, None, None]) / jnp.sqrt(v[None, :, None, None] + eps)
                * g[None, :, None, None] + b[None, :, None, None])

    k1 = lax.conv_general_dilated(x, p['wk'], (1, 1), [(1, 1), (1, 1)],
                                  dimension_numbers=dn)
    k1 = jax.nn.relu(bn(k1, p['bn_k']))
    v = lax.conv_general_dilated(x, p['wv'], (1, 1), 'VALID', dimension_numbers=dn)
    v = bn(v, p['bn_v']).reshape(bs, c, -1)
    y = jnp.concatenate([k1, x], axis=1)
    a1 = lax.conv_general_dilated(y, p['w1'], (1, 1), 'VALID', dimension_numbers=dn)
    a1 = jax.nn.relu(bn(a1, p['bn_a']))
    att = lax.conv_general_dilated(a1, p['w2'], (1, 1), 'VALID', dimension_numbers=dn)
    att = att + p['b2'][None, :, None, None]
    att = att.reshape(bs, c, ksz * ksz, h, w).mean(2).reshape(bs, c, -1)
    k2 = jax.nn.softmax(att, axis=-1) * v
    return k1 + k2.reshape(bs, c, h, w)


if __name__ == "__main__":
    dim, ksz = 4, 3
    bs, h, w = 2, 16, 16

    key = jax.random.PRNGKey(0)
    kx, kp = jax.random.split(key)
    x = jax.random.normal(kx, (bs, dim, h, w), jnp.float32)

    params = init_params(kp, dim, ksz)
    folded = fold_params(params, dim, ksz)
    packed = pack_params(folded, dim)

    # Small tile target so the test exercises multiple row-tiles (n_t=2) and
    # therefore the online (two-pass) softmax path.
    out = cot_layer_pallas(x, packed, tile_rows_target=128)
    out = jax.block_until_ready(out)

    ref = ref_forward(x, params, dim, ksz)
    assert out.shape == (bs, dim, h, w)
    max_err = float(jnp.max(jnp.abs(out - ref)))
    # bf16 MXU / bf16 stash path vs all-f32 reference -> relaxed tolerance.
    assert jnp.allclose(out, ref, rtol=3e-2, atol=3e-2), f"max abs err={max_err}"
    print("KERNEL_OK")
</pallas_src>

<mosaic_0001>
module attributes {stable_mosaic.version = 11 : i64} {
  func.func @kernel(%arg0: i32, %arg1: memref<1x18x18x128xbf16, #tpu.memory_space<vmem>>, %arg2: memref<9x128x128xbf16, #tpu.memory_space<vmem>>, %arg3: memref<1x128xf32, #tpu.memory_space<vmem>>, %arg4: memref<1x128xf32, #tpu.memory_space<vmem>>, %arg5: memref<128x256xbf16, #tpu.memory_space<vmem>>, %arg6: memref<1x128xf32, #tpu.memory_space<vmem>>, %arg7: memref<1x128xf32, #tpu.memory_space<vmem>>, %arg8: memref<128x128xbf16, #tpu.memory_space<vmem>>, %arg9: memref<1x128xf32, #tpu.memory_space<vmem>>, %arg10: memref<1x128xf32, #tpu.memory_space<vmem>>, %arg11: memref<128x128xbf16, #tpu.memory_space<vmem>>, %arg12: memref<1x128xf32, #tpu.memory_space<vmem>>, %arg13: memref<1x256x128xf32, #tpu.memory_space<vmem>>, %arg14: memref<256x128xbf16, #tpu.memory_space<vmem>>, %arg15: memref<256x128xbf16, #tpu.memory_space<vmem>>, %arg16: memref<2x128xf32, #tpu.memory_space<vmem>>, %arg17: memref<1x128xf32, #tpu.memory_space<vmem>>, %arg18: memref<1x128xf32, #tpu.memory_space<vmem>>) attributes {dimension_semantics = [#tpu.dimension_semantics<parallel>], iteration_bounds = array<i64: 2>, scalar_prefetch = 0 : i64, scratch_operands = 5 : i64, tpu.core_type = #tpu.core_type<tc>, window_params = [{transform_indices = @transform_0, window_bounds = array<i64: 1, 18, 18, 128>}, {pipeline_mode = #tpu.pipeline_mode<synchronous>, transform_indices = @transform_1, window_bounds = array<i64: 9, 128, 128>}, {pipeline_mode = #tpu.pipeline_mode<synchronous>, transform_indices = @transform_2, window_bounds = array<i64: 1, 128>}, {pipeline_mode = #tpu.pipeline_mode<synchronous>, transform_indices = @transform_3, window_bounds = array<i64: 1, 128>}, {pipeline_mode = #tpu.pipeline_mode<synchronous>, transform_indices = @transform_4, window_bounds = array<i64: 128, 256>}, {pipeline_mode = #tpu.pipeline_mode<synchronous>, transform_indices = @transform_5, window_bounds = array<i64: 1, 128>}, {pipeline_mode = #tpu.pipeline_mode<synchronous>, transform_indices = @transform_6, window_bounds = array<i64: 1, 128>}, {pipeline_mode = #tpu.pipeline_mode<synchronous>, transform_indices = @transform_7, window_bounds = array<i64: 128, 128>}, {pipeline_mode = #tpu.pipeline_mode<synchronous>, transform_indices = @transform_8, window_bounds = array<i64: 1, 128>}, {pipeline_mode = #tpu.pipeline_mode<synchronous>, transform_indices = @transform_9, window_bounds = array<i64: 1, 128>}, {pipeline_mode = #tpu.pipeline_mode<synchronous>, transform_indices = @transform_10, window_bounds = array<i64: 128, 128>}, {pipeline_mode = #tpu.pipeline_mode<synchronous>, transform_indices = @transform_11, window_bounds = array<i64: 1, 128>}, {transform_indices = @transform_12, window_bounds = array<i64: 1, 256, 128>}]} {
    %cst = arith.constant 0xFF800000 : f32
    %0 = vector.broadcast %cst : f32 to vector<1x128xf32>
    %c0 = arith.constant 0 : index
    %c0_0 = arith.constant 0 : index
    %1 = vector.load %arg17[%c0, %c0_0] : memref<1x128xf32, #tpu.memory_space<vmem>>, vector<1x128xf32>
    tpu.vector_store %arg17[%c0, %c0_0], %0 {strides = array<i32>} : memref<1x128xf32, #tpu.memory_space<vmem>>, vector<1x128xf32>,
    %cst_1 = arith.constant 0.000000e+00 : f32
    %2 = vector.broadcast %cst_1 : f32 to vector<1x128xf32>
    %c0_2 = arith.constant 0 : index
    %c0_3 = arith.constant 0 : index
    %3 = vector.load %arg18[%c0_2, %c0_3] : memref<1x128xf32, #tpu.memory_space<vmem>>, vector<1x128xf32>
    tpu.vector_store %arg18[%c0_2, %c0_3], %2 {strides = array<i32>} : memref<1x128xf32, #tpu.memory_space<vmem>>, vector<1x128xf32>,
    %c0_i32 = arith.constant 0 : i32
    %c2_i32 = arith.constant 2 : i32
    %4 = arith.addi %c0_i32, %c2_i32 : i32
    %c1_i32 = arith.constant 1 : i32
    scf.for %arg19 = %c0_i32 to %4 step %c1_i32  : i32 {
      %c1_i32_9 = arith.constant 1 : i32
      %6 = arith.muli %arg19, %c1_i32_9 : i32
      %c0_i32_10 = arith.constant 0 : i32
      %7 = arith.addi %c0_i32_10, %6 : i32
      %c8_i32 = arith.constant 8 : i32
      %8 = arith.muli %7, %c8_i32 : i32
      %c128_i32 = arith.constant 128 : i32
      %9 = arith.muli %7, %c128_i32 : i32
      %10 = tpu.assume_multiple %9, 128 : i32
      %c0_i32_11 = arith.constant 0 : i32
      %11 = arith.addi %8, %c0_i32_11 : i32
      %c0_12 = arith.constant 0 : index
      %12 = arith.index_cast %11 : i32 to index
      %c0_13 = arith.constant 0 : index
      %c0_14 = arith.constant 0 : index
      %13 = vector.load %arg1[%c0_12, %12, %c0_13, %c0_14] : memref<1x18x18x128xbf16, #tpu.memory_space<vmem>>, vector<1x8x16x128xbf16>
      %14 = vector.shape_cast %13 : vector<1x8x16x128xbf16> to vector<8x16x128xbf16>
      %15 = vector.shape_cast %14 : vector<8x16x128xbf16> to vector<128x128xbf16>
      %c0_15 = arith.constant 0 : index
      %c0_16 = arith.constant 0 : index
      %c0_17 = arith.constant 0 : index
      %16 = vector.load %arg2[%c0_15, %c0_16, %c0_17] : memref<9x128x128xbf16, #tpu.memory_space<vmem>>, vector<1x128x128xbf16>
      %17 = vector.shape_cast %16 : vector<1x128x128xbf16> to vector<128x128xbf16>
      %cst_18 = arith.constant dense<0.000000e+00> : vector<128x128xf32>
      %18 = tpu.matmul %15, %17, %cst_18 {dimension_numbers = #tpu.dot_dimension_numbers<[1], [0], [0], [1], [0, 0, 1, 1], [], []>} : vector<128x128xbf16>, vector<128x128xbf16>, vector<128x128xf32> -> vector<128x128xf32>
      %c0_i32_19 = arith.constant 0 : i32
      %19 = arith.addi %8, %c0_i32_19 : i32
      %c0_20 = arith.constant 0 : index
      %20 = arith.index_cast %19 : i32 to index
      %c1 = arith.constant 1 : index
      %c0_21 = arith.constant 0 : index
      %21 = vector.load %arg1[%c0_20, %20, %c1, %c0_21] : memref<1x18x18x128xbf16, #tpu.memory_space<vmem>>, vector<1x8x16x128xbf16>
      %22 = vector.shape_cast %21 : vector<1x8x16x128xbf16> to vector<8x16x128xbf16>
      %23 = vector.shape_cast %22 : vector<8x16x128xbf16> to vector<128x128xbf16>
      %c1_22 = arith.constant 1 : index
      %c0_23 = arith.constant 0 : index
      %c0_24 = arith.constant 0 : index
      %24 = vector.load %arg2[%c1_22, %c0_23, %c0_24] : memref<9x128x128xbf16, #tpu.memory_space<vmem>>, vector<1x128x128xbf16>
      %25 = vector.shape_cast %24 : vector<1x128x128xbf16> to vector<128x128xbf16>
      %cst_25 = arith.constant dense<0.000000e+00> : vector<128x128xf32>
      %26 = tpu.matmul %23, %25, %cst_25 {dimension_numbers = #tpu.dot_dimension_numbers<[1], [0], [0], [1], [0, 0, 1, 1], [], []>} : vector<128x128xbf16>, vector<128x128xbf16>, vector<128x128xf32> -> vector<128x128xf32>
      %27 = arith.addf %18, %26 : vector<128x128xf32>
      %c0_i32_26 = arith.constant 0 : i32
      %28 = arith.addi %8, %c0_i32_26 : i32
      %c0_27 = arith.constant 0 : index
      %29 = arith.index_cast %28 : i32 to index
      %c2 = arith.constant 2 : index
      %c0_28 = arith.constant 0 : index
      %30 = vector.load %arg1[%c0_27, %29, %c2, %c0_28] : memref<1x18x18x128xbf16, #tpu.memory_space<vmem>>, vector<1x8x16x128xbf16>
      %31 = vector.shape_cast %30 : vector<1x8x16x128xbf16> to vector<8x16x128xbf16>
      %32 = vector.shape_cast %31 : vector<8x16x128xbf16> to vector<128x128xbf16>
      %c2_29 = arith.constant 2 : index
      %c0_30 = arith.constant 0 : index
      %c0_31 = arith.constant 0 : index
      %33 = vector.load %arg2[%c2_29, %c0_30, %c0_31] : memref<9x128x128xbf16, #tpu.memory_space<vmem>>, vector<1x128x128xbf16>
      %34 = vector.shape_cast %33 : vector<1x128x128xbf16> to vector<128x128xbf16>
      %cst_32 = arith.constant dense<0.000000e+00> : vector<128x128xf32>
      %35 = tpu.matmul %32, %34, %cst_32 {dimension_numbers = #tpu.dot_dimension_numbers<[1], [0], [0], [1], [0, 0, 1, 1], [], []>} : vector<128x128xbf16>, vector<128x128xbf16>, vector<128x128xf32> -> vector<128x128xf32>
      %36 = arith.addf %27, %35 : vector<128x128xf32>
      %c1_i32_33 = arith.constant 1 : i32
      %37 = arith.addi %8, %c1_i32_33 : i32
      %c0_34 = arith.constant 0 : index
      %38 = arith.index_cast %37 : i32 to index
      %c0_35 = arith.constant 0 : index
      %c0_36 = arith.constant 0 : index
      %39 = vector.load %arg1[%c0_34, %38, %c0_35, %c0_36] : memref<1x18x18x128xbf16, #tpu.memory_space<vmem>>, vector<1x8x16x128xbf16>
      %40 = vector.shape_cast %39 : vector<1x8x16x128xbf16> to vector<8x16x128xbf16>
      %41 = vector.shape_cast %40 : vector<8x16x128xbf16> to vector<128x128xbf16>
      %c3 = arith.constant 3 : index
      %c0_37 = arith.constant 0 : index
      %c0_38 = arith.constant 0 : index
      %42 = vector.load %arg2[%c3, %c0_37, %c0_38] : memref<9x128x128xbf16, #tpu.memory_space<vmem>>, vector<1x128x128xbf16>
      %43 = vector.shape_cast %42 : vector<1x128x128xbf16> to vector<128x128xbf16>
      %cst_39 = arith.constant dense<0.000000e+00> : vector<128x128xf32>
      %44 = tpu.matmul %41, %43, %cst_39 {dimension_numbers = #tpu.dot_dimension_numbers<[1], [0], [0], [1], [0, 0, 1, 1], [], []>} : vector<128x128xbf16>, vector<128x128xbf16>, vector<128x128xf32> -> vector<128x128xf32>
      %45 = arith.addf %36, %44 : vector<128x128xf32>
      %c1_i32_40 = arith.constant 1 : i32
      %46 = arith.addi %8, %c1_i32_40 : i32
      %c0_41 = arith.constant 0 : index
      %47 = arith.index_cast %46 : i32 to index
      %c1_42 = arith.constant 1 : index
      %c0_43 = arith.constant 0 : index
      %48 = vector.load %arg1[%c0_41, %47, %c1_42, %c0_43] : memref<1x18x18x128xbf16, #tpu.memory_space<vmem>>, vector<1x8x16x128xbf16>
      %49 = vector.shape_cast %48 : vector<1x8x16x128xbf16> to vector<8x16x128xbf16>
      %50 = vector.shape_cast %49 : vector<8x16x128xbf16> to vector<128x128xbf16>
      %c4 = arith.constant 4 : index
      %c0_44 = arith.constant 0 : index
      %c0_45 = arith.constant 0 : index
      %51 = vector.load %arg2[%c4, %c0_44, %c0_45] : memref<9x128x128xbf16, #tpu.memory_space<vmem>>, vector<1x128x128xbf16>
      %52 = vector.shape_cast %51 : vector<1x128x128xbf16> to vector<128x128xbf16>
      %cst_46 = arith.constant dense<0.000000e+00> : vector<128x128xf32>
      %53 = tpu.matmul %50, %52, %cst_46 {dimension_numbers = #tpu.dot_dimension_numbers<[1], [0], [0], [1], [0, 0, 1, 1], [], []>} : vector<128x128xbf16>, vector<128x128xbf16>, vector<128x128xf32> -> vector<128x128xf32>
      %54 = arith.addf %45, %53 : vector<128x128xf32>
      %c1_i32_47 = arith.constant 1 : i32
      %55 = arith.addi %8, %c1_i32_47 : i32
      %c0_48 = arith.constant 0 : index
      %56 = arith.index_cast %55 : i32 to index
      %c2_49 = arith.constant 2 : index
      %c0_50 = arith.constant 0 : index
      %57 = vector.load %arg1[%c0_48, %56, %c2_49, %c0_50] : memref<1x18x18x128xbf16, #tpu.memory_space<vmem>>, vector<1x8x16x128xbf16>
      %58 = vector.shape_cast %57 : vector<1x8x16x128xbf16> to vector<8x16x128xbf16>
      %59 = vector.shape_cast %58 : vector<8x16x128xbf16> to vector<128x128xbf16>
      %c5 = arith.constant 5 : index
      %c0_51 = arith.constant 0 : index
      %c0_52 = arith.constant 0 : index
      %60 = vector.load %arg2[%c5, %c0_51, %c0_52] : memref<9x128x128xbf16, #tpu.memory_space<vmem>>, vector<1x128x128xbf16>
      %61 = vector.shape_cast %60 : vector<1x128x128xbf16> to vector<128x128xbf16>
      %cst_53 = arith.constant dense<0.000000e+00> : vector<128x128xf32>
      %62 = tpu.matmul %59, %61, %cst_53 {dimension_numbers = #tpu.dot_dimension_numbers<[1], [0], [0], [1], [0, 0, 1, 1], [], []>} : vector<128x128xbf16>, vector<128x128xbf16>, vector<128x128xf32> -> vector<128x128xf32>
      %63 = arith.addf %54, %62 : vector<128x128xf32>
      %c2_i32_54 = arith.constant 2 : i32
      %64 = arith.addi %8, %c2_i32_54 : i32
      %c0_55 = arith.constant 0 : index
      %65 = arith.index_cast %64 : i32 to index
      %c0_56 = arith.constant 0 : index
      %c0_57 = arith.constant 0 : index
      %66 = vector.load %arg1[%c0_55, %65, %c0_56, %c0_57] : memref<1x18x18x128xbf16, #tpu.memory_space<vmem>>, vector<1x8x16x128xbf16>
      %67 = vector.shape_cast %66 : vector<1x8x16x128xbf16> to vector<8x16x128xbf16>
      %68 = vector.shape_cast %67 : vector<8x16x128xbf16> to vector<128x128xbf16>
      %c6 = arith.constant 6 : index
      %c0_58 = arith.constant 0 : index
      %c0_59 = arith.constant 0 : index
      %69 = vector.load %arg2[%c6, %c0_58, %c0_59] : memref<9x128x128xbf16, #tpu.memory_space<vmem>>, vector<1x128x128xbf16>
      %70 = vector.shape_cast %69 : vector<1x128x128xbf16> to vector<128x128xbf16>
      %cst_60 = arith.constant dense<0.000000e+00> : vector<128x128xf32>
      %71 = tpu.matmul %68, %70, %cst_60 {dimension_numbers = #tpu.dot_dimension_numbers<[1], [0], [0], [1], [0, 0, 1, 1], [], []>} : vector<128x128xbf16>, vector<128x128xbf16>, vector<128x128xf32> -> vector<128x128xf32>
      %72 = arith.addf %63, %71 : vector<128x128xf32>
      %c2_i32_61 = arith.constant 2 : i32
      %73 = arith.addi %8, %c2_i32_61 : i32
      %c0_62 = arith.constant 0 : index
      %74 = arith.index_cast %73 : i32 to index
      %c1_63 = arith.constant 1 : index
      %c0_64 = arith.constant 0 : index
      %75 = vector.load %arg1[%c0_62, %74, %c1_63, %c0_64] : memref<1x18x18x128xbf16, #tpu.memory_space<vmem>>, vector<1x8x16x128xbf16>
      %76 = vector.shape_cast %75 : vector<1x8x16x128xbf16> to vector<8x16x128xbf16>
      %77 = vector.shape_cast %76 : vector<8x16x128xbf16> to vector<128x128xbf16>
      %c7 = arith.constant 7 : index
      %c0_65 = arith.constant 0 : index
      %c0_66 = arith.constant 0 : index
      %78 = vector.load %arg2[%c7, %c0_65, %c0_66] : memref<9x128x128xbf16, #tpu.memory_space<vmem>>, vector<1x128x128xbf16>
      %79 = vector.shape_cast %78 : vector<1x128x128xbf16> to vector<128x128xbf16>
      %cst_67 = arith.constant dense<0.000000e+00> : vector<128x128xf32>
      %80 = tpu.matmul %77, %79, %cst_67 {dimension_numbers = #tpu.dot_dimension_numbers<[1], [0], [0], [1], [0, 0, 1, 1], [], []>} : vector<128x128xbf16>, vector<128x128xbf16>, vector<128x128xf32> -> vector<128x128xf32>
      %81 = arith.addf %72, %80 : vector<128x128xf32>
      %c2_i32_68 = arith.constant 2 : i32
      %82 = arith.addi %8, %c2_i32_68 : i32
      %c0_69 = arith.constant 0 : index
      %83 = arith.index_cast %82 : i32 to index
      %c2_70 = arith.constant 2 : index
      %c0_71 = arith.constant 0 : index
      %84 = vector.load %arg1[%c0_69, %83, %c2_70, %c0_71] : memref<1x18x18x128xbf16, #tpu.memory_space<vmem>>, vector<1x8x16x128xbf16>
      %85 = vector.shape_cast %84 : vector<1x8x16x128xbf16> to vector<8x16x128xbf16>
      %86 = vector.shape_cast %85 : vector<8x16x128xbf16> to vector<128x128xbf16>
      %c8 = arith.constant 8 : index
      %c0_72 = arith.constant 0 : index
      %c0_73 = arith.constant 0 : index
      %87 = vector.load %arg2[%c8, %c0_72, %c0_73] : memref<9x128x128xbf16, #tpu.memory_space<vmem>>, vector<1x128x128xbf16>
      %88 = vector.shape_cast %87 : vector<1x128x128xbf16> to vector<128x128xbf16>
      %cst_74 = arith.constant dense<0.000000e+00> : vector<128x128xf32>
      %89 = tpu.matmul %86, %88, %cst_74 {dimension_numbers = #tpu.dot_dimension_numbers<[1], [0], [0], [1], [0, 0, 1, 1], [], []>} : vector<128x128xbf16>, vector<128x128xbf16>, vector<128x128xf32> -> vector<128x128xf32>
      %90 = arith.addf %81, %89 : vector<128x128xf32>
      %c0_75 = arith.constant 0 : index
      %c0_76 = arith.constant 0 : index
      %91 = vector.load %arg3[%c0_75, %c0_76] : memref<1x128xf32, #tpu.memory_space<vmem>>, vector<1x128xf32>
      %92 = vector.broadcast %91 : vector<1x128xf32> to vector<128x128xf32>
      %93 = arith.mulf %90, %92 : vector<128x128xf32>
      %c0_77 = arith.constant 0 : index
      %c0_78 = arith.constant 0 : index
      %94 = vector.load %arg4[%c0_77, %c0_78] : memref<1x128xf32, #tpu.memory_space<vmem>>, vector<1x128xf32>
      %95 = vector.broadcast %94 : vector<1x128xf32> to vector<128x128xf32>
      %96 = arith.addf %93, %95 : vector<128x128xf32>
      %cst_79 = arith.constant 0.000000e+00 : f32
      %97 = vector.broadcast %cst_79 : f32 to vector<128x128xf32>
      %98 = arith.maximumf %96, %97 : vector<128x128xf32>
      %99 = arith.truncf %98 : vector<128x128xf32> to vector<128x128xbf16>
      %c0_80 = arith.constant 0 : index
      %c0_81 = arith.constant 0 : index
      %100 = vector.load %arg5[%c0_80, %c0_81] : memref<128x256xbf16, #tpu.memory_space<vmem>>, vector<128x256xbf16>
      %cst_82 = arith.constant dense<0.000000e+00> : vector<128x256xf32>
      %101 = tpu.matmul %50, %100, %cst_82 {dimension_numbers = #tpu.dot_dimension_numbers<[1], [0], [0], [1], [0, 0, 1, 1], [], []>} : vector<128x128xbf16>, vector<128x256xbf16>, vector<128x256xf32> -> vector<128x256xf32>
      %102 = vector.extract_strided_slice %101 {offsets = [0, 0], sizes = [128, 128], strides = [1, 1]} : vector<128x256xf32> to vector<128x128xf32>
      %c0_83 = arith.constant 0 : index
      %c0_84 = arith.constant 0 : index
      %103 = vector.load %arg6[%c0_83, %c0_84] : memref<1x128xf32, #tpu.memory_space<vmem>>, vector<1x128xf32>
      %104 = vector.broadcast %103 : vector<1x128xf32> to vector<128x128xf32>
      %105 = arith.mulf %102, %104 : vector<128x128xf32>
      %c0_85 = arith.constant 0 : index
      %c0_86 = arith.constant 0 : index
      %106 = vector.load %arg7[%c0_85, %c0_86] : memref<1x128xf32, #tpu.memory_space<vmem>>, vector<1x128xf32>
      %107 = vector.broadcast %106 : vector<1x128xf32> to vector<128x128xf32>
      %108 = arith.addf %105, %107 : vector<128x128xf32>
      %109 = vector.extract_strided_slice %101 {offsets = [0, 128], sizes = [128, 128], strides = [1, 1]} : vector<128x256xf32> to vector<128x128xf32>
      %c0_87 = arith.constant 0 : index
      %c0_88 = arith.constant 0 : index
      %110 = vector.load %arg8[%c0_87, %c0_88] : memref<128x128xbf16, #tpu.memory_space<vmem>>, vector<128x128xbf16>
      %cst_89 = arith.constant dense<0.000000e+00> : vector<128x128xf32>
      %111 = tpu.matmul %99, %110, %cst_89 {dimension_numbers = #tpu.dot_dimension_numbers<[1], [0], [0], [1], [0, 0, 1, 1], [], []>} : vector<128x128xbf16>, vector<128x128xbf16>, vector<128x128xf32> -> vector<128x128xf32>
      %112 = arith.addf %109, %111 : vector<128x128xf32>
      %c0_90 = arith.constant 0 : index
      %c0_91 = arith.constant 0 : index
      %113 = vector.load %arg9[%c0_90, %c0_91] : memref<1x128xf32, #tpu.memory_space<vmem>>, vector<1x128xf32>
      %114 = vector.broadcast %113 : vector<1x128xf32> to vector<128x128xf32>
      %115 = arith.mulf %112, %114 : vector<128x128xf32>
      %c0_92 = arith.constant 0 : index
      %c0_93 = arith.constant 0 : index
      %116 = vector.load %arg10[%c0_92, %c0_93] : memref<1x128xf32, #tpu.memory_space<vmem>>, vector<1x128xf32>
      %117 = vector.broadcast %116 : vector<1x128xf32> to vector<128x128xf32>
      %118 = arith.addf %115, %117 : vector<128x128xf32>
      %cst_94 = arith.constant 0.000000e+00 : f32
      %119 = vector.broadcast %cst_94 : f32 to vector<128x128xf32>
      %120 = arith.maximumf %118, %119 : vector<128x128xf32>
      %121 = arith.truncf %120 : vector<128x128xf32> to vector<128x128xbf16>
      %c0_95 = arith.constant 0 : index
      %c0_96 = arith.constant 0 : index
      %122 = vector.load %arg11[%c0_95, %c0_96] : memref<128x128xbf16, #tpu.memory_space<vmem>>, vector<128x128xbf16>
      %cst_97 = arith.constant dense<0.000000e+00> : vector<128x128xf32>
      %123 = tpu.matmul %121, %122, %cst_97 {dimension_numbers = #tpu.dot_dimension_numbers<[1], [0], [0], [1], [0, 0, 1, 1], [], []>} : vector<128x128xbf16>, vector<128x128xbf16>, vector<128x128xf32> -> vector<128x128xf32>
      %c0_98 = arith.constant 0 : index
      %c0_99 = arith.constant 0 : index
      %124 = vector.load %arg12[%c0_98, %c0_99] : memref<1x128xf32, #tpu.memory_space<vmem>>, vector<1x128xf32>
      %125 = vector.broadcast %124 : vector<1x128xf32> to vector<128x128xf32>
      %126 = arith.addf %123, %125 : vector<128x128xf32>
      %cst_100 = arith.constant dense<0xFF800000> : vector<128xf32>
      %127 = vector.multi_reduction <maximumf>, %126, %cst_100 [0] : vector<128x128xf32> to vector<128xf32>
      %128 = vector.shape_cast %127 : vector<128xf32> to vector<1x128xf32>
      %129 = vector.broadcast %128 : vector<1x128xf32> to vector<128x128xf32>
      %130 = arith.subf %126, %129 : vector<128x128xf32>
      %131 = math.exp %130 : vector<128x128xf32>
      %cst_101 = arith.constant dense<0.000000e+00> : vector<128xf32>
      %132 = vector.multi_reduction <add>, %131, %cst_101 [0] : vector<128x128xf32> to vector<128xf32>
      %133 = vector.shape_cast %132 : vector<128xf32> to vector<1x128xf32>
      %134 = arith.index_cast %10 : i32 to index
      %c0_102 = arith.constant 0 : index
      %135 = vector.load %arg14[%134, %c0_102] : memref<256x128xbf16, #tpu.memory_space<vmem>>, vector<128x128xbf16>
      tpu.vector_store %arg14[%134, %c0_102], %99 {strides = array<i32>} : memref<256x128xbf16, #tpu.memory_space<vmem>>, vector<128x128xbf16>,
      %136 = arith.mulf %131, %108 : vector<128x128xf32>
      %137 = arith.truncf %136 : vector<128x128xf32> to vector<128x128xbf16>
      %138 = arith.index_cast %10 : i32 to index
      %c0_103 = arith.constant 0 : index
      %139 = vector.load %arg15[%138, %c0_103] : memref<256x128xbf16, #tpu.memory_space<vmem>>, vector<128x128xbf16>
      tpu.vector_store %arg15[%138, %c0_103], %137 {strides = array<i32>} : memref<256x128xbf16, #tpu.memory_space<vmem>>, vector<128x128xbf16>,
      %140 = arith.index_cast %7 : i32 to index
      %c0_104 = arith.constant 0 : index
      %141 = vector.load %arg16[%140, %c0_104] : memref<2x128xf32, #tpu.memory_space<vmem>>, vector<1x128xf32>
      tpu.vector_store %arg16[%140, %c0_104], %128 {strides = array<i32>} : memref<2x128xf32, #tpu.memory_space<vmem>>, vector<1x128xf32>,
      %c0_105 = arith.constant 0 : index
      %c0_106 = arith.constant 0 : index
      %142 = vector.load %arg17[%c0_105, %c0_106] : memref<1x128xf32, #tpu.memory_space<vmem>>, vector<1x128xf32>
      %143 = arith.maximumf %142, %128 : vector<1x128xf32>
      %c0_107 = arith.constant 0 : index
      %c0_108 = arith.constant 0 : index
      %144 = vector.load %arg18[%c0_107, %c0_108] : memref<1x128xf32, #tpu.memory_space<vmem>>, vector<1x128xf32>
      %145 = arith.subf %142, %143 : vector<1x128xf32>
      %146 = math.exp %145 : vector<1x128xf32>
      %147 = arith.mulf %144, %146 : vector<1x128xf32>
      %148 = arith.subf %128, %143 : vector<1x128xf32>
      %149 = math.exp %148 : vector<1x128xf32>
      %150 = arith.mulf %133, %149 : vector<1x128xf32>
      %151 = arith.addf %147, %150 : vector<1x128xf32>
      %c0_109 = arith.constant 0 : index
      %c0_110 = arith.constant 0 : index
      %152 = vector.load %arg18[%c0_109, %c0_110] : memref<1x128xf32, #tpu.memory_space<vmem>>, vector<1x128xf32>
      tpu.vector_store %arg18[%c0_109, %c0_110], %151 {strides = array<i32>} : memref<1x128xf32, #tpu.memory_space<vmem>>, vector<1x128xf32>,
      %c0_111 = arith.constant 0 : index
      %c0_112 = arith.constant 0 : index
      %153 = vector.load %arg17[%c0_111, %c0_112] : memref<1x128xf32, #tpu.memory_space<vmem>>, vector<1x128xf32>
      tpu.vector_store %arg17[%c0_111, %c0_112], %143 {strides = array<i32>} : memref<1x128xf32, #tpu.memory_space<vmem>>, vector<1x128xf32>,
    }
    %c2_i32_4 = arith.constant 2 : i32
    %c0_i32_5 = arith.constant 0 : i32
    %c2_i32_6 = arith.constant 2 : i32
    %5 = arith.addi %c0_i32_5, %c2_i32_6 : i32
    %c1_i32_7 = arith.constant 1 : i32
    scf.for %arg19 = %c0_i32_5 to %5 step %c1_i32_7  : i32 {
      %c1_i32_9 = arith.constant 1 : i32
      %6 = arith.muli %arg19, %c1_i32_9 : i32
      %c0_i32_10 = arith.constant 0 : i32
      %7 = arith.addi %c0_i32_10, %6 : i32
      %c128_i32 = arith.constant 128 : i32
      %8 = arith.muli %7, %c128_i32 : i32
      %9 = tpu.assume_multiple %8, 128 : i32
      %c0_11 = arith.constant 0 : index
      %c0_12 = arith.constant 0 : index
      %10 = vector.load %arg18[%c0_11, %c0_12] : memref<1x128xf32, #tpu.memory_space<vmem>>, vector<1x128xf32>
      %11 = tpu.reciprocal %10 {approx = true} : vector<1x128xf32> -> vector<1x128xf32>
      %12 = arith.index_cast %7 : i32 to index
      %c0_13 = arith.constant 0 : index
      %13 = vector.load %arg16[%12, %c0_13] : memref<2x128xf32, #tpu.memory_space<vmem>>, vector<1x128xf32>
      %c0_14 = arith.constant 0 : index
      %c0_15 = arith.constant 0 : index
      %14 = vector.load %arg17[%c0_14, %c0_15] : memref<1x128xf32, #tpu.memory_space<vmem>>, vector<1x128xf32>
      %15 = arith.subf %13, %14 : vector<1x128xf32>
      %16 = math.exp %15 : vector<1x128xf32>
      %17 = arith.mulf %16, %11 : vector<1x128xf32>
      %18 = arith.index_cast %9 : i32 to index
      %c0_16 = arith.constant 0 : index
      %19 = vector.load %arg14[%18, %c0_16] : memref<256x128xbf16, #tpu.memory_space<vmem>>, vector<128x128xbf16>
      %20 = arith.extf %19 : vector<128x128xbf16> to vector<128x128xf32>
      %21 = arith.index_cast %9 : i32 to index
      %c0_17 = arith.constant 0 : index
      %22 = vector.load %arg15[%21, %c0_17] : memref<256x128xbf16, #tpu.memory_space<vmem>>, vector<128x128xbf16>
      %23 = arith.extf %22 : vector<128x128xbf16> to vector<128x128xf32>
      %24 = vector.broadcast %17 : vector<1x128xf32> to vector<128x128xf32>
      %25 = arith.mulf %23, %24 : vector<128x128xf32>
      %26 = arith.addf %20, %25 : vector<128x128xf32>
      %c0_18 = arith.constant 0 : index
      %27 = arith.index_cast %9 : i32 to index
      %c0_19 = arith.constant 0 : index
      %28 = vector.load %arg13[%c0_18, %27, %c0_19] : memref<1x256x128xf32, #tpu.memory_space<vmem>>, vector<1x128x128xf32>
      %29 = vector.shape_cast %28 : vector<1x128x128xf32> to vector<128x128xf32>
      %30 = vector.shape_cast %26 : vector<128x128xf32> to vector<1x128x128xf32>
      tpu.vector_store %arg13[%c0_18, %27, %c0_19], %30 {strides = array<i32>} : memref<1x256x128xf32, #tpu.memory_space<vmem>>, vector<1x128x128xf32>,
    }
    %c2_i32_8 = arith.constant 2 : i32
    return
  }
  func.func @transform_0(%arg0: i32) -> (i32, i32, i32, i32) {
    %c0_i32 = arith.constant 0 : i32
    %c0_i32_0 = arith.constant 0 : i32
    %c0_i32_1 = arith.constant 0 : i32
    %c0_i32_2 = arith.constant 0 : i32
    return %arg0, %c0_i32, %c0_i32_0, %c0_i32_1 : i32, i32, i32, i32
  }
  func.func @transform_1(%arg0: i32) -> (i32, i32, i32) {
    %c0_i32 = arith.constant 0 : i32
    %c0_i32_0 = arith.constant 0 : i32
    %c0_i32_1 = arith.constant 0 : i32
    %c0_i32_2 = arith.constant 0 : i32
    return %c0_i32, %c0_i32_0, %c0_i32_1 : i32, i32, i32
  }
  func.func @transform_2(%arg0: i32) -> (i32, i32) {
    %c0_i32 = arith.constant 0 : i32
    %c0_i32_0 = arith.constant 0 : i32
    %c0_i32_1 = arith.constant 0 : i32
    return %c0_i32, %c0_i32_0 : i32, i32
  }
  func.func @transform_3(%arg0: i32) -> (i32, i32) {
    %c0_i32 = arith.constant 0 : i32
    %c0_i32_0 = arith.constant 0 : i32
    %c0_i32_1 = arith.constant 0 : i32
    return %c0_i32, %c0_i32_0 : i32, i32
  }
  func.func @transform_4(%arg0: i32) -> (i32, i32) {
    %c0_i32 = arith.constant 0 : i32
    %c0_i32_0 = arith.constant 0 : i32
    %c0_i32_1 = arith.constant 0 : i32
    return %c0_i32, %c0_i32_0 : i32, i32
  }
  func.func @transform_5(%arg0: i32) -> (i32, i32) {
    %c0_i32 = arith.constant 0 : i32
    %c0_i32_0 = arith.constant 0 : i32
    %c0_i32_1 = arith.constant 0 : i32
    return %c0_i32, %c0_i32_0 : i32, i32
  }
  func.func @transform_6(%arg0: i32) -> (i32, i32) {
    %c0_i32 = arith.constant 0 : i32
    %c0_i32_0 = arith.constant 0 : i32
    %c0_i32_1 = arith.constant 0 : i32
    return %c0_i32, %c0_i32_0 : i32, i32
  }
  func.func @transform_7(%arg0: i32) -> (i32, i32) {
    %c0_i32 = arith.constant 0 : i32
    %c0_i32_0 = arith.constant 0 : i32
    %c0_i32_1 = arith.constant 0 : i32
    return %c0_i32, %c0_i32_0 : i32, i32
  }
  func.func @transform_8(%arg0: i32) -> (i32, i32) {
    %c0_i32 = arith.constant 0 : i32
    %c0_i32_0 = arith.constant 0 : i32
    %c0_i32_1 = arith.constant 0 : i32
    return %c0_i32, %c0_i32_0 : i32, i32
  }
  func.func @transform_9(%arg0: i32) -> (i32, i32) {
    %c0_i32 = arith.constant 0 : i32
    %c0_i32_0 = arith.constant 0 : i32
    %c0_i32_1 = arith.constant 0 : i32
    return %c0_i32, %c0_i32_0 : i32, i32
  }
  func.func @transform_10(%arg0: i32) -> (i32, i32) {
    %c0_i32 = arith.constant 0 : i32
    %c0_i32_0 = arith.constant 0 : i32
    %c0_i32_1 = arith.constant 0 : i32
    return %c0_i32, %c0_i32_0 : i32, i32
  }
  func.func @transform_11(%arg0: i32) -> (i32, i32) {
    %c0_i32 = arith.constant 0 : i32
    %c0_i32_0 = arith.constant 0 : i32
    %c0_i32_1 = arith.constant 0 : i32
    return %c0_i32, %c0_i32_0 : i32, i32
  }
  func.func @transform_12(%arg0: i32) -> (i32, i32, i32) {
    %c0_i32 = arith.constant 0 : i32
    %c0_i32_0 = arith.constant 0 : i32
    %c0_i32_1 = arith.constant 0 : i32
    return %arg0, %c0_i32, %c0_i32_0 : i32, i32, i32
  }
}

</mosaic_0001>

<bundles_post_ra>
// kernel: tpu_custom_call.1
= control target key start
LH: loop header
LB: loop body
LE: loop exit
PB: predicated region body
PF: predicated region fallthrough
CT: control target
= control target key end

     0   :  { %s6995_s0 = inlined_call_operand.vmem [shape: bf16[2,18,18,128], index: 0, kind: input, shape index: {}]   ;;  %s6996_s1 = inlined_call_operand.vmem [shape: bf16[9,128,128], index: 1, kind: input, shape index: {}]   ;;  %s6997_s2 = inlined_call_operand.vmem [shape: f32[1,128], index: 2, kind: input, shape index: {}]   ;;  %s6998_s3 = inlined_call_operand.vmem [shape: f32[1,128], index: 3, kind: input, shape index: {}]   ;;  %s6999_s4 = inlined_call_operand.vmem [shape: bf16[128,256], index: 4, kind: input, shape index: {}]   ;;  %s7000_s5 = inlined_call_operand.vmem [shape: f32[1,128], index: 5, kind: input, shape index: {}]   ;;  %s7001_s6 = inlined_call_operand.vmem [shape: f32[1,128], index: 6, kind: input, shape index: {}]   ;;  %s7002_s7 = inlined_call_operand.hbm [shape: bf16[128,128], index: 7, kind: input, shape index: {}]   ;;  %s7003_s8 = inlined_call_operand.vmem [shape: f32[1,128], index: 8, kind: input, shape index: {}]   ;;  %s7004_s9 = inlined_call_operand.vmem [shape: f32[1,128], index: 9, kind: input, shape index: {}]   ;;  %s7005_s10 = inlined_call_operand.hbm [shape: bf16[128,128], index: 10, kind: input, shape index: {}]   ;;  %s7006_s11 = inlined_call_operand.vmem [shape: f32[1,128], index: 11, kind: input, shape index: {}]   ;;  %s7007_s12 = inlined_call_operand.hbm [shape: f32[2,256,128], index: 12, kind: output, shape index: {}]  }
   0x1   :  { %7015 = sst [smem:[#allocation20_spill]] %s6995_s0 }
   0x2   :  { %7016 = sst [smem:[#allocation21_spill]] %s6996_s1 }
   0x3   :  { %17 = vsyncpa [#allocation8], 0 }
   0x4   :  { %18 = vsyncpa [#allocation11], 0 }
   0x5   :  { %19 = vsyncpa [#allocation9], 0 }
   0x6   :  { %21 = vsyncpa [#allocation9 + $0x1], 0  ;;  %s5460_s21 = smov 0   ;;  %s5462_s22 = smov 0  }
   0x7   :  { %s5464_s23 = smov 0   ;;  %s5466_s24 = smov 0  }
   0x8 LB: > { %7017 = sst [smem:[#allocation16_spill]] %s5373_s23  ;;  %s5481_s25 = sadd.s32 4294967295, %s5377_s24   ;;  %s5377_s24 = sphi %s5466_s24, %s7035_s24   ;;  %s5373_s23 = sphi %s5464_s23, %s7037_s23   ;;  %s5369_s22 = sphi %s5462_s22, %s7039_s22   ;;  %s5365_s21 = sphi %s5460_s21, %s7038_s21  }
   0x9   : > { %s3990_s26 = sadd.s32 4294967294, %s5377_s24   ;;  %s5485_s27 = sadd.s32 1, %s5377_s24  }
   0xa   : > { %7018 = sst [smem:[#allocation17_spill]] %s5485_s27  ;;  %s291_s28 = sadd.s32 1, %s5373_s23 }
   0xb   : > { %s288_s29 = ssub.s32 %s5377_s24, %s5485_s27  ;;  %p301_p0 = scmp.ne.s32.totalorder %s5373_s23, %s5369_s22 }
   0xc   : > { %p289_p1 = scmp.eq.s32.totalorder %s288_s29, 0  ;;  %p302_p2 = scmp.eq.s32.totalorder %s5481_s25, 1 }
   0xd   : > { %p307_p3 = scmp.ne.s32.totalorder %s5369_s22, %s5365_s21  ;;  %p308_p4 = scmp.eq.s32.totalorder %s3990_s26, 1 }
   0xe   : > { %s5496_s30 = scalar_select %p289_p1, %s5373_s23, %s291_s28  }
   0xf   : > { %p5498_p5 = por %p302_p2, %p301_p0  ;;  %p5502_p6 = por %p308_p4, %p307_p3 }
  0x10   : > { %7019 = sst [smem:[#allocation18_spill]] %s5496_s30  ;;  %p3991_p7 = scmp.ge.s32.totalorder %s5377_s24, 1 }
  0x11   : > { %p315_p8 = scmp.lt.s32.totalorder %s5377_s24, 3  ;;  %p5126_p9 = scmp.eq.s32.totalorder %s5481_s25, 0 }
  0x12   : > { %s344_s18 = sshll.u32 %s7002_s7, 4  ;;  %s5387_s19 = smov [#allocation7]   ;;  %s345_s18 = int_to_ptr.hbm [resolvable:$true] %s344_s18 }
  0x13   : > { %p5509_p10 = pnand %p3991_p7, %p315_p8  ;;  %s346_s20 = sshll.u32 %s5387_s19, 4  ;;  %s347_s20 = int_to_ptr.vmem [resolvable:$true] %s346_s20 }
  0x14   : > { %s364_s29 = sshll.u32 %s7005_s10, 4  ;;  %s5388_s30 = smov 64   ;;  %s365_s29 = int_to_ptr.hbm [resolvable:$true] %s364_s29 }
  0x15   : > { %p5115_p11 = pneg %p5509_p10  ;;  %s5389_s23 = smov 4  }
  0x16   : > { %s5390_s27 = smov [#allocation10]   ;;  %393 = sbr.rel (%p5509_p10) target bundleno = 918 (0x396), region = 68 }
  0x17   : > { %p5116_p12 = pnand %p5126_p9, %p5115_p11  ;;  %s366_s16 = sshll.u32 %s5390_s27, 4  ;;  %s367_s16 = int_to_ptr.vmem [resolvable:$true] %s366_s16 }
  0x19   : > { %5118 = dma.hbm_to_vmem [thread:$0]  (!%p5116_p12), %s345_s18, 1024, %s347_s20, [#allocation8], %s5388_s30, %s5388_s30, %s5389_s23  }
  0x1a   : > { %5121 = dma.hbm_to_vmem [thread:$0]  (!%p5116_p12), %s365_s29, 1024, %s367_s16, [#allocation11], %s5388_s30, %s5388_s30, %s5389_s23  }
  0x1b   : > { %5352 = dma.done.wait (%p5126_p9), [#allocation8], 1024  }
  0x1c   : > { %5354 = vsyncadd (%p5126_p9), [#allocation8], 4294966272 }
  0x1d   : > { %5356 = dma.done.wait (%p5126_p9), [#allocation11], 1024  }
  0x1e   : > { %5358 = vsyncadd (%p5126_p9), [#allocation11], 4294966272  ;;  %s7011_s23 = sand.u32 1, %s5369_s22   ;;  %p441_p13 = scmp.lt.s32.totalorder %s5481_s25, 1  ;;  %v5391_v0 = vmov -inf   ;;  %v5392_v1 = vmov 0.0  }
  0x1f   : > { %s5537_s27 = sshll.u32 %s7011_s23, 8  ;;  %446 = vst [vmem:[#allocation5] sm:$0x1] %v5391_v0  ;;  %s7023_s0 = sld [smem:[#allocation20_spill]] }
  0x20   : > { %447 = vst [vmem:[#allocation6] sm:$0x1] %v5392_v1  ;;  %s442_s30 = scalar_select %p441_p13, %s5481_s25, 1 }
  0x21   : > { %s5546_s26 = smov 0  }
  0x22   : > { %s5104_s15 = smul.u32 216, %s442_s30 }
  0x25   : > { %s5543_s19 = scalar_lea.vmem %s7023_s0, %s5104_s15 }
  0x26 LB: >> { %s7024_s1 = sld [smem:[#allocation21_spill]]  ;;  %s4778_s15 = smul.u32 96, %s5381_s26  ;;  %vm499_vm0 = vsmask.f32 3328  ;;  %vm500_vm1 = vsmask.f32 7440  ;;  %s5381_s26 = sphi %s5546_s26, %s453_s26  }
  0x27   : >> { %vm5591_vm2 = vmor %vm499_vm0, %vm500_vm1  ;;  %vm1009_vm3 = vcmask 1042432   ;;  %vm1010_vm4 = vcmask 1046532   ;;  %s4001_s16 = sshll.u32 %s5381_s26, 7  ;;  %s3706_s18 = scalar_lea.vmem [#allocation4], %s5381_s26 }
  0x28   : >> { %s5562_s23 = scalar_lea.vmem %s5543_s19, %s4778_s15  ;;  %vm5802_vm5 = vmor %vm1009_vm3, %vm1010_vm4  ;;  %s6504_s20 = sshra.s32 %s4001_s16, 3 }
  0x29   : >> { %v463_v5 = vld [vmem:[%s5562_s23 + $0x18] sm:$0xf]  ;;  %v5566_v6 = vld [vmem:[%s5562_s23 + $0x1c] sm:$0xf]  ;;  %v5569_v7 = vld [vmem:[%s5562_s23 + $0x20] sm:$0x1] }
  0x2a   : >> { %v551_v8 = vshrl.u32 %v463_v5, 16  ;;  %v554_v9 = vshll.u32 %v463_v5, 16  ;;  %v560_v10 = vshll.u32 %v5566_v6, 16  ;;  %v564_v11 = vshrl.u32 %v5566_v6, 16  ;;  %v467_v12 = vld [vmem:[%s5562_s23 + $0x30] sm:$0xf] }
  0x2b   : >> { %v570_v13 = vshll.u32 %v5569_v7, 16  ;;  %v5576_v14 = vld [vmem:[%s5562_s23 + $0x34] sm:$0xf]  ;;  %v5579_v15 = vld [vmem:[%s5562_s23 + $0x38] sm:$0x1]  ;;  %v599_v16 = vshrl.u32 %v467_v12, 16 }
  0x2c   : >> { %v4802_v2 = vld [vmem:[%s7024_s1 + $0x78] sm:$0xff]  ;;  %v4801_v3 = vld [vmem:[%s7024_s1 + $0x70] sm:$0xff]  ;;  %v4800_v4 = vld [vmem:[%s7024_s1 + $0x68] sm:$0xff]  ;;  %v553_v17 = vrot.slane %v551_v8, 4  ;;  %v556_v18 = vrot.slane %v554_v9, 5  ;;  %v562_v19 = vrot.slane %v560_v10, 5 }
  0x2d   : >> { %5080 = vmatpush.bf16.msra.mxu1 %v4802_v2  ;;  %5081 = vmatpush.bf16.msra.mxu2 %v4802_v2  ;;  %v566_v20 = vrot.slane %v564_v11, 4  ;;  %v471_v21 = vld [vmem:[%s5562_s23 + $0x48] sm:$0xf]  ;;  %v572_v22 = vrot.slane %v570_v13, 5  ;;  %v601_v23 = vrot.slane %v599_v16, 4  ;;  %v602_v24 = vshll.u32 %v467_v12, 16 }
  0x2e   : >> { %5082 = vmatpush.bf16.msra.mxu3 %v4802_v2  ;;  %791 = vmatpush.bf16.msra.mxu0 %v4802_v2  ;;  %v608_v25 = vshll.u32 %v5576_v14, 16  ;;  %v4799_v26 = vld [vmem:[%s7024_s1 + $0x60] sm:$0xff]  ;;  %v557_v27 = vor.u32 %v556_v18, %v553_v17  ;;  %v612_v29 = vshrl.u32 %v5576_v14, 16  ;;  %v618_v30 = vshll.u32 %v5579_v15, 16  ;;  %v472_v31 = vld [vmem:[%s5562_s23 + $0x4c] sm:$0xf] }
  0x2f   : >> { %v567_v28 = vor.u32 %v566_v20, %v562_v19  ;;  %v604_v33 = vrot.slane %v602_v24, 5  ;;  %v647_v35 = vshrl.u32 %v471_v21, 16  ;;  %v650_v36 = vshll.u32 %v471_v21, 16  ;;  %v497_v41 = vld [vmem:[%s5562_s23 + $0x50] sm:$0x1]  ;;  %v4798_v45 = vld [vmem:[%s7024_s1 + $0x58] sm:$0xff] }
  0x30   : >> { %v610_v34 = vrot.slane %v608_v25, 5  ;;  %v558_v37 = vrot.slane %v557_v27, 4  ;;  %v614_v39 = vrot.slane %v612_v29, 4  ;;  %v656_v44 = vshll.u32 %v472_v31, 16  ;;  %v459_v50 = vld [vmem:[%s5562_s23] sm:$0xf] }
  0x31   : >> { %5083 = vmatpush.bf16.msra.mxu1 %v4801_v3  ;;  %5084 = vmatpush.bf16.msra.mxu2 %v4801_v3  ;;  %v568_v38 = vrot.slane %v567_v28, 4  ;;  %v605_v40 = vor.u32 %v604_v33, %v601_v23  ;;  %v649_v42 = vrot.slane %v647_v35, 4  ;;  %v652_v43 = vrot.slane %v650_v36, 5  ;;  %v5609_v61 = vld [vmem:[%s5562_s23 + $0x4] sm:$0xf]  ;;  %v4797_v63 = vld [vmem:[%s7024_s1 + $0x50] sm:$0xff] }
  0x32   : >> { %5085 = vmatpush.bf16.msra.mxu3 %v4801_v3  ;;  %792 = vmatpush.bf16.msra.mxu0 %v4801_v3  ;;  %v563_v46 = vsel %vm5591_vm2, %v558_v37, %v562_v19  ;;  %v615_v47 = vor.u32 %v614_v39, %v610_v34  ;;  %v620_v48 = vrot.slane %v618_v30, 5  ;;  %v660_v49 = vshrl.u32 %v472_v31, 16  ;;  %v465_v5 = vld [vmem:[%s5562_s23 + $0x24] sm:$0xf]  ;;  %v5631_v18 = vld [vmem:[%s5562_s23 + $0x28] sm:$0xf] }
  0x33   : >> { %v573_v51 = vsel %vm5591_vm2, %v568_v38, %v572_v22  ;;  %v606_v52 = vrot.slane %v605_v40, 4  ;;  %v653_v53 = vor.u32 %v652_v43, %v649_v42  ;;  %v658_v55 = vrot.slane %v656_v44, 5  ;;  %v5637_v22 = vld [vmem:[%s5562_s23 + $0x2c] sm:$0x1]  ;;  %v469_v29 = vld [vmem:[%s5562_s23 + $0x3c] sm:$0xf] }
  0x34   : >> { %v616_v54 = vrot.slane %v615_v47, 4  ;;  %v662_v56 = vrot.slane %v660_v49, 4  ;;  %v666_v57 = vshll.u32 %v497_v41, 16  ;;  %v5604_v58 = vunpack.c.l.b16 %v563_v46  ;;  %v4796_v24 = vld [vmem:[%s7024_s1 + $0x48] sm:$0xff]  ;;  %v4795_v43 = vld [vmem:[%s7024_s1 + $0x40] sm:$0xff]  ;;  %s7014_s30 = sshll.u32 %s6504_s20, 2 }
  0x35   : >> { %5086 = vmatpush.bf16.msra.mxu1 %v4800_v4  ;;  %5087 = vmatpush.bf16.msra.mxu2 %v4800_v4  ;;  %v611_v59 = vsel %vm5591_vm2, %v606_v52, %v610_v34  ;;  %v654_v60 = vrot.slane %v653_v53, 4  ;;  %v503_v62 = vshrl.u32 %v459_v50, 16  ;;  %v5614_v0 = vunpack.c.l.b16 %v573_v51  ;;  %v5665_v51 = vld [vmem:[%s5562_s23 + $0x44] sm:$0x1]  ;;  %s6512_s15 = scalar_lea.vmem [#allocation2], %s7014_s30  ;;  %s7031_s28 = sshll.u32 %s6504_s20, 2 }
  0x36   : >> { %5088 = vmatpush.bf16.msra.mxu3 %v4800_v4  ;;  %793 = vmatpush.bf16.msra.mxu0 %v4800_v4  ;;  %v621_v1 = vsel %vm5591_vm2, %v616_v54, %v620_v48  ;;  %v663_v2 = vor.u32 %v662_v56, %v658_v55  ;;  %v668_v3 = vrot.slane %v666_v57, 5  ;;  %v5619_v4 = vld [vmem:[%s5562_s23 + $0x8] sm:$0x1]  ;;  %v5622_v8 = vunpack.c.l.b16 %v611_v59  ;;  %v5658_v48 = vld [vmem:[%s5562_s23 + $0x40] sm:$0xf]  ;;  %v4810_v56 = vld [vmem:[%s7024_s1 + $0xb8] sm:$0xff] }
  0x37   : >> { %v659_v9 = vsel %vm5591_vm2, %v654_v60, %v658_v55  ;;  %v505_v10 = vrot.slane %v503_v62, 4  ;;  %v506_v11 = vshll.u32 %v459_v50, 16  ;;  %v5626_v12 = vunpack.c.l.b16 %v621_v1  ;;  %v473_v54 = vld [vmem:[%s5562_s23 + $0x54] sm:$0xf]  ;;  %v4794_v57 = vld [vmem:[%s7024_s1 + $0x38] sm:$0xff]  ;;  %s6858_s29 = scalar_lea.vmem [#allocation3], %s7031_s28 }
  0x38   : >> { %v664_v13 = vrot.slane %v663_v2, 4  ;;  %v512_v16 = vshll.u32 %v5609_v61, 16  ;;  %v516_v17 = vshrl.u32 %v5609_v61, 16  ;;  %v5633_v19 = vunpack.c.l.b16 %v659_v9  ;;  %v5680_v62 = vld [vmem:[%s5562_s23 + $0x58] sm:$0xf]  ;;  %s453_s26 = sadd.s32 1, %s5381_s26  }
  0x39   : >> { %5089 = vmatpush.bf16.msra.mxu1 %v4799_v26  ;;  %5090 = vmatpush.bf16.msra.mxu2 %v4799_v26  ;;  %v508_v20 = vrot.slane %v506_v11, 5  ;;  %v522_v21 = vshll.u32 %v5619_v4, 16  ;;  %v575_v23 = vshrl.u32 %v465_v5, 16  ;;  %v578_v28 = vshll.u32 %v465_v5, 16  ;;  %v4834_v1 = vld [vmem:[%s7024_s1 + $0x138] sm:$0xff]  ;;  %p450_p0 = scmp.ge.s32.totalorder %s453_s26, 2  }
  0x3a   : >> { %5091 = vmatpush.bf16.msra.mxu3 %v4799_v26  ;;  %794 = vmatpush.bf16.msra.mxu0 %v4799_v26  ;;  %v669_v25 = vsel %vm5591_vm2, %v664_v13, %v668_v3  ;;  %v514_v26 = vrot.slane %v512_v16, 5  ;;  %v518_v27 = vrot.slane %v516_v17, 4  ;;  %v584_v37 = vshll.u32 %v5631_v18, 16  ;;  %v461_v13 = vld [vmem:[%s5562_s23 + $0xc] sm:$0xf]  ;;  %s6888_s20 = smov (%p450_p0), 0  }
  0x3b   : >> { %v5645_v30 = vunpack.c.l.b16 %v669_v25  ;;  %v509_v31 = vor.u32 %v508_v20, %v505_v10  ;;  %v524_v33 = vrot.slane %v522_v21, 5  ;;  %v577_v34 = vrot.slane %v575_v23, 4  ;;  %v4809_v21 = vld [vmem:[%s7024_s1 + $0xb0] sm:$0xff] }
  0x3c   : >> { %v519_v35 = vor.u32 %v518_v27, %v514_v26  ;;  %v580_v36 = vrot.slane %v578_v28, 5  ;;  %v588_v38 = vshrl.u32 %v5631_v18, 16  ;;  %v729_v39 = vpack.c.b16 %v5614_v0, %v5604_v58  ;;  %v4793_v23 = vld [vmem:[%s7024_s1 + $0x30] sm:$0xff] }
  0x3d   : >> { %5092 = vmatpush.bf16.msra.mxu1 %v4798_v45  ;;  %5093 = vmatpush.bf16.msra.mxu2 %v4798_v45  ;;  %v510_v40 = vrot.slane %v509_v31, 4  ;;  %v594_v41 = vshll.u32 %v5637_v22, 16  ;;  %v623_v42 = vshrl.u32 %v469_v29, 16  ;;  %v5655_v46 = vrot.slane %v584_v37, 5  ;;  %v4825_v31 = vld [vmem:[%s7024_s1 + $0xf0] sm:$0xff] }
  0x3e   : >> { %5094 = vmatpush.bf16.msra.mxu3 %v4798_v45  ;;  %795 = vmatpush.bf16.msra.mxu0 %v4798_v45  ;;  %v520_v44 = vrot.slane %v519_v35, 4  ;;  %v581_v45 = vor.u32 %v580_v36, %v577_v34  ;;  %v590_v47 = vrot.slane %v588_v38, 4  ;;  %v731_v49 = vpack.c.b16 %v5626_v12, %v5622_v8  ;;  %v5691_v8 = vld [vmem:[%s5562_s23 + $0x5c] sm:$0x1]  ;;  %v4833_v37 = vld [vmem:[%s7024_s1 + $0x130] sm:$0xff]  ;;  %v4808_v38 = vld [vmem:[%s7024_s1 + $0xa8] sm:$0xff] }
  0x3f   : >> { %v515_v50 = vsel %vm5591_vm2, %v510_v40, %v514_v26  ;;  %v625_v52 = vrot.slane %v623_v42, 4  ;;  %v626_v53 = vshll.u32 %v469_v29, 16  ;;  %v733_v55 = vpack.c.b16 %v5645_v30, %v5633_v19  ;;  %v5706_v26 = vld [vmem:[%s5562_s23 + $0x10] sm:$0xf] }
  0x40   : >> { %v525_v58 = vsel %vm5591_vm2, %v520_v44, %v524_v33  ;;  %v711_v59 = vunpack.c.l.b16 %v515_v50  ;;  %v591_v60 = vor.u32 %v590_v47, %v5655_v46  ;;  %v632_v3 = vshll.u32 %v5658_v48, 16  ;;  %v4792_v44 = vld [vmem:[%s7024_s1 + $0x28] sm:$0xff] }
  0x41   : >> { %5095 = vmatpush.bf16.msra.mxu1 %v4797_v63  ;;  %5096 = vmatpush.bf16.msra.mxu2 %v4797_v63  ;;  %v712_v0 = vunpack.c.l.b16 %v525_v58  ;;  %v628_v2 = vrot.slane %v626_v53, 5  ;;  %v636_v5 = vshrl.u32 %v5658_v48, 16  ;;  %v5693_v9 = vrot.slane %v581_v45, 4 }
  0x42   : >> { %5097 = vmatpush.bf16.msra.mxu3 %v4797_v63  ;;  %796 = vmatpush.bf16.msra.mxu0 %v4797_v63  ;;  %v4826_v63 = vld [vmem:[%s7024_s1 + $0xf8] sm:$0xff]  ;;  %v5695_v10 = vrot.slane %v594_v41, 5  ;;  %v642_v11 = vshll.u32 %v5665_v51, 16  ;;  %v671_v12 = vshrl.u32 %v473_v54, 16  ;;  %v592_v17 = vrot.slane %v591_v60, 4  ;;  %v4832_v60 = vld [vmem:[%s7024_s1 + $0x128] sm:$0xff] }
  0x43   : >> { %v727_v16 = vpack.c.b16 %v712_v0, %v711_v59  ;;  %v629_v19 = vor.u32 %v628_v2, %v625_v52  ;;  %v634_v20 = vrot.slane %v632_v3, 5  ;;  %v674_v29 = vshll.u32 %v473_v54, 16  ;;  %v4807_v2 = vld [vmem:[%s7024_s1 + $0xa0] sm:$0xff] }
  0x44   : >> { %v644_v25 = vrot.slane %v642_v11, 5  ;;  %v673_v28 = vrot.slane %v671_v12, 4  ;;  %v680_v30 = vshll.u32 %v5680_v62, 16  ;;  %v684_v34 = vshrl.u32 %v5680_v62, 16  ;;  %v4791_v3 = vld [vmem:[%s7024_s1 + $0x20] sm:$0xff] }
  0x45   : >> { %5098 = vmatpush.bf16.msra.mxu1 %v4796_v24  ;;  %5099 = vmatpush.bf16.msra.mxu2 %v4796_v24  ;;  %v630_v27 = vrot.slane %v629_v19, 4  ;;  %v690_v35 = vshll.u32 %v5691_v8, 16  ;;  %v527_v36 = vshrl.u32 %v461_v13, 16  ;;  %v597_v40 = vsel %vm5591_vm2, %v592_v17, %v5695_v10  ;;  %v4270_v19 = vld [vmem:[%s5562_s23 + $0xc] sm:$0xf] }
  0x46   : >> { %5100 = vmatpush.bf16.msra.mxu3 %v4796_v24  ;;  %797 = vmatpush.bf16.msra.mxu0 %v4796_v24  ;;  %v638_v24 = vrot.slane %v636_v5, 4  ;;  %v676_v41 = vrot.slane %v674_v29, 5  ;;  %v682_v42 = vrot.slane %v680_v30, 5  ;;  %v530_v53 = vshll.u32 %v461_v13, 16 }
  0x47   : >> { %v635_v45 = vsel %vm5591_vm2, %v630_v27, %v634_v20  ;;  %v529_v52 = vrot.slane %v527_v36, 4  ;;  %v536_v54 = vshll.u32 %v5706_v26, 16  ;;  %v540_v58 = vshrl.u32 %v5706_v26, 16  ;;  %v4823_v27 = vld [vmem:[%s7024_s1 + $0xe0] sm:$0xff] }
  0x48   : >> { %v639_v33 = vor.u32 %v638_v24, %v634_v20  ;;  %v677_v50 = vor.u32 %v676_v41, %v673_v28  ;;  %v532_v0 = vrot.slane %v530_v53, 5  ;;  %v721_v12 = vunpack.c.l.b16 %v635_v45  ;;  %v5756_v20 = vld [vmem:[%s5562_s23 + $0x10] sm:$0xf]  ;;  %v4831_v28 = vld [vmem:[%s7024_s1 + $0x120] sm:$0xff] }
  0x49   : >> { %5101 = vmatpush.bf16.msra.mxu1 %v4795_v43  ;;  %5102 = vmatpush.bf16.msra.mxu2 %v4795_v43  ;;  %v542_v11 = vrot.slane %v540_v58, 4  ;;  %v1456_v36 = vshll.u32 %v4270_v19, 16  ;;  %v1014_v41 = vrot.slane %v5609_v61, 5  ;;  %v4830_v61 = vld [vmem:[%s7024_s1 + $0x118] sm:$0xff] }
  0x4a   : >> { %5103 = vmatpush.bf16.msra.mxu3 %v4795_v43  ;;  %798 = vmatpush.bf16.msra.mxu0 %v4795_v43  ;;  %v5728_v43 = vld [vmem:[%s5562_s23 + $0x14] sm:$0x1]  ;;  %v640_v47 = vrot.slane %v639_v33, 4  ;;  %v533_v17 = vor.u32 %v532_v0, %v529_v52  ;;  %v4790_v33 = vld [vmem:[%s7024_s1 + $0x18] sm:$0xff]  ;;  %v985_v52 = vld [vmem:[%s5562_s23] sm:$0xe] }
  0x4b   : >> { %v546_v59 = vshll.u32 %v5728_v43, 16  ;;  %v1458_v53 = vrot.slane %v1456_v36, 5  ;;  %v1016_v0 = vrot.slane %v1014_v41, 4 }
  0x4c   : >> { %809 = vmatmul.bf16.vlgmr.msra.gmra.mxu1 %v729_v39  ;;  %819 = vmatmul.bf16.vlgmr.msra.gmra.mxu2 %v731_v49  ;;  %v587_v39 = vsel %vm5591_vm2, %v5693_v9, %v5655_v46  ;;  %v686_v49 = vrot.slane %v684_v34, 4  ;;  %v692_v46 = vrot.slane %v690_v35, 5  ;;  %v718_v9 = vunpack.c.l.b16 %v597_v40 }
  0x4d   : >> { %1165 = vmatpush.bf16.msrb.mxu2 %v4810_v56  ;;  %936 = vmatpush.bf16.msrb.mxu1 %v4794_v57  ;;  %v645_v56 = vsel %vm5591_vm2, %v640_v47, %v644_v25  ;;  %v717_v5 = vunpack.c.l.b16 %v587_v39  ;;  %v548_v25 = vrot.slane %v546_v59, 5  ;;  %v534_v30 = vrot.slane %v533_v17, 4  ;;  %v4789_v59 = vld [vmem:[%s7024_s1 + $0x10] sm:$0xff]  ;;  %v5817_v17 = vld [vmem:[%s5562_s23 + $0x1c] sm:$0xf] }
  0x4e   : >> { %829 = vmatmul.bf16.vlgmr.msra.gmra.mxu3 %v733_v55  ;;  %799 = vmatmul.bf16.vlgmr.msra.gmra.mxu0 %v727_v16  ;;  %v4824_v55 = vld [vmem:[%s7024_s1 + $0xe8] sm:$0xff]  ;;  %v687_v57 = vor.u32 %v686_v49, %v682_v42  ;;  %v722_v13 = vunpack.c.l.b16 %v645_v56  ;;  %v1453_v35 = vshrl.u32 %v4270_v19, 16  ;;  %v1466_v56 = vshrl.u32 %v5756_v20, 16 }
  0x4f   : >> { %1363 = vmatpush.bf16.msrb.mxu3 %v4826_v63  ;;  %1741 = vmatpush.bf16.msrb.mxu0 %v4834_v1  ;;  %v678_v63 = vrot.slane %v677_v50, 4  ;;  %v538_v1 = vrot.slane %v536_v54, 5  ;;  %v4805_v54 = vld [vmem:[%s7024_s1 + $0x90] sm:$0xff] }
  0x50   : >> { %v688_v10 = vrot.slane %v687_v57, 4  ;;  %v732_v39 = vpack.c.b16 %v722_v13, %v721_v12  ;;  %v1455_v49 = vrot.slane %v1453_v35, 4  ;;  %v4787_v35 = vld [vmem:[%s7024_s1] sm:$0xff] }
  0x51   : >> { %1166 = vmatpush.bf16.msrb.mxu2 %v4809_v21  ;;  %937 = vmatpush.bf16.msrb.mxu1 %v4793_v23  ;;  %v683_v16 = vsel %vm5591_vm2, %v678_v63, %v682_v42  ;;  %v543_v24 = vor.u32 %v542_v11, %v538_v1  ;;  %v539_v40 = vsel %vm5591_vm2, %v534_v30, %v538_v1  ;;  %v5777_v42 = vld [vmem:[%s5562_s23 + $0x14] sm:$0x1]  ;;  %v4116_v63 = vrot.slane %v985_v52, 9  ;;  %v4804_v11 = vld [vmem:[%s7024_s1 + $0x88] sm:$0xff]  ;;  %v4803_v30 = vld [vmem:[%s7024_s1 + $0x80] sm:$0xff] }
  0x52   : >> { %v693_v21 = vsel %vm5591_vm2, %v688_v10, %v692_v46  ;;  %v725_v23 = vunpack.c.l.b16 %v683_v16  ;;  %v713_v47 = vunpack.c.l.b16 %v539_v40  ;;  %v4822_v46 = vld [vmem:[%s7024_s1 + $0xd8] sm:$0xff]  ;;  %v1472_v57 = vshll.u32 %v5777_v42, 16  ;;  %v4788_v16 = vld [vmem:[%s7024_s1 + $0x8] sm:$0xff] }
  0x53   : >> { %1364 = vmatpush.bf16.msrb.mxu3 %v4825_v31  ;;  %1742 = vmatpush.bf16.msrb.mxu0 %v4833_v37  ;;  %v726_v29 = vunpack.c.l.b16 %v693_v21  ;;  %v4806_v31 = vld [vmem:[%s7024_s1 + $0x98] sm:$0xff]  ;;  %v544_v34 = vrot.slane %v543_v24, 4  ;;  %v1462_v37 = vshll.u32 %v5756_v20, 16  ;;  %v1017_v1 = vrot.slane %v5619_v4, 5  ;;  %v4829_v4 = vld [vmem:[%s7024_s1 + $0x110] sm:$0xff] }
  0x54   : >> { %v4273_v10 = vld [vmem:[%s5562_s23 + $0x18] sm:$0xf]  ;;  %v1474_v13 = vrot.slane %v1472_v57, 5  ;;  %v1015_v19 = vsel %vm5802_vm5, %v4116_v63, %v1014_v41 }
  0x55   : >> { %1167 = vmatpush.bf16.msrb.mxu2 %v4808_v38  ;;  %938 = vmatpush.bf16.msrb.mxu1 %v4792_v44  ;;  %v730_v38 = vpack.c.b16 %v718_v9, %v717_v5  ;;  %v734_v44 = vpack.c.b16 %v726_v29, %v725_v23  ;;  %v549_v45 = vsel %vm5591_vm2, %v544_v34, %v548_v25  ;;  %v1477_v24 = vshrl.u32 %v4273_v10, 16  ;;  %v4820_v25 = vld [vmem:[%s7024_s1 + $0xc8] sm:$0xff]  ;;  %v4842_v41 = vld [vmem:[%s7024_s1 + $0x178] sm:$0xff]  ;;  %v4875_v5 = vld [vmem:[%s6999_s4 + $0x4] sm:$0xf] }
  0x56   : >> { %v714_v50 = vunpack.c.l.b16 %v549_v45  ;;  %v1018_v21 = vsel %vm5802_vm5, %v1016_v0, %v1017_v1  ;;  %v4828_v29 = vld [vmem:[%s7024_s1 + $0x108] sm:$0xff]  ;;  %v1490_v34 = vshrl.u32 %v5817_v17, 16  ;;  %v1085_v36 = vunpack.c.l.b16 %v1015_v19  ;;  %v987_v45 = vld [vmem:[%s5562_s23 + $0x18] sm:$0xe] }
  0x57   : >> { %1365 = vmatpush.bf16.msrb.mxu3 %v4824_v55  ;;  %1743 = vmatpush.bf16.msrb.mxu0 %v4832_v60  ;;  %v1464_v55 = vrot.slane %v1462_v37, 5  ;;  %v1459_v60 = vor.u32 %v1458_v53, %v1455_v49  ;;  %v1086_v37 = vunpack.c.l.b16 %v1018_v21  ;;  %v4866_v53 = vld [vmem:[%s7024_s1 + $0x1f8] sm:$0xff]  ;;  %v986_v0 = vld [vmem:[%s5562_s23 + $0xc] sm:$0xe]  ;;  %v1021_v1 = vrot.slane %v5706_v26, 5 }
  0x58   : >> { %v728_v58 = vpack.c.b16 %v714_v50, %v713_v47  ;;  %v4819_v47 = vld [vmem:[%s7024_s1 + $0xc0] sm:$0xff]  ;;  %v4118_v50 = vrot.slane %v987_v45, 9  ;;  %v4874_v63 = vld [vmem:[%s7024_s1 + $0x238] sm:$0xff] }
  0x59   : >> { %1168 = vmatpush.bf16.msrb.mxu2 %v4807_v2  ;;  %939 = vmatpush.bf16.msrb.mxu1 %v4791_v3  ;;  %v1468_v2 = vrot.slane %v1466_v56, 4  ;;  %v4821_v3 = vld [vmem:[%s7024_s1 + $0xd0] sm:$0xff]  ;;  %v1460_v9 = vrot.slane %v1459_v60, 4  ;;  %v4779_v56 = vld [vmem:[%s5562_s23] sm:$0xff]  ;;  %v1101_v57 = vpack.c.b16 %v1086_v37, %v1085_v36  ;;  %v1023_v21 = vrot.slane %v1021_v1, 4 }
  0x5a   : >> { %v4811_v60 = vld [vmem:[%s5562_s23 + $0xc] sm:$0xff] }
  0x5b   : >> { %1366 = vmatpush.bf16.msrb.mxu3 %v4823_v27  ;;  %1744 = vmatpush.bf16.msrb.mxu0 %v4831_v28  ;;  %v1469_v12 = vor.u32 %v1468_v2, %v1464_v55  ;;  %v1465_v27 = vsel %vm5591_vm2, %v1460_v9, %v1464_v55  ;;  %v1480_v28 = vshll.u32 %v4273_v10, 16  ;;  %v1031_v55 = vrot.slane %v5569_v7, 5  ;;  %v4857_v9 = vld [vmem:[%s7024_s1 + $0x1b0] sm:$0xff] }
  0x5c   : >> { %814 = vmatmul.bf16.gmra.mxu1 %v730_v38  ;;  %824 = vmatmul.bf16.gmra.mxu2 %v732_v39  ;;  %v4858_v38 = vld [vmem:[%s7024_s1 + $0x1b8] sm:$0xff]  ;;  %v1028_v39 = vrot.slane %v5566_v6, 5  ;;  %v1661_v40 = vunpack.c.l.b16 %v1465_v27  ;;  %v4827_v6 = vld [vmem:[%s7024_s1 + $0x100] sm:$0xff] }
  0x5d   : >> { %1169 = vmatpush.bf16.msrb.mxu2 %v4806_v31  ;;  %940 = vmatpush.bf16.msrb.mxu1 %v4790_v33  ;;  %v1470_v23 = vrot.slane %v1469_v12, 4  ;;  %v1486_v33 = vshll.u32 %v5817_v17, 16  ;;  %v4865_v12 = vld [vmem:[%s7024_s1 + $0x1f0] sm:$0xff] }
  0x5e   : >> { %834 = vmatmul.bf16.gmra.mxu3 %v734_v44  ;;  %804 = vmatmul.bf16.gmra.mxu0 %v728_v58  ;;  %v1479_v44 = vrot.slane %v1477_v24, 4  ;;  %v1030_v52 = vrot.slane %v1028_v39, 4  ;;  %v5863_v58 = vld [vmem:[%s5562_s23 + $0x20] sm:$0x1]  ;;  %v4873_v24 = vld [vmem:[%s7024_s1 + $0x230] sm:$0xff] }
  0x5f   : >> { %1367 = vmatpush.bf16.msrb.mxu3 %v4822_v46  ;;  %1745 = vmatpush.bf16.msrb.mxu0 %v4830_v61  ;;  %v1475_v31 = vsel %vm5591_vm2, %v1470_v23, %v1474_v13  ;;  %v1482_v46 = vrot.slane %v1480_v28, 5  ;;  %v5858_v61 = vrot.slane %v1486_v33, 5  ;;  %v1496_v26 = vshll.u32 %v5863_v58, 16  ;;  %v4841_v13 = vld [vmem:[%s7024_s1 + $0x170] sm:$0xff]  ;;  %v4856_v28 = vld [vmem:[%s7024_s1 + $0x1a8] sm:$0xff] }
  0x60   : >> { %v1662_v49 = vunpack.c.l.b16 %v1475_v31  ;;  %v1032_v7 = vsel %vm5802_vm5, %v1030_v52, %v1031_v55  ;;  %v1024_v23 = vrot.slane %v5728_v43, 5  ;;  %v4864_v43 = vld [vmem:[%s7024_s1 + $0x1e8] sm:$0xff] }
  0x61   : >> { %1170 = vmatpush.bf16.msrb.mxu2 %v4805_v54  ;;  %941 = vmatpush.bf16.msrb.mxu1 %v4789_v59  ;;  %v1492_v54 = vrot.slane %v1490_v34, 4  ;;  %v1029_v59 = vsel %vm5802_vm5, %v4118_v50, %v1028_v39  ;;  %v1483_v10 = vor.u32 %v1482_v46, %v1479_v44  ;;  %v1498_v31 = vrot.slane %v1496_v26, 5  ;;  %v4840_v33 = vld [vmem:[%s7024_s1 + $0x168] sm:$0xff] }
  0x62   : >> { %v1089_v2 = vunpack.c.l.b16 %v1029_v59  ;;  %v1025_v37 = vsel %vm5802_vm5, %v1023_v21, %v1024_v23  ;;  %v1035_v50 = vrot.slane %v5631_v18, 5  ;;  %v5925_v55 = vld [vmem:[%s5562_s23 + $0x2c] sm:$0x1]  ;;  %v1038_v59 = vrot.slane %v5637_v22, 5  ;;  %v4863_v21 = vld [vmem:[%s7024_s1 + $0x1e0] sm:$0xff] }
  0x63   : >> { %1368 = vmatpush.bf16.msrb.mxu3 %v4821_v3  ;;  %1746 = vmatpush.bf16.msrb.mxu0 %v4829_v4  ;;  %v5875_v3 = vpack.c.b16 %v1662_v49, %v1661_v40  ;;  %v1090_v4 = vunpack.c.l.b16 %v1032_v7  ;;  %v1484_v27 = vrot.slane %v1483_v10, 4  ;;  %v4872_v40 = vld [vmem:[%s7024_s1 + $0x228] sm:$0xff]  ;;  %v4812_v7 = vld [vmem:[%s5562_s23 + $0x18] sm:$0xff]  ;;  %v4839_v23 = vld [vmem:[%s7024_s1 + $0x160] sm:$0xff] }
  0x65   : >> { %1171 = vmatpush.bf16.msrb.mxu2 %v4804_v11  ;;  %942 = vmatpush.bf16.msrb.mxu1 %v4788_v16  ;;  %v1493_v11 = vor.u32 %v1492_v54, %v5858_v61  ;;  %v4117_v16 = vrot.slane %v986_v0, 9  ;;  %v5888_v19 = vpack.c.b16 %v1090_v4, %v1089_v2 }
  0x67   : >> { %1369 = vmatpush.bf16.msrb.mxu3 %v4820_v25  ;;  %1747 = vmatpush.bf16.msrb.mxu0 %v4828_v29  ;;  %v4276_v25 = vld [vmem:[%s5562_s23 + $0x24] sm:$0xf]  ;;  %v5900_v29 = vld [vmem:[%s5562_s23 + $0x28] sm:$0xf]  ;;  %v1022_v34 = vsel %vm5802_vm5, %v4117_v16, %v1021_v1 }
  0x68   : >> { %v1504_v36 = vshll.u32 %v4276_v25, 16  ;;  %v1514_v39 = vshrl.u32 %v5900_v29, 16  ;;  %v1087_v44 = vunpack.c.l.b16 %v1022_v34  ;;  %v4855_v16 = vld [vmem:[%s7024_s1 + $0x1a0] sm:$0xff] }
  0x69   : >> { %1172 = vmatpush.bf16.msrb.mxu2 %v4803_v30  ;;  %943 = vmatpush.bf16.msrb.mxu1 %v4787_v35  ;;  %v1494_v30 = vrot.slane %v1493_v11, 4  ;;  %v1501_v35 = vshrl.u32 %v4276_v25, 16  ;;  %v4279_v25 = vld [vmem:[%s5562_s23 + $0x30] sm:$0xf] }
  0x6a   : >> { %v1506_v46 = vrot.slane %v1504_v36, 5 }
  0x6b   : >> { %1370 = vmatpush.bf16.msrb.mxu3 %v4819_v47  ;;  %1748 = vmatpush.bf16.msrb.mxu0 %v4827_v6  ;;  %v1499_v45 = vsel %vm5591_vm2, %v1494_v30, %v1498_v31  ;;  %v1088_v47 = vunpack.c.l.b16 %v1025_v37  ;;  %v1503_v49 = vrot.slane %v1501_v35, 4  ;;  %v1525_v31 = vshrl.u32 %v4279_v25, 16 }
  0x6c   : >> { %944 = vmatmul.bf16.vlgmr.msrb.gmra.mxu1 %v4779_v56  ;;  %1173 = vmatmul.bf16.vlgmr.msrb.gmra.mxu2 %v1101_v57  ;;  %v1664_v54 = vunpack.c.l.b16 %v1499_v45  ;;  %v1037_v57 = vrot.slane %v1035_v50, 4  ;;  %v4813_v45 = vld [vmem:[%s5562_s23 + $0x24] sm:$0xff] }
  0x6d   : >> { %2189 = vmatpush.bf16.msra.mxu2 %v4858_v38  ;;  %1991 = vmatpush.bf16.msra.mxu1 %v4842_v41  ;;  %v1510_v38 = vshll.u32 %v5900_v29, 16  ;;  %v1489_v41 = vsel %vm5591_vm2, %v1484_v27, %v5858_v61  ;;  %v988_v61 = vld [vmem:[%s5562_s23 + $0x24] sm:$0xe]  ;;  %v1507_v0 = vor.u32 %v1506_v46, %v1503_v49  ;;  %v5954_v27 = vld [vmem:[%s5562_s23 + $0x34] sm:$0xf]  ;;  %v1527_v37 = vrot.slane %v1525_v31, 4 }
  0x6e   : >> { %1371 = vmatmul.bf16.vlgmr.msrb.gmra.mxu3 %v4811_v60  ;;  %1749 = vmatmul.bf16.vlgmr.msrb.gmra.mxu0 %v5875_v3  ;;  %v1663_v52 = vunpack.c.l.b16 %v1489_v41  ;;  %v4119_v56 = vrot.slane %v988_v61, 9  ;;  %v4780_v60 = vld [vmem:[%s5562_s23 + $0xc] sm:$0xff]  ;;  %v1039_v18 = vsel %vm5802_vm5, %v1037_v57, %v1038_v59  ;;  %v1538_v34 = vshrl.u32 %v5954_v27, 16  ;;  %v5963_v41 = vld [vmem:[%s5562_s23 + $0x38] sm:$0x1] }
  0x6f   : >> { %2567 = vmatpush.bf16.msra.mxu3 %v4866_v53  ;;  %2817 = vmatpush.bf16.msra.mxu0 %v4874_v63  ;;  %v1512_v6 = vrot.slane %v1510_v38, 5  ;;  %v1516_v53 = vrot.slane %v1514_v39, 4  ;;  %v1102_v63 = vpack.c.b16 %v1088_v47, %v1087_v44  ;;  %v1092_v4 = vunpack.c.l.b16 %v1039_v18  ;;  %v4781_v44 = vld [vmem:[%s5562_s23 + $0x18] sm:$0xff]  ;;  %v5986_v59 = vld [vmem:[%s5562_s23 + $0x40] sm:$0xf] }
  0x70   : >> { %v1036_v1 = vsel %vm5802_vm5, %v4119_v56, %v1035_v50  ;;  %v5935_v11 = vpack.c.b16 %v1664_v54, %v1663_v52  ;;  %v1508_v26 = vrot.slane %v1507_v0, 4  ;;  %v1544_v50 = vshll.u32 %v5963_v41, 16  ;;  %v4854_v52 = vld [vmem:[%s7024_s1 + $0x198] sm:$0xff] }
  0x71   : >> { %2190 = vmatpush.bf16.msra.mxu2 %v4857_v9  ;;  %1992 = vmatpush.bf16.msra.mxu1 %v4841_v13  ;;  %v1517_v2 = vor.u32 %v1516_v53, %v1512_v6  ;;  %v1520_v9 = vshll.u32 %v5925_v55, 16  ;;  %v1091_v10 = vunpack.c.l.b16 %v1036_v1  ;;  %v4862_v54 = vld [vmem:[%s7024_s1 + $0x1d8] sm:$0xff]  ;;  %v1558_v18 = vshll.u32 %v5986_v59, 16 }
  0x72   : >> { %v1546_v61 = vrot.slane %v1544_v50, 5  ;;  %v4838_v56 = vld [vmem:[%s7024_s1 + $0x158] sm:$0xff] }
  0x73   : >> { %2568 = vmatpush.bf16.msra.mxu3 %v4865_v12  ;;  %2818 = vmatpush.bf16.msra.mxu0 %v4873_v24  ;;  %v5937_v22 = vpack.c.b16 %v1092_v4, %v1091_v10  ;;  %v1518_v12 = vrot.slane %v1517_v2, 4  ;;  %v1522_v13 = vrot.slane %v1520_v9, 5  ;;  %v4871_v24 = vld [vmem:[%s7024_s1 + $0x220] sm:$0xff]  ;;  %v4282_v57 = vld [vmem:[%s5562_s23 + $0x3c] sm:$0xf] }
  0x74   : >> { %v1549_v0 = vshrl.u32 %v4282_v57, 16  ;;  %v1552_v1 = vshll.u32 %v4282_v57, 16 }
  0x75   : >> { %2191 = vmatpush.bf16.msra.mxu2 %v4856_v28  ;;  %1993 = vmatpush.bf16.msra.mxu1 %v4840_v33  ;;  %v1513_v28 = vsel %vm5591_vm2, %v1508_v26, %v1512_v6  ;;  %v1523_v30 = vsel %vm5591_vm2, %v1518_v12, %v1522_v13  ;;  %v1534_v33 = vshll.u32 %v5954_v27, 16  ;;  %v1560_v26 = vrot.slane %v1558_v18, 5  ;;  %v4782_v13 = vld [vmem:[%s5562_s23 + $0x24] sm:$0xff]  ;;  %v4783_v18 = vld [vmem:[%s5562_s23 + $0x30] sm:$0xff] }
  0x76   : >> { %v1665_v35 = vunpack.c.l.b16 %v1513_v28  ;;  %v1666_v36 = vunpack.c.l.b16 %v1523_v30  ;;  %v1551_v10 = vrot.slane %v1549_v0, 4  ;;  %v1554_v4 = vrot.slane %v1552_v1, 5  ;;  %v6034_v1 = vld [vmem:[%s5562_s23 + $0x50] sm:$0x1] }
  0x77   : >> { %2569 = vmatpush.bf16.msra.mxu3 %v4864_v43  ;;  %2819 = vmatpush.bf16.msra.mxu0 %v4872_v40  ;;  %v1528_v43 = vshll.u32 %v4279_v25, 16  ;;  %v1536_v39 = vrot.slane %v1534_v33, 5  ;;  %v1540_v40 = vrot.slane %v1538_v34, 4  ;;  %v1045_v34 = vrot.slane %v5579_v15, 5  ;;  %v4869_v15 = vld [vmem:[%s7024_s1 + $0x210] sm:$0xff] }
  0x78   : >> { %v5967_v47 = vpack.c.b16 %v1666_v36, %v1665_v35  ;;  %v1555_v28 = vor.u32 %v1554_v4, %v1551_v10  ;;  %v4285_v35 = vld [vmem:[%s5562_s23 + $0x48] sm:$0xf]  ;;  %v6011_v36 = vld [vmem:[%s5562_s23 + $0x4c] sm:$0xf]  ;;  %v990_v10 = vld [vmem:[%s5562_s23 + $0x3c] sm:$0xe] }
  0x79   : >> { %2192 = vmatpush.bf16.msra.mxu2 %v4855_v16  ;;  %1994 = vmatpush.bf16.msra.mxu1 %v4839_v23  ;;  %v1530_v38 = vrot.slane %v1528_v43, 5  ;;  %v1541_v46 = vor.u32 %v1540_v40, %v1536_v39  ;;  %v1042_v16 = vrot.slane %v5576_v14, 5  ;;  %v4814_v23 = vld [vmem:[%s5562_s23 + $0x30] sm:$0xff]  ;;  %v1582_v50 = vshll.u32 %v6011_v36, 16 }
  0x7a   : >> { %v4853_v14 = vld [vmem:[%s7024_s1 + $0x190] sm:$0xff] }
  0x7b   : >> { %2570 = vmatpush.bf16.msra.mxu3 %v4863_v21  ;;  %2820 = vmatpush.bf16.msra.mxu0 %v4871_v24  ;;  %v1531_v49 = vor.u32 %v1530_v38, %v1527_v37  ;;  %v1542_v53 = vrot.slane %v1541_v46, 4  ;;  %v5997_v21 = vld [vmem:[%s5562_s23 + $0x44] sm:$0x1]  ;;  %v989_v24 = vld [vmem:[%s5562_s23 + $0x30] sm:$0xe]  ;;  %v1044_v33 = vrot.slane %v1042_v16, 4 }
  0x7c   : >> { %949 = vmatmul.bf16.gmra.mxu1 %v4780_v60  ;;  %1178 = vmatmul.bf16.gmra.mxu2 %v1102_v63  ;;  %v1568_v31 = vshll.u32 %v5997_v21, 16  ;;  %v4120_v43 = vrot.slane %v989_v24, 9  ;;  %v4861_v37 = vld [vmem:[%s7024_s1 + $0x1d0] sm:$0xff]  ;;  %v1556_v38 = vrot.slane %v1555_v28, 4  ;;  %v1576_v46 = vshll.u32 %v4285_v35, 16 }
  0x7d   : >> { %v1532_v6 = vrot.slane %v1531_v49, 4  ;;  %2193 = vmatpush.bf16.msra.mxu2 %v4854_v52  ;;  %1995 = vmatpush.bf16.msra.mxu1 %v4838_v56  ;;  %v1547_v63 = vsel %vm5591_vm2, %v1542_v53, %v1546_v61  ;;  %v1573_v49 = vshrl.u32 %v4285_v35, 16  ;;  %v1586_v52 = vshrl.u32 %v6011_v36, 16 }
  0x7e   : >> { %1376 = vmatmul.bf16.gmra.mxu3 %v4812_v7  ;;  %1754 = vmatmul.bf16.gmra.mxu0 %v5935_v11  ;;  %v1562_v7 = vshrl.u32 %v5986_v59, 16  ;;  %v1668_v9 = vunpack.c.l.b16 %v1547_v63  ;;  %v1570_v40 = vrot.slane %v1568_v31, 5  ;;  %v1584_v57 = vrot.slane %v1582_v50, 5  ;;  %v4852_v31 = vld [vmem:[%s7024_s1 + $0x188] sm:$0xff] }
  0x7f   : >> { %2571 = vmatpush.bf16.msra.mxu3 %v4862_v54  ;;  %v1537_v60 = vsel %vm5591_vm2, %v1532_v6, %v1536_v39  ;;  %v1561_v6 = vsel %vm5591_vm2, %v1556_v38, %v1560_v26  ;;  %v1575_v56 = vrot.slane %v1573_v49, 4  ;;  %v1052_v24 = vrot.slane %v5665_v51, 5  ;;  %v4836_v51 = vld [vmem:[%s7024_s1 + $0x148] sm:$0xff] }
  0x80   : >> { %v1667_v2 = vunpack.c.l.b16 %v1537_v60  ;;  %v1564_v12 = vrot.slane %v1562_v7, 4  ;;  %v1588_v60 = vrot.slane %v1586_v52, 4  ;;  %v1669_v63 = vunpack.c.l.b16 %v1561_v6 }
  0x81   : >> { %2194 = vmatpush.bf16.msra.mxu2 %v4853_v14 }
  0x82   : >> { %v6001_v25 = vpack.c.b16 %v1668_v9, %v1667_v2  ;;  %v1565_v30 = vor.u32 %v1564_v12, %v1560_v26  ;;  %v1049_v2 = vrot.slane %v5658_v48, 5  ;;  %v4815_v9 = vld [vmem:[%s5562_s23 + $0x3c] sm:$0xff]  ;;  %v1589_v26 = vor.u32 %v1588_v60, %v1584_v57  ;;  %v5230_v60 = vld [vmem:[%s5562_s23 + $0x4c] sm:$0xf] }
  0x83   : >> { %2572 = vmatpush.bf16.msra.mxu3 %v4861_v37  ;;  %v1592_v12 = vshll.u32 %v6034_v1, 16 }
  0x84   : >> { %v1566_v39 = vrot.slane %v1565_v30, 4  ;;  %v1590_v30 = vrot.slane %v1589_v26, 4  ;;  %v5231_v26 = vld [vmem:[%s5562_s23 + $0x50] sm:$0x1] }
  0x85   : >> { %v1594_v48 = vrot.slane %v1592_v12, 5  ;;  %2195 = vmatpush.bf16.msra.mxu2 %v4852_v31  ;;  %v1059_v12 = vrot.slane %v5231_v26, 5  ;;  %v4292_v31 = vld [vmem:[%s5562_s23 + $0x64] sm:$0xf]  ;;  %v4504_v26 = vld [vmem:[%s5562_s23 + $0x18] sm:$0xf] }
  0x86   : >> { %v1571_v53 = vsel %vm5591_vm2, %v1566_v39, %v1570_v40 }
  0x87   : >> { %v1670_v0 = vunpack.c.l.b16 %v1571_v53 }
  0x8c   : >> { %954 = vmatmul.bf16.gmra.mxu1 %v4781_v44  ;;  %1183 = vmatmul.bf16.gmra.mxu2 %v5888_v19  ;;  %v4870_v19 = vld [vmem:[%s7024_s1 + $0x218] sm:$0xff]  ;;  %v1043_v44 = vsel %vm5802_vm5, %v4120_v43, %v1042_v16  ;;  %v4121_v16 = vrot.slane %v990_v10, 9  ;;  %v4860_v43 = vld [vmem:[%s7024_s1 + $0x1c8] sm:$0xff] }
  0x8d   : >> { %2821 = vmatpush.bf16.msra.mxu0 %v4870_v19  ;;  %v1093_v61 = vunpack.c.l.b16 %v1043_v44  ;;  %v1578_v19 = vrot.slane %v1576_v46, 5  ;;  %2573 = vmatpush.bf16.msra.mxu3 %v4860_v43  ;;  %v4868_v44 = vld [vmem:[%s7024_s1 + $0x208] sm:$0xff]  ;;  %v4835_v43 = vld [vmem:[%s7024_s1 + $0x140] sm:$0xff] }
  0x8e   : >> { %1381 = vmatmul.bf16.gmra.mxu3 %v4813_v45  ;;  %1759 = vmatmul.bf16.gmra.mxu0 %v5967_v47  ;;  %v1046_v45 = vsel %vm5802_vm5, %v1044_v33, %v1045_v34  ;;  %v4288_v33 = vld [vmem:[%s5562_s23 + $0x54] sm:$0xf]  ;;  %v4289_v34 = vld [vmem:[%s5562_s23 + $0x58] sm:$0xf]  ;;  %v1050_v14 = vsel %vm5802_vm5, %v4121_v16, %v1049_v2  ;;  %v4851_v16 = vld [vmem:[%s7024_s1 + $0x180] sm:$0xff] }
  0x8f   : >> { %v1094_v54 = vunpack.c.l.b16 %v1046_v45  ;;  %v1579_v4 = vor.u32 %v1578_v19, %v1575_v56  ;;  %v1600_v38 = vshll.u32 %v4288_v33, 16  ;;  %v1606_v39 = vshll.u32 %v4289_v34, 16  ;;  %v4784_v56 = vld [vmem:[%s5562_s23 + $0x3c] sm:$0xff]  ;;  %2196 = vmatpush.bf16.msra.mxu2 %v4851_v16 }
  0x90   : >> { %v1610_v40 = vshrl.u32 %v4289_v34, 16  ;;  %v1095_v45 = vunpack.c.l.b16 %v1050_v14 }
  0x91   : >> { %2822 = vmatpush.bf16.msra.mxu0 %v4869_v15  ;;  %v1105_v7 = vpack.c.b16 %v1094_v54, %v1093_v61  ;;  %v1580_v28 = vrot.slane %v1579_v4, 4  ;;  %v1597_v15 = vshrl.u32 %v4288_v33, 16  ;;  %v1602_v6 = vrot.slane %v1600_v38, 5  ;;  %v6068_v54 = vld [vmem:[%s5562_s23 + $0x5c] sm:$0x1]  ;;  %v4867_v38 = vld [vmem:[%s7024_s1 + $0x200] sm:$0xff] }
  0x92   : >> { %v1608_v53 = vrot.slane %v1606_v39, 5  ;;  %v1612_v61 = vrot.slane %v1610_v40, 4 }
  0x93   : >> { %v1585_v37 = vsel %vm5591_vm2, %v1580_v28, %v1584_v57  ;;  %v1599_v52 = vrot.slane %v1597_v15, 4  ;;  %v4816_v57 = vld [vmem:[%s5562_s23 + $0x48] sm:$0xff]  ;;  %v1634_v15 = vshrl.u32 %v4292_v31, 16 }
  0x94   : >> { %v1671_v46 = vunpack.c.l.b16 %v1585_v37 }
  0x95   : >> { %2823 = vmatpush.bf16.msra.mxu0 %v4868_v44 }
  0x99   : >> { %2824 = vmatpush.bf16.msra.mxu0 %v4867_v38 }
  0x9c   : >> { %959 = vmatmul.bf16.gmra.mxu1 %v4782_v13  ;;  %1188 = vmatmul.bf16.gmra.mxu2 %v5937_v22  ;;  %v4837_v22 = vld [vmem:[%s7024_s1 + $0x150] sm:$0xff]  ;;  %v6041_v13 = vpack.c.b16 %v1670_v0, %v1669_v63  ;;  %v1056_v63 = vrot.slane %v5230_v60, 5 }
  0x9d   : >> { %1996 = vmatpush.bf16.msra.mxu1 %v4837_v22  ;;  %v1595_v22 = vsel %vm5591_vm2, %v1590_v30, %v1594_v48  ;;  %v4859_v30 = vld [vmem:[%s7024_s1 + $0x1c0] sm:$0xff]  ;;  %v992_v60 = vld [vmem:[%s5562_s23 + $0x54] sm:$0xe] }
  0x9e   : >> { %1386 = vmatmul.bf16.gmra.mxu3 %v4814_v23  ;;  %1764 = vmatmul.bf16.gmra.mxu0 %v6001_v25  ;;  %v1051_v23 = vrot.slane %v1049_v2, 4  ;;  %v1672_v50 = vunpack.c.l.b16 %v1595_v22  ;;  %v1613_v2 = vor.u32 %v1612_v61, %v1608_v53  ;;  %v1058_v4 = vrot.slane %v1056_v63, 4  ;;  %v4291_v48 = vld [vmem:[%s5562_s23 + $0x60] sm:$0xf] }
  0x9f   : >> { %2574 = vmatpush.bf16.msra.mxu3 %v4859_v30  ;;  %v1624_v37 = vshll.u32 %v4291_v48, 16  ;;  %v1630_v22 = vshll.u32 %v4292_v31, 16  ;;  %v1063_v61 = vrot.slane %v5680_v62, 5  ;;  %v1066_v62 = vrot.slane %v5691_v8, 5 }
  0xa0   : >> { %v1053_v35 = vsel %vm5802_vm5, %v1051_v23, %v1052_v24  ;;  %v6073_v0 = vpack.c.b16 %v1672_v50, %v1671_v46  ;;  %v1614_v24 = vrot.slane %v1613_v2, 4  ;;  %v1060_v34 = vsel %vm5802_vm5, %v1058_v4, %v1059_v12  ;;  %v6116_v12 = vld [vmem:[%s5562_s23 + $0x1c] sm:$0xf] }
  0xa1   : >> { %1997 = vmatpush.bf16.msra.mxu1 %v4836_v51  ;;  %v1096_v49 = vunpack.c.l.b16 %v1053_v35  ;;  %v1621_v35 = vshrl.u32 %v4291_v48, 16  ;;  %v1098_v40 = vunpack.c.l.b16 %v1060_v34  ;;  %v1626_v46 = vrot.slane %v1624_v37, 5 }
  0xa2   : >> { %v1632_v50 = vrot.slane %v1630_v22, 5  ;;  %v1065_v4 = vrot.slane %v1063_v61, 4  ;;  %v2288_v34 = vshll.u32 %v6116_v12, 16 }
  0xa3   : >> { %v1106_v19 = vpack.c.b16 %v1096_v49, %v1095_v45  ;;  %v1623_v49 = vrot.slane %v1621_v35, 4 }
  0xa4   : >> { %v1067_v31 = vsel %vm5802_vm5, %v1065_v4, %v1066_v62  ;;  %v2666_v62 = vrot.slane %v6116_v12, 5 }
  0xa5   : >> { %1998 = vmatpush.bf16.msra.mxu1 %v4835_v43  ;;  %v2279_v43 = vshrl.u32 %v4504_v26, 16 }
  0xa7   : >> { %v2281_v38 = vrot.slane %v2279_v43, 4  ;;  %v4507_v43 = vld [vmem:[%s5562_s23 + $0x24] sm:$0xf] }
  0xac   : >> { %964 = vmatmul.bf16.gmra.mxu1 %v4783_v18  ;;  %1193 = vmatmul.bf16.gmra.mxu2 %v1105_v7  ;;  %v991_v18 = vld [vmem:[%s5562_s23 + $0x48] sm:$0xe]  ;;  %v1603_v7 = vor.u32 %v1602_v6, %v1599_v52  ;;  %v1636_v52 = vrot.slane %v1634_v15, 4  ;;  %v1100_v15 = vunpack.c.l.b16 %v1067_v31 }
  0xad   : >> { %v4122_v10 = vrot.slane %v991_v18, 9  ;;  %v4785_v6 = vld [vmem:[%s5562_s23 + $0x48] sm:$0xff] }
  0xae   : >> { %1391 = vmatmul.bf16.gmra.mxu3 %v4815_v9  ;;  %1769 = vmatmul.bf16.gmra.mxu0 %v6041_v13  ;;  %v1616_v9 = vshll.u32 %v6068_v54, 16  ;;  %v1604_v23 = vrot.slane %v1603_v7, 4  ;;  %v1627_v7 = vor.u32 %v1626_v46, %v1623_v49  ;;  %v1637_v2 = vor.u32 %v1636_v52, %v1632_v50  ;;  %v4506_v46 = vld [vmem:[%s5562_s23 + $0x20] sm:$0x1] }
  0xaf   : >> { %v1057_v33 = vsel %vm5802_vm5, %v4122_v10, %v1056_v63  ;;  %v4123_v10 = vrot.slane %v992_v60, 9  ;;  %v4342_v60 = vld [vmem:[%s5562_s23 + $0xc] sm:$0xe] }
  0xb0   : >> { %v1618_v28 = vrot.slane %v1616_v9, 5  ;;  %v1609_v51 = vsel %vm5591_vm2, %v1604_v23, %v1608_v53  ;;  %v1097_v39 = vunpack.c.l.b16 %v1057_v33  ;;  %v1628_v23 = vrot.slane %v1627_v7, 4 }
  0xb1   : >> { %v1673_v44 = vunpack.c.l.b16 %v1609_v51  ;;  %v1064_v48 = vsel %vm5802_vm5, %v4123_v10, %v1063_v61  ;;  %v2282_v33 = vshll.u32 %v4504_v26, 16  ;;  %v2292_v51 = vshrl.u32 %v6116_v12, 16 }
  0xb2   : >> { %v1619_v14 = vsel %vm5591_vm2, %v1614_v24, %v1618_v28  ;;  %v1107_v53 = vpack.c.b16 %v1098_v40, %v1097_v39  ;;  %v1638_v24 = vrot.slane %v1637_v2, 4  ;;  %v1633_v35 = vsel %vm5591_vm2, %v1628_v23, %v1632_v50 }
  0xb3   : >> { %v1674_v45 = vunpack.c.l.b16 %v1619_v14  ;;  %v1099_v22 = vunpack.c.l.b16 %v1064_v48  ;;  %v2284_v39 = vrot.slane %v2282_v33, 5  ;;  %v2290_v40 = vrot.slane %v2288_v34, 5 }
  0xb4   : >> { %v1840_v61 = vrot.slane %v5756_v20, 5  ;;  %v1843_v26 = vrot.slane %v5777_v42, 5  ;;  %v4350_v20 = vrot.slane %v4342_v60, 9  ;;  %v2669_v12 = vrot.slane %v4506_v46, 5 }
  0xb5   : >> { %v6110_v18 = vpack.c.b16 %v1674_v45, %v1673_v44  ;;  %v2294_v44 = vrot.slane %v2292_v51, 4  ;;  %v1675_v45 = vunpack.c.l.b16 %v1633_v35  ;;  %v1108_v50 = vpack.c.b16 %v1100_v15, %v1099_v22  ;;  %v6159_v35 = vld [vmem:[%s5562_s23 + $0x28] sm:$0xf] }
  0xb6   : >> { %v2285_v7 = vor.u32 %v2284_v39, %v2281_v38  ;;  %v1842_v23 = vrot.slane %v1840_v61, 4  ;;  %v2668_v51 = vrot.slane %v2666_v62, 4 }
  0xb7   : >> { %v2295_v2 = vor.u32 %v2294_v44, %v2290_v40  ;;  %v2303_v44 = vshrl.u32 %v4507_v43, 16 }
  0xb8   : >> { %v1844_v22 = vsel %vm5802_vm5, %v1842_v23, %v1843_v26 }
  0xb9   : >> { %v2296_v48 = vrot.slane %v2295_v2, 4  ;;  %v1847_v2 = vrot.slane %v5817_v17, 5 }
  0xbc   : >> { %969 = vmatmul.bf16.gmra.mxu1 %v4784_v56  ;;  %1198 = vmatmul.bf16.gmra.mxu2 %v1106_v19  ;;  %v4293_v56 = vld [vmem:[%s5562_s23 + $0x68] sm:$0x1] }
  0xbd   : >> { %v1640_v9 = vshll.u32 %v4293_v56, 16 }
  0xbe   : >> { %1396 = vmatmul.bf16.gmra.mxu3 %v4816_v57  ;;  %1774 = vmatmul.bf16.gmra.mxu0 %v6073_v0  ;;  %v4817_v57 = vld [vmem:[%s5562_s23 + $0x54] sm:$0xff] }
  0xbf   : >> { %v1642_v28 = vrot.slane %v1640_v9, 5  ;;  %v2298_v9 = vshll.u32 %v4506_v46, 16  ;;  %v2316_v46 = vshrl.u32 %v6159_v35, 16 }
  0xc1   : >> { %v1643_v37 = vsel %vm5591_vm2, %v1638_v24, %v1642_v28  ;;  %v4576_v24 = vld [vmem:[%s5562_s23 + $0x18] sm:$0xe]  ;;  %v2286_v28 = vrot.slane %v2285_v7, 4  ;;  %v2300_v31 = vrot.slane %v2298_v9, 5  ;;  %v2305_v9 = vrot.slane %v2303_v44, 4 }
  0xc2   : >> { %v1676_v49 = vunpack.c.l.b16 %v1643_v37  ;;  %v4584_v34 = vrot.slane %v4576_v24, 9  ;;  %v1841_v37 = vsel %vm5802_vm5, %v4350_v20, %v1840_v61  ;;  %v2670_v61 = vsel %vm5802_vm5, %v2668_v51, %v2669_v12  ;;  %v4343_v24 = vld [vmem:[%s5562_s23 + $0x18] sm:$0xe] }
  0xc3   : >> { %v2291_v38 = vsel %vm5591_vm2, %v2286_v28, %v2290_v40  ;;  %v2301_v39 = vsel %vm5591_vm2, %v2296_v48, %v2300_v31  ;;  %v1911_v40 = vunpack.c.l.b16 %v1841_v37  ;;  %v2738_v23 = vunpack.c.l.b16 %v2670_v61  ;;  %v4509_v28 = vld [vmem:[%s5562_s23 + $0x2c] sm:$0x1]  ;;  %v4843_v51 = vld [vmem:[%s5562_s23 + $0x18] sm:$0xff] }
  0xc4   : >> { %v6147_v10 = vpack.c.b16 %v1676_v49, %v1675_v45  ;;  %v2306_v45 = vshll.u32 %v4507_v43, 16  ;;  %v2312_v49 = vshll.u32 %v6159_v35, 16  ;;  %v2487_v60 = vunpack.c.l.b16 %v2291_v38  ;;  %v4700_v61 = vld [vmem:[%s6999_s4 + $0x78] sm:$0xf0] }
  0xc5   : >> { %v2488_v7 = vunpack.c.l.b16 %v2301_v39  ;;  %v2318_v31 = vrot.slane %v2316_v46, 4  ;;  %v1849_v38 = vrot.slane %v1847_v2, 4  ;;  %v2322_v39 = vshll.u32 %v4509_v28, 16 }
  0xc6   : >> { %7029 = vst [vmem:[#allocation19_spill] sm:$0xff] %v6147_v10  ;;  %v2308_v26 = vrot.slane %v2306_v45, 5  ;;  %v2314_v48 = vrot.slane %v2312_v49, 5  ;;  %v1850_v49 = vrot.slane %v5863_v58, 5 }
  0xc7   : >> { %v2503_v12 = vpack.c.b16 %v2488_v7, %v2487_v60  ;;  %v2673_v60 = vrot.slane %v6159_v35, 5 }
  0xc8   : >> { %v2309_v17 = vor.u32 %v2308_v26, %v2305_v9  ;;  %v2319_v46 = vor.u32 %v2318_v31, %v2314_v48  ;;  %v4510_v9 = vld [vmem:[%s5562_s23 + $0x30] sm:$0xf]  ;;  %v6201_v26 = vld [vmem:[%s5562_s23 + $0x34] sm:$0xf]  ;;  %v2324_v31 = vrot.slane %v2322_v39, 5 }
  0xc9   : >> { %v6104_v19 = vpop.f32.mrf.mxu1 }
  0xca   : >> { %v2310_v58 = vrot.slane %v2309_v17, 4 }
  0xcb   : >> { %v6108_v63 = vpop.f32.mrf.mxu0 }
  0xcc   : >> { %974 = vmatmul.bf16.gmra.mxu1 %v4785_v6  ;;  %1203 = vmatmul.bf16.gmra.mxu2 %v1107_v53  ;;  %v4786_v53 = vld [vmem:[%s5562_s23 + $0x54] sm:$0xff] }
  0xce   : >> { %1401 = vmatmul.bf16.gmra.mxu3 %v4817_v57  ;;  %1779 = vmatmul.bf16.gmra.mxu0 %v6110_v18  ;;  %v4818_v57 = vld [vmem:[%s5562_s23 + $0x60] sm:$0xff] }
  0xcf   : >> { %v6118_v16 = vpop.f32.mrf.mxu2 }
  0xd1   : >> { %v6120_v30 = vpop.f32.mrf.mxu3  ;;  %v6126_v8 = vpop.f32.mrf.mxu1 }
  0xd3   : >> { %v6130_v14 = vpop.f32.mrf.mxu0 }
  0xd7   : >> { %v6137_v52 = vpop.f32.mrf.mxu2 }
  0xd9   : >> { %v6139_v6 = vpop.f32.mrf.mxu3  ;;  %v6143_v56 = vpop.f32.mrf.mxu1 }
  0xdb   : >> { %v6149_v4 = vpop.f32.mrf.mxu0 }
  0xdc   : >> { %979 = vmatmul.bf16.gmra.mxu1 %v4786_v53  ;;  %1208 = vmatmul.bf16.gmra.mxu2 %v1108_v50  ;;  %v2667_v50 = vsel %vm5802_vm5, %v4584_v34, %v2666_v62 }
  0xdd   : >> { %v2737_v20 = vunpack.c.l.b16 %v2667_v50  ;;  %v4889_v50 = vld [vmem:[%s6999_s4 + $0x74] sm:$0xf] }
  0xde   : >> { %1406 = vmatmul.bf16.gmra.mxu3 %v4818_v57  ;;  %1784 = vmatmul.bf16.gmra.mxu0 %v6147_v10  ;;  %v1912_v57 = vunpack.c.l.b16 %v1844_v22  ;;  %v4351_v22 = vrot.slane %v4343_v24, 9  ;;  %v4703_v7 = vor.u32 %v4889_v50, %v4700_v61  ;;  %v2320_v24 = vrot.slane %v2319_v46, 4 }
  0xdf   : >> { %v6156_v33 = vpop.f32.mrf.mxu2  ;;  %v2753_v45 = vpack.c.b16 %v2738_v23, %v2737_v20  ;;  %v1851_v23 = vsel %vm5802_vm5, %v1849_v38, %v1850_v49  ;;  %v2327_v50 = vshrl.u32 %v4510_v9, 16  ;;  %v2330_v61 = vshll.u32 %v4510_v9, 16 }
  0xe0   : >> { %v1927_v34 = vpack.c.b16 %v1912_v57, %v1911_v40  ;;  %v4898_v40 = vld [vmem:[#allocation7 + $0x38] sm:$0xff]  ;;  %3099 = vmatpush.bf16.msrb.mxu2 %v4703_v7  ;;  %v1848_v20 = vsel %vm5802_vm5, %v4351_v22, %v1847_v2  ;;  %v2336_v7 = vshll.u32 %v6201_v26, 16  ;;  %v2315_v2 = vsel %vm5591_vm2, %v2310_v58, %v2314_v48 }
  0xe1   : >> { %v6161_v42 = vpop.f32.mrf.mxu3  ;;  %v6167_v15 = vpop.f32.mrf.mxu1  ;;  %3300 = vmatpush.bf16.msrb.mxu3 %v4898_v40  ;;  %v1913_v39 = vunpack.c.l.b16 %v1848_v20  ;;  %v2332_v48 = vrot.slane %v2330_v61, 5 }
  0xe2   : >> { %v6218_v9 = vrot.slane %v2336_v7, 5 }
  0xe3   : >> { %v6175_v53 = vpop.f32.mrf.mxu0 }
  0xe7   : >> { %v6184_v43 = vpop.f32.mrf.mxu2 }
  0xe9   : >> { %v6186_v62 = vpop.f32.mrf.mxu3  ;;  %v945_v37 = vpop.f32.mrf.mxu1 }
  0xea   : >> { %v946_v44 = vadd.f32 %v945_v37, %v6108_v63  ;;  %v4577_v63 = vld [vmem:[%s5562_s23 + $0x24] sm:$0xe]  ;;  %v2676_v37 = vrot.slane %v4509_v28, 5  ;;  %v2325_v28 = vsel %vm5591_vm2, %v2320_v24, %v2324_v31  ;;  %v4512_v24 = vld [vmem:[%s5562_s23 + $0x38] sm:$0x1] }
  0xeb   : >> { %v1750_v57 = vpop.f32.mrf.mxu0  ;;  %v2490_v20 = vunpack.c.l.b16 %v2325_v28  ;;  %v2346_v7 = vshll.u32 %v4512_v24, 16 }
  0xec   : >> { %1999 = vmatmul.bf16.vlgmr.msra.gmra.mxu1 %v1927_v34  ;;  %2197 = vmatmul.bf16.vlgmr.msra.gmra.mxu2 %v4843_v51  ;;  %v4585_v34 = vrot.slane %v4577_v63, 9  ;;  %v2675_v51 = vrot.slane %v2673_v60, 4  ;;  %v2329_v63 = vrot.slane %v2327_v50, 4  ;;  %v4844_v50 = vld [vmem:[%s5562_s23 + $0x24] sm:$0xff] }
  0xee   : >> { %2575 = vmatmul.bf16.vlgmr.msra.gmra.mxu3 %v2503_v12  ;;  %2825 = vmatmul.bf16.vlgmr.msra.gmra.mxu0 %v2753_v45  ;;  %v2340_v45 = vshrl.u32 %v6201_v26, 16  ;;  %v2674_v46 = vsel %vm5802_vm5, %v4585_v34, %v2673_v60  ;;  %v2677_v40 = vsel %vm5802_vm5, %v2675_v51, %v2676_v37  ;;  %v1854_v34 = vrot.slane %v5900_v29, 5  ;;  %v4887_v29 = vld [vmem:[%s6999_s4 + $0x64] sm:$0xf] }
  0xef   : >> { %v1174_v35 = vpop.f32.mrf.mxu2  ;;  %v2740_v31 = vunpack.c.l.b16 %v2677_v40 }
  0xf0   : >> { %v1214_v12 = vadd.f32 %v1174_v35, %v946_v44  ;;  %v1914_v44 = vunpack.c.l.b16 %v1851_v23  ;;  %v2342_v58 = vrot.slane %v2340_v45, 4  ;;  %v2739_v23 = vunpack.c.l.b16 %v2674_v46 }
  0xf1   : >> { %v1372_v17 = vpop.f32.mrf.mxu3  ;;  %v947_v10 = vpop.f32.mrf.mxu1 }
  0xf2   : >> { %v1412_v22 = vadd.f32 %v1372_v17, %v1214_v12  ;;  %v948_v38 = vadd.f32 %v947_v10, %v6130_v14  ;;  %v2489_v10 = vunpack.c.l.b16 %v2315_v2  ;;  %v1928_v60 = vpack.c.b16 %v1914_v44, %v1913_v39  ;;  %v4344_v12 = vld [vmem:[%s5562_s23 + $0x24] sm:$0xe]  ;;  %v4578_v2 = vld [vmem:[%s5562_s23 + $0x30] sm:$0xe]  ;;  %v4897_v39 = vld [vmem:[#allocation7 + $0x30] sm:$0xff] }
  0xf3   : >> { %v1752_v49 = vpop.f32.mrf.mxu0  ;;  %v2333_v17 = vor.u32 %v2332_v48, %v2329_v63  ;;  %v2343_v61 = vor.u32 %v2342_v58, %v6218_v9  ;;  %v2754_v40 = vpack.c.b16 %v2740_v31, %v2739_v23  ;;  %v4352_v63 = vrot.slane %v4344_v12, 9  ;;  %3301 = vmatpush.bf16.msrb.mxu3 %v4897_v39 }
  0xf4   : >> { %v6220_v14 = vadd.f32 %v1750_v57, %v1412_v22  ;;  %v2504_v45 = vpack.c.b16 %v2490_v20, %v2489_v10  ;;  %v2680_v22 = vrot.slane %v6201_v26, 5  ;;  %v1856_v48 = vrot.slane %v1854_v34, 4 }
  0xf5   : >> { %v1857_v58 = vrot.slane %v5925_v55, 5  ;;  %v2344_v10 = vrot.slane %v2343_v61, 4  ;;  %v2348_v20 = vrot.slane %v2346_v7, 5  ;;  %v4586_v31 = vrot.slane %v4578_v2, 9 }
  0xf6   : >> { %v1855_v55 = vsel %vm5802_vm5, %v4352_v63, %v1854_v34 }
  0xf7   : >> { %v1176_v35 = vpop.f32.mrf.mxu2 }
  0xf8   : >> { %v1215_v51 = vadd.f32 %v1176_v35, %v948_v38  ;;  %v4692_v38 = vld [vmem:[%s6999_s4 + $0x68] sm:$0xf0]  ;;  %v2682_v35 = vrot.slane %v2680_v22, 4 }
  0xf9   : >> { %v1374_v37 = vpop.f32.mrf.mxu3  ;;  %v950_v57 = vpop.f32.mrf.mxu1  ;;  %v4695_v26 = vor.u32 %v4887_v29, %v4692_v38  ;;  %v1915_v38 = vunpack.c.l.b16 %v1855_v55  ;;  %v4845_v55 = vld [vmem:[%s5562_s23 + $0x30] sm:$0xff] }
  0xfa   : >> { %v1413_v28 = vadd.f32 %v1374_v37, %v1215_v51  ;;  %v951_v46 = vadd.f32 %v950_v57, %v6149_v4  ;;  %v2334_v4 = vrot.slane %v2333_v17, 4  ;;  %v2683_v51 = vrot.slane %v4512_v24, 5  ;;  %v4513_v37 = vld [vmem:[%s5562_s23 + $0x3c] sm:$0xf] }
  0xfb   : >> { %v1755_v44 = vpop.f32.mrf.mxu0  ;;  %3100 = vmatpush.bf16.msrb.mxu2 %v4695_v26  ;;  %v2349_v24 = vsel %vm5591_vm2, %v2344_v10, %v2348_v20  ;;  %v2681_v57 = vsel %vm5802_vm5, %v4586_v31, %v2680_v22  ;;  %v2354_v2 = vshll.u32 %v4513_v37, 16 }
  0xfc   : >> { %2004 = vmatmul.bf16.gmra.mxu1 %v1928_v60  ;;  %2202 = vmatmul.bf16.gmra.mxu2 %v4844_v50  ;;  %v6237_v23 = vadd.f32 %v1752_v49, %v1413_v28  ;;  %v6243_v60 = vld [vmem:[%s5562_s23 + $0x40] sm:$0xf]  ;;  %v1858_v49 = vsel %vm5802_vm5, %v1856_v48, %v1857_v58  ;;  %v2339_v61 = vsel %vm5591_vm2, %v2334_v4, %v6218_v9  ;;  %v2492_v48 = vunpack.c.l.b16 %v2349_v24 }
  0xfd   : >> { %v2684_v34 = vsel %vm5802_vm5, %v2682_v35, %v2683_v51  ;;  %v2364_v9 = vshrl.u32 %v6243_v60, 16  ;;  %v1916_v39 = vunpack.c.l.b16 %v1858_v49  ;;  %v2491_v63 = vunpack.c.l.b16 %v2339_v61  ;;  %v4515_v35 = vld [vmem:[%s5562_s23 + $0x44] sm:$0x1]  ;;  %v4345_v61 = vld [vmem:[%s5562_s23 + $0x30] sm:$0xe] }
  0xfe   : >> { %2580 = vmatmul.bf16.gmra.mxu3 %v2504_v45  ;;  %2830 = vmatmul.bf16.gmra.mxu0 %v2754_v40  ;;  %v2351_v45 = vshrl.u32 %v4513_v37, 16  ;;  %v2360_v40 = vshll.u32 %v6243_v60, 16  ;;  %v2741_v58 = vunpack.c.l.b16 %v2681_v57  ;;  %v2742_v26 = vunpack.c.l.b16 %v2684_v34 }
  0xff   : >> { %v1179_v12 = vpop.f32.mrf.mxu2  ;;  %v2356_v10 = vrot.slane %v2354_v2, 5  ;;  %v4885_v2 = vld [vmem:[%s6999_s4 + $0x54] sm:$0xf] }
 0x100   : >> { %v1216_v50 = vadd.f32 %v1179_v12, %v951_v46  ;;  %v2353_v4 = vrot.slane %v2351_v45, 4  ;;  %v6261_v20 = vrot.slane %v2360_v40, 5  ;;  %v1929_v12 = vpack.c.b16 %v1916_v39, %v1915_v38  ;;  %v4579_v38 = vld [vmem:[%s5562_s23 + $0x3c] sm:$0xe] }
 0x101   : >> { %v1377_v17 = vpop.f32.mrf.mxu3  ;;  %v952_v7 = vpop.f32.mrf.mxu1  ;;  %v2755_v49 = vpack.c.b16 %v2742_v26, %v2741_v58  ;;  %v2370_v45 = vshll.u32 %v4515_v35, 16  ;;  %v4516_v58 = vld [vmem:[%s5562_s23 + $0x48] sm:$0xf] }
 0x102   : >> { %v1414_v28 = vadd.f32 %v1377_v17, %v1216_v50  ;;  %v953_v46 = vadd.f32 %v952_v7, %v6175_v53  ;;  %v2366_v53 = vrot.slane %v2364_v9, 4  ;;  %v2505_v17 = vpack.c.b16 %v2492_v48, %v2491_v63 }
 0x103   : >> { %v1757_v29 = vpop.f32.mrf.mxu0  ;;  %v2357_v24 = vor.u32 %v2356_v10, %v2353_v4  ;;  %v1864_v48 = vrot.slane %v5963_v41, 5  ;;  %v2372_v10 = vrot.slane %v2370_v45, 5  ;;  %v2378_v41 = vshll.u32 %v4516_v58, 16 }
 0x104   : >> { %v6259_v22 = vadd.f32 %v1755_v44, %v1414_v28  ;;  %v1861_v44 = vrot.slane %v5954_v27, 5  ;;  %v2367_v34 = vor.u32 %v2366_v53, %v6261_v20  ;;  %v4684_v28 = vld [vmem:[%s6999_s4 + $0x58] sm:$0xf0]  ;;  %v2687_v27 = vrot.slane %v6243_v60, 5  ;;  %v6282_v60 = vld [vmem:[%s5562_s23 + $0x4c] sm:$0xf] }
 0x105   : >> { %v4687_v9 = vor.u32 %v4885_v2, %v4684_v28  ;;  %v2358_v26 = vrot.slane %v2357_v24, 4  ;;  %v2388_v24 = vshrl.u32 %v6282_v60, 16 }
 0x106   : >> { %v1863_v63 = vrot.slane %v1861_v44, 4  ;;  %v2368_v4 = vrot.slane %v2367_v34, 4 }
 0x107   : >> { %v1181_v31 = vpop.f32.mrf.mxu2  ;;  %3101 = vmatpush.bf16.msrb.mxu2 %v4687_v9 }
 0x108   : >> { %v1217_v51 = vadd.f32 %v1181_v31, %v953_v46  ;;  %v4896_v46 = vld [vmem:[#allocation7 + $0x28] sm:$0xff]  ;;  %v4587_v31 = vrot.slane %v4579_v38, 9 }
 0x109   : >> { %v1379_v37 = vpop.f32.mrf.mxu3  ;;  %v955_v50 = vpop.f32.mrf.mxu1  ;;  %3302 = vmatpush.bf16.msrb.mxu3 %v4896_v46 }
 0x10a   : >> { %v1415_v7 = vadd.f32 %v1379_v37, %v1217_v51  ;;  %v956_v57 = vadd.f32 %v955_v50, %v6104_v19  ;;  %v4353_v19 = vrot.slane %v4345_v61, 9  ;;  %v2689_v51 = vrot.slane %v2687_v27, 4 }
 0x10b   : >> { %v1760_v40 = vpop.f32.mrf.mxu0  ;;  %v2690_v37 = vrot.slane %v4515_v35, 5  ;;  %v2375_v50 = vshrl.u32 %v4516_v58, 16  ;;  %v2384_v61 = vshll.u32 %v6282_v60, 16  ;;  %v2363_v35 = vsel %vm5591_vm2, %v2358_v26, %v6261_v20 }
 0x10c   : >> { %2009 = vmatmul.bf16.gmra.mxu1 %v1929_v12  ;;  %2207 = vmatmul.bf16.gmra.mxu2 %v4845_v55  ;;  %v6277_v39 = vadd.f32 %v1757_v29, %v1415_v7  ;;  %v1862_v55 = vsel %vm5802_vm5, %v4353_v19, %v1861_v44  ;;  %v2373_v44 = vsel %vm5591_vm2, %v2368_v4, %v2372_v10  ;;  %v2493_v20 = vunpack.c.l.b16 %v2363_v35  ;;  %v4518_v4 = vld [vmem:[%s5562_s23 + $0x50] sm:$0x1] }
 0x10d   : >> { %v1917_v45 = vunpack.c.l.b16 %v1862_v55  ;;  %v2688_v2 = vsel %vm5802_vm5, %v4587_v31, %v2687_v27  ;;  %v2691_v28 = vsel %vm5802_vm5, %v2689_v51, %v2690_v37  ;;  %v2377_v9 = vrot.slane %v2375_v50, 4  ;;  %v4846_v37 = vld [vmem:[%s5562_s23 + $0x3c] sm:$0xff] }
 0x10e   : >> { %2585 = vmatmul.bf16.gmra.mxu3 %v2505_v17  ;;  %2835 = vmatmul.bf16.gmra.mxu0 %v2755_v49  ;;  %v1865_v49 = vsel %vm5802_vm5, %v1863_v63, %v1864_v48  ;;  %v2494_v38 = vunpack.c.l.b16 %v2373_v44  ;;  %v2386_v63 = vrot.slane %v2384_v61, 5  ;;  %v2390_v48 = vrot.slane %v2388_v24, 4 }
 0x10f   : >> { %v1184_v53 = vpop.f32.mrf.mxu2  ;;  %v1918_v46 = vunpack.c.l.b16 %v1865_v49  ;;  %v2743_v58 = vunpack.c.l.b16 %v2688_v2  ;;  %v2744_v26 = vunpack.c.l.b16 %v2691_v28  ;;  %v1868_v27 = vrot.slane %v5986_v59, 5  ;;  %v4676_v59 = vld [vmem:[%s6999_s4 + $0x48] sm:$0xf0] }
 0x110   : >> { %v1218_v12 = vadd.f32 %v1184_v53, %v956_v57  ;;  %v4346_v53 = vld [vmem:[%s5562_s23 + $0x3c] sm:$0xe]  ;;  %v2506_v50 = vpack.c.b16 %v2494_v38, %v2493_v20  ;;  %v2694_v2 = vrot.slane %v6282_v60, 5  ;;  %v4519_v38 = vld [vmem:[%s5562_s23 + $0x54] sm:$0xf] }
 0x111   : >> { %v1382_v29 = vpop.f32.mrf.mxu3  ;;  %v957_v17 = vpop.f32.mrf.mxu1  ;;  %v1930_v51 = vpack.c.b16 %v1918_v46, %v1917_v45  ;;  %v2756_v61 = vpack.c.b16 %v2744_v26, %v2743_v58  ;;  %v4354_v24 = vrot.slane %v4346_v53, 9  ;;  %v1870_v44 = vrot.slane %v1868_v27, 4  ;;  %v4580_v46 = vld [vmem:[%s5562_s23 + $0x48] sm:$0xe] }
 0x112   : >> { %v1416_v7 = vadd.f32 %v1382_v29, %v1218_v12  ;;  %v958_v34 = vadd.f32 %v957_v17, %v6126_v8  ;;  %v2380_v8 = vrot.slane %v2378_v41, 5  ;;  %v2394_v41 = vshll.u32 %v4518_v4, 16 }
 0x113   : >> { %v1762_v57 = vpop.f32.mrf.mxu0  ;;  %v1871_v45 = vrot.slane %v5997_v21, 5  ;;  %v6322_v21 = vld [vmem:[%s5562_s23 + $0x58] sm:$0xf]  ;;  %v4588_v26 = vrot.slane %v4580_v46, 9 }
 0x114   : >> { %v6300_v19 = vadd.f32 %v1760_v40, %v1416_v7  ;;  %v2381_v29 = vor.u32 %v2380_v8, %v2377_v9  ;;  %v2391_v40 = vor.u32 %v2390_v48, %v2386_v63  ;;  %v4883_v7 = vld [vmem:[%s6999_s4 + $0x44] sm:$0xf]  ;;  %v2396_v20 = vrot.slane %v2394_v41, 5 }
 0x115   : >> { %v1869_v48 = vsel %vm5802_vm5, %v4354_v24, %v1868_v27  ;;  %v1872_v58 = vsel %vm5802_vm5, %v1870_v44, %v1871_v45 }
 0x116   : >> { %v2382_v28 = vrot.slane %v2381_v29, 4  ;;  %v2392_v8 = vrot.slane %v2391_v40, 4 }
 0x117   : >> { %v1186_v10 = vpop.f32.mrf.mxu2 }
 0x118   : >> { %v1219_v31 = vadd.f32 %v1186_v10, %v958_v34  ;;  %v4895_v34 = vld [vmem:[#allocation7 + $0x20] sm:$0xff]  ;;  %v2696_v10 = vrot.slane %v2694_v2, 4  ;;  %v2397_v27 = vsel %vm5591_vm2, %v2392_v8, %v2396_v20  ;;  %v4521_v20 = vld [vmem:[%s5562_s23 + $0x5c] sm:$0x1] }
 0x119   : >> { %v1384_v12 = vpop.f32.mrf.mxu3  ;;  %v960_v55 = vpop.f32.mrf.mxu1  ;;  %3303 = vmatpush.bf16.msrb.mxu3 %v4895_v34  ;;  %v4347_v8 = vld [vmem:[%s5562_s23 + $0x48] sm:$0xe] }
 0x11a   : >> { %v1417_v17 = vadd.f32 %v1384_v12, %v1219_v31  ;;  %v961_v49 = vadd.f32 %v960_v55, %v6143_v56  ;;  %v4679_v56 = vor.u32 %v4883_v7, %v4676_v59  ;;  %v2387_v12 = vsel %vm5591_vm2, %v2382_v28, %v2386_v63 }
 0x11b   : >> { %v1765_v35 = vpop.f32.mrf.mxu0  ;;  %v2408_v55 = vshll.u32 %v6322_v21, 16  ;;  %v2695_v63 = vsel %vm5802_vm5, %v4588_v26, %v2694_v2  ;;  %v2496_v7 = vunpack.c.l.b16 %v2397_v27  ;;  %v4668_v27 = vld [vmem:[%s6999_s4 + $0x38] sm:$0xf0] }
 0x11c   : >> { %2014 = vmatmul.bf16.gmra.mxu1 %v1930_v51  ;;  %2212 = vmatmul.bf16.gmra.mxu2 %v4846_v37  ;;  %v6316_v9 = vadd.f32 %v1762_v57, %v1417_v17  ;;  %v2697_v57 = vrot.slane %v4518_v4, 5  ;;  %v2399_v51 = vshrl.u32 %v4519_v38, 16  ;;  %v2402_v37 = vshll.u32 %v4519_v38, 16 }
 0x11d   : >> { %3102 = vmatpush.bf16.msrb.mxu2 %v4679_v56  ;;  %v1919_v4 = vunpack.c.l.b16 %v1869_v48  ;;  %v6340_v45 = vrot.slane %v2408_v55, 5  ;;  %v2745_v28 = vunpack.c.l.b16 %v2695_v63  ;;  %v4894_v55 = vld [vmem:[#allocation7 + $0x18] sm:$0xff] }
 0x11e   : >> { %2590 = vmatmul.bf16.gmra.mxu3 %v2506_v50  ;;  %2840 = vmatmul.bf16.gmra.mxu0 %v2756_v61  ;;  %v2412_v50 = vshrl.u32 %v6322_v21, 16  ;;  %v2495_v61 = vunpack.c.l.b16 %v2387_v12  ;;  %v2698_v24 = vsel %vm5802_vm5, %v2696_v10, %v2697_v57  ;;  %v2401_v59 = vrot.slane %v2399_v51, 4 }
 0x11f   : >> { %v1189_v60 = vpop.f32.mrf.mxu2  ;;  %v2404_v34 = vrot.slane %v2402_v37, 5  ;;  %v2746_v46 = vunpack.c.l.b16 %v2698_v24  ;;  %v1878_v37 = vrot.slane %v6034_v1, 5  ;;  %v6359_v24 = vld [vmem:[%s5562_s23 + $0x64] sm:$0xf]  ;;  %3304 = vmatpush.bf16.msrb.mxu3 %v4894_v55 }
 0x120   : >> { %v1220_v53 = vadd.f32 %v1189_v60, %v961_v49  ;;  %v1920_v49 = vunpack.c.l.b16 %v1872_v58  ;;  %v2414_v56 = vrot.slane %v2412_v50, 4  ;;  %v4847_v58 = vld [vmem:[%s5562_s23 + $0x48] sm:$0xff]  ;;  %v2507_v26 = vpack.c.b16 %v2496_v7, %v2495_v61 }
 0x121   : >> { %v1387_v31 = vpop.f32.mrf.mxu3  ;;  %v962_v29 = vpop.f32.mrf.mxu1  ;;  %v2405_v10 = vor.u32 %v2404_v34, %v2401_v59  ;;  %v2757_v51 = vpack.c.b16 %v2746_v46, %v2745_v28  ;;  %v2704_v46 = vrot.slane %v4521_v20, 5 }
 0x122   : >> { %v1418_v40 = vadd.f32 %v1387_v31, %v1220_v53  ;;  %v963_v41 = vadd.f32 %v962_v29, %v6167_v15  ;;  %v1875_v15 = vrot.slane %v6011_v36, 5  ;;  %v1931_v60 = vpack.c.b16 %v1920_v49, %v1919_v4  ;;  %v4881_v29 = vld [vmem:[%s6999_s4 + $0x34] sm:$0xf]  ;;  %v4522_v49 = vld [vmem:[%s5562_s23 + $0x60] sm:$0xf] }
 0x123   : >> { %v1767_v17 = vpop.f32.mrf.mxu0  ;;  %v2415_v36 = vor.u32 %v2414_v56, %v6340_v45  ;;  %v2418_v31 = vshll.u32 %v4521_v20, 16  ;;  %v4581_v4 = vld [vmem:[%s5562_s23 + $0x54] sm:$0xe]  ;;  %v2406_v1 = vrot.slane %v2405_v10, 4 }
 0x124   : >> { %v6337_v44 = vadd.f32 %v1765_v35, %v1418_v40  ;;  %v4355_v35 = vrot.slane %v4347_v8, 9  ;;  %v1877_v53 = vrot.slane %v1875_v15, 4  ;;  %v2701_v40 = vrot.slane %v6322_v21, 5 }
 0x125   : >> { %v2416_v63 = vrot.slane %v2415_v36, 4  ;;  %v2420_v34 = vrot.slane %v2418_v31, 5  ;;  %v2423_v8 = vshrl.u32 %v4522_v49, 16  ;;  %v2411_v10 = vsel %vm5591_vm2, %v2406_v1, %v6340_v45 }
 0x126   : >> { %v1876_v59 = vsel %vm5802_vm5, %v4355_v35, %v1875_v15  ;;  %v1879_v21 = vsel %vm5802_vm5, %v1877_v53, %v1878_v37  ;;  %v2703_v28 = vrot.slane %v2701_v40, 4 }
 0x127   : >> { %v1191_v38 = vpop.f32.mrf.mxu2  ;;  %v2421_v20 = vsel %vm5591_vm2, %v2416_v63, %v2420_v34  ;;  %v1922_v35 = vunpack.c.l.b16 %v1879_v21  ;;  %v2425_v31 = vrot.slane %v2423_v8, 4  ;;  %v4848_v63 = vld [vmem:[%s5562_s23 + $0x54] sm:$0xff]  ;;  %v2708_v8 = vrot.slane %v6359_v24, 5 }
 0x128   : >> { %v1221_v2 = vadd.f32 %v1191_v38, %v963_v41  ;;  %v4671_v41 = vor.u32 %v4881_v29, %v4668_v27  ;;  %v2705_v36 = vsel %vm5802_vm5, %v2703_v28, %v2704_v46  ;;  %v2497_v29 = vunpack.c.l.b16 %v2411_v10  ;;  %v4582_v46 = vld [vmem:[%s5562_s23 + $0x60] sm:$0xe] }
 0x129   : >> { %v1389_v48 = vpop.f32.mrf.mxu3  ;;  %v965_v57 = vpop.f32.mrf.mxu1  ;;  %v2498_v27 = vunpack.c.l.b16 %v2421_v20 }
 0x12a   : >> { %v1419_v12 = vadd.f32 %v1389_v48, %v1221_v2  ;;  %3103 = vmatpush.bf16.msrb.mxu2 %v4671_v41  ;;  %v966_v7 = vadd.f32 %v965_v57, %v6118_v16  ;;  %v2426_v48 = vshll.u32 %v4522_v49, 16  ;;  %v2436_v16 = vshrl.u32 %v6359_v24, 16 }
 0x12b   : >> { %v1770_v50 = vpop.f32.mrf.mxu0  ;;  %v2748_v41 = vunpack.c.l.b16 %v2705_v36  ;;  %v4590_v36 = vrot.slane %v4582_v46, 9 }
 0x12c   : >> { %2019 = vmatmul.bf16.gmra.mxu1 %v1931_v60  ;;  %2217 = vmatmul.bf16.gmra.mxu2 %v4847_v58  ;;  %v6356_v61 = vadd.f32 %v1767_v17, %v1419_v12  ;;  %v4589_v17 = vrot.slane %v4581_v4, 9  ;;  %v2432_v60 = vshll.u32 %v6359_v24, 16  ;;  %v2428_v12 = vrot.slane %v2426_v48, 5  ;;  %v4524_v4 = vld [vmem:[%s5562_s23 + $0x68] sm:$0x1] }
 0x12d   : >> { %v2438_v45 = vrot.slane %v2436_v16, 4  ;;  %v2442_v28 = vshll.u32 %v4524_v4, 16  ;;  %v4660_v48 = vld [vmem:[%s6999_s4 + $0x28] sm:$0xf0]  ;;  %v1885_v24 = vrot.slane %v6068_v54, 5 }
 0x12e   : >> { %2595 = vmatmul.bf16.gmra.mxu3 %v2507_v26  ;;  %2845 = vmatmul.bf16.gmra.mxu0 %v2757_v51  ;;  %v1921_v26 = vunpack.c.l.b16 %v1876_v59  ;;  %v2702_v53 = vsel %vm5802_vm5, %v4589_v17, %v2701_v40  ;;  %v6381_v51 = vrot.slane %v2432_v60, 5  ;;  %v5232_v59 = vld [vmem:[%s5562_s23 + $0x58] sm:$0xf]  ;;  %v2429_v34 = vor.u32 %v2428_v12, %v2425_v31 }
 0x12f   : >> { %v1194_v56 = vpop.f32.mrf.mxu2  ;;  %v2747_v55 = vunpack.c.l.b16 %v2702_v53  ;;  %v1882_v21 = vrot.slane %v5232_v59, 5  ;;  %v2508_v17 = vpack.c.b16 %v2498_v27, %v2497_v29  ;;  %v4893_v60 = vld [vmem:[#allocation7 + $0x10] sm:$0xff]  ;;  %v2444_v53 = vrot.slane %v2442_v28, 5  ;;  %v4525_v29 = vld [vmem:[%s5562_s23 + $0x6c] sm:$0xf] }
 0x130   : >> { %v1222_v38 = vadd.f32 %v1194_v56, %v966_v7  ;;  %v1932_v1 = vpack.c.b16 %v1922_v35, %v1921_v26  ;;  %v4348_v7 = vld [vmem:[%s5562_s23 + $0x54] sm:$0xe]  ;;  %v2439_v56 = vor.u32 %v2438_v45, %v6381_v51  ;;  %v2430_v20 = vrot.slane %v2429_v34, 4  ;;  %3305 = vmatpush.bf16.msrb.mxu3 %v4893_v60 }
 0x131   : >> { %v1392_v2 = vpop.f32.mrf.mxu3  ;;  %v6368_v58 = vpop.f32.mrf.mxu1  ;;  %v1884_v10 = vrot.slane %v1882_v21, 4  ;;  %v2710_v31 = vrot.slane %v2708_v8, 4  ;;  %v2711_v12 = vrot.slane %v4524_v4, 5  ;;  %v2709_v59 = vsel %vm5802_vm5, %v4590_v36, %v2708_v8 }
 0x132   : >> { %v1420_v15 = vadd.f32 %v1392_v2, %v1222_v38  ;;  %v2758_v38 = vpack.c.b16 %v2748_v41, %v2747_v55  ;;  %v4879_v2 = vld [vmem:[%s6999_s4 + $0x24] sm:$0xf]  ;;  %v2440_v35 = vrot.slane %v2439_v56, 4  ;;  %v6406_v55 = vld [vmem:[%s5562_s23 + $0x70] sm:$0xf]  ;;  %v2435_v4 = vsel %vm5591_vm2, %v2430_v20, %v6381_v51 }
 0x133   : >> { %v6375_v57 = vpop.f32.mrf.mxu0  ;;  %v4663_v26 = vor.u32 %v4879_v2, %v4660_v48  ;;  %v2712_v34 = vsel %vm5802_vm5, %v2710_v31, %v2711_v12  ;;  %v2447_v56 = vshrl.u32 %v4525_v29, 16  ;;  %v2460_v28 = vshrl.u32 %v6406_v55, 16  ;;  %v4849_v12 = vld [vmem:[%s5562_s23 + $0x60] sm:$0xff] }
 0x134   : >> { %v6383_v37 = vadd.f32 %v1770_v50, %v1420_v15  ;;  %v4356_v15 = vrot.slane %v4348_v7, 9  ;;  %v2499_v8 = vunpack.c.l.b16 %v2435_v4  ;;  %v2749_v60 = vunpack.c.l.b16 %v2709_v59  ;;  %v4652_v59 = vld [vmem:[%s6999_s4 + $0x18] sm:$0xf0] }
 0x135   : >> { %3104 = vmatpush.bf16.msrb.mxu2 %v4663_v26  ;;  %v2449_v26 = vrot.slane %v2447_v56, 4  ;;  %v2462_v20 = vrot.slane %v2460_v28, 4 }
 0x136   : >> { %v1883_v54 = vsel %vm5802_vm5, %v4356_v15, %v1882_v21  ;;  %v2750_v15 = vunpack.c.l.b16 %v2712_v34  ;;  %v4892_v34 = vld [vmem:[#allocation7 + $0x8] sm:$0xff] }
 0x137   : >> { %v6386_v49 = vpop.f32.mrf.mxu2  ;;  %v1923_v46 = vunpack.c.l.b16 %v1883_v54  ;;  %3306 = vmatpush.bf16.msrb.mxu3 %v4892_v34 }
 0x139   : >> { %v6388_v40 = vpop.f32.mrf.mxu3  ;;  %v970_v50 = vpop.f32.mrf.mxu1 }
 0x13a   : >> { %v971_v45 = vadd.f32 %v970_v50, %v6156_v33  ;;  %v2445_v33 = vsel %vm5591_vm2, %v2440_v35, %v2444_v53  ;;  %v2450_v50 = vshll.u32 %v4525_v29, 16  ;;  %v4527_v53 = vld [vmem:[%s5562_s23 + $0x74] sm:$0x1]  ;;  %v4349_v29 = vld [vmem:[%s5562_s23 + $0x60] sm:$0xe] }
 0x13b   : >> { %v1775_v16 = vpop.f32.mrf.mxu0  ;;  %v2500_v48 = vunpack.c.l.b16 %v2445_v33  ;;  %v2466_v4 = vshll.u32 %v4527_v53, 16  ;;  %v4877_v33 = vld [vmem:[%s6999_s4 + $0x14] sm:$0xf]  ;;  %v4357_v28 = vrot.slane %v4349_v29, 9 }
 0x13c   : >> { %2024 = vmatmul.bf16.gmra.mxu1 %v1932_v1  ;;  %2222 = vmatmul.bf16.gmra.mxu2 %v4848_v63  ;;  %v1886_v63 = vsel %vm5802_vm5, %v1884_v10, %v1885_v24  ;;  %v2452_v10 = vrot.slane %v2450_v50, 5  ;;  %v4655_v50 = vor.u32 %v4877_v33, %v4652_v59 }
 0x13e   : >> { %2600 = vmatmul.bf16.gmra.mxu3 %v2508_v17  ;;  %2850 = vmatmul.bf16.gmra.mxu0 %v2758_v38  ;;  %v2456_v17 = vshll.u32 %v6406_v55, 16  ;;  %v1924_v38 = vunpack.c.l.b16 %v1886_v63  ;;  %v2453_v54 = vor.u32 %v2452_v10, %v2449_v26  ;;  %v2468_v26 = vrot.slane %v2466_v4, 5 }
 0x13f   : >> { %v1199_v27 = vpop.f32.mrf.mxu2  ;;  %3105 = vmatpush.bf16.msrb.mxu2 %v4655_v50 }
 0x140   : >> { %v1224_v41 = vadd.f32 %v1199_v27, %v971_v45  ;;  %v2458_v24 = vrot.slane %v2456_v17, 5  ;;  %v1933_v31 = vpack.c.b16 %v1924_v38, %v1923_v46  ;;  %v5233_v27 = vld [vmem:[%s5562_s23 + $0x64] sm:$0xf]  ;;  %v4583_v17 = vld [vmem:[%s5562_s23 + $0x6c] sm:$0xe] }
 0x141   : >> { %v1397_v1 = vpop.f32.mrf.mxu3  ;;  %v6415_v7 = vpop.f32.mrf.mxu1  ;;  %v5234_v38 = vld [vmem:[%s5562_s23 + $0x68] sm:$0x1] }
 0x142   : >> { %v1422_v21 = vadd.f32 %v1397_v1, %v1224_v41  ;;  %v1889_v41 = vrot.slane %v5233_v27, 5  ;;  %v2759_v1 = vpack.c.b16 %v2750_v15, %v2749_v60  ;;  %v2463_v63 = vor.u32 %v2462_v20, %v2458_v24 }
 0x143   : >> { %v6425_v51 = vpop.f32.mrf.mxu0  ;;  %v2454_v60 = vrot.slane %v2453_v54, 4  ;;  %v4591_v20 = vrot.slane %v4583_v17, 9  ;;  %v2718_v27 = vrot.slane %v4527_v53, 5 }
 0x144   : >> { %v6427_v2 = vadd.f32 %v1775_v16, %v1422_v21  ;;  %v2509_v16 = vpack.c.b16 %v2500_v48, %v2499_v8  ;;  %v2715_v21 = vrot.slane %v6406_v55, 5  ;;  %v1891_v46 = vrot.slane %v1889_v41, 4 }
 0x145   : >> { %v1892_v8 = vrot.slane %v5234_v38, 5  ;;  %v2464_v15 = vrot.slane %v2463_v63, 4  ;;  %v4850_v38 = vld [vmem:[%s5562_s23 + $0x6c] sm:$0xff] }
 0x146   : >> { %v2717_v55 = vrot.slane %v2715_v21, 4  ;;  %v2716_v53 = vsel %vm5802_vm5, %v4591_v20, %v2715_v21 }
 0x147   : >> { %v6429_v35 = vpop.f32.mrf.mxu2  ;;  %v1893_v29 = vsel %vm5802_vm5, %v1891_v46, %v1892_v8  ;;  %v2751_v17 = vunpack.c.l.b16 %v2716_v53 }
 0x148   : >> { %v2719_v63 = vsel %vm5802_vm5, %v2717_v55, %v2718_v27  ;;  %v1926_v4 = vunpack.c.l.b16 %v1893_v29  ;;  %v4891_v29 = vld [vmem:[#allocation7] sm:$0xff] }
 0x149   : >> { %v6432_v36 = vpop.f32.mrf.mxu3  ;;  %v975_v45 = vpop.f32.mrf.mxu1  ;;  %3307 = vmatpush.bf16.msrb.mxu3 %v4891_v29 }
 0x14a   : >> { %v976_v48 = vadd.f32 %v975_v45, %v6120_v30  ;;  %v2459_v45 = vsel %vm5591_vm2, %v2454_v60, %v2458_v24 }
 0x14b   : >> { %v1780_v56 = vpop.f32.mrf.mxu0  ;;  %v2501_v34 = vunpack.c.l.b16 %v2459_v45 }
 0x14c   : >> { %2029 = vmatmul.bf16.gmra.mxu1 %v1933_v31  ;;  %2227 = vmatmul.bf16.gmra.mxu2 %v4849_v12 }
 0x14e   : >> { %2605 = vmatmul.bf16.gmra.mxu3 %v2509_v16  ;;  %2855 = vmatmul.bf16.gmra.mxu0 %v2759_v1  ;;  %v1890_v16 = vsel %vm5802_vm5, %v4357_v28, %v1889_v41  ;;  %v2469_v1 = vsel %vm5591_vm2, %v2464_v15, %v2468_v26  ;;  %v2752_v28 = vunpack.c.l.b16 %v2719_v63 }
 0x14f   : >> { %v1204_v10 = vpop.f32.mrf.mxu2  ;;  %v1925_v41 = vunpack.c.l.b16 %v1890_v16  ;;  %v2502_v50 = vunpack.c.l.b16 %v2469_v1 }
 0x150   : >> { %v1226_v31 = vadd.f32 %v1204_v10, %v976_v48  ;;  %v2760_v21 = vpack.c.b16 %v2752_v28, %v2751_v17  ;;  %v6492_v17 = vld [vmem:[%s6997_s2] ss:$0 sm:$0xff] }
 0x151   : >> { %v1402_v12 = vpop.f32.mrf.mxu3  ;;  %v6447_v33 = vpop.f32.mrf.mxu1  ;;  %v1934_v46 = vpack.c.b16 %v1926_v4, %v1925_v41  ;;  %v2510_v48 = vpack.c.b16 %v2502_v50, %v2501_v34 }
 0x152   : >> { %v1424_v30 = vadd.f32 %v1402_v12, %v1226_v31 }
 0x153   : >> { %v6457_v54 = vpop.f32.mrf.mxu0 }
 0x154   : >> { %v6463_v59 = vadd.f32 %v1780_v56, %v1424_v30  ;;  %v4644_v56 = vld [vmem:[%s6999_s4 + $0x8] sm:$0xf0] }
 0x155   : >> { %v4647_v26 = vor.u32 %v4875_v5, %v4644_v56 }
 0x157   : >> { %v6465_v24 = vpop.f32.mrf.mxu2  ;;  %3106 = vmatpush.bf16.msrb.mxu2 %v4647_v26 }
 0x159   : >> { %v6467_v32 = vpop.f32.mrf.mxu3  ;;  %v980_v8 = vpop.f32.mrf.mxu1 }
 0x15a   : >> { %v981_v15 = vadd.f32 %v980_v8, %v6161_v42  ;;  %v6498_v8 = vld [vmem:[%s6998_s3] ss:$0 sm:$0xff] }
 0x15b   : >> { %v1785_v60 = vpop.f32.mrf.mxu0 }
 0x15c   : >> { %2034 = vmatmul.bf16.gmra.mxu1 %v1934_v46  ;;  %2232 = vmatmul.bf16.gmra.mxu2 %v4850_v38 }
 0x15e   : >> { %2610 = vmatmul.bf16.gmra.mxu3 %v2510_v48  ;;  %2860 = vmatmul.bf16.gmra.mxu0 %v2760_v21 }
 0x15f   : >> { %v1209_v10 = vpop.f32.mrf.mxu2 }
 0x160   : >> { %v1228_v20 = vadd.f32 %v1209_v10, %v981_v15 }
 0x161   : >> { %v1407_v55 = vpop.f32.mrf.mxu3  ;;  %v6477_v27 = vpop.f32.mrf.mxu1 }
 0x162   : >> { %v1426_v31 = vadd.f32 %v1407_v55, %v1228_v20 }
 0x163   : >> { %v6479_v12 = vpop.f32.mrf.mxu0 }
 0x164   : >> { %v6481_v16 = vadd.f32 %v1785_v60, %v1426_v31 }
 0x167   : >> { %v6483_v30 = vpop.f32.mrf.mxu2 }
 0x169   : >> { %v6485_v45 = vpop.f32.mrf.mxu3  ;;  %v2000_v42 = vpop.f32.mrf.mxu1 }
 0x16a   : >> { %v2040_v53 = vadd.f32 %v2000_v42, %v6220_v14 }
 0x16b   : >> { %v2826_v1 = vpop.f32.mrf.mxu0 }
 0x16c   : >> { %3107 = vmatmul.bf16.vlgmr.msrb.gmra.mxu2 %v5875_v3 }
 0x16f   : >> { %v2198_v63 = vpop.f32.mrf.mxu2 }
 0x170   : >> { %v2238_v41 = vadd.f32 %v2198_v63, %v2040_v53 }
 0x171   : >> { %v2576_v4 = vpop.f32.mrf.mxu3  ;;  %v2002_v34 = vpop.f32.mrf.mxu1 }
 0x172   : >> { %v2616_v50 = vadd.f32 %v2576_v4, %v2238_v41  ;;  %v2041_v14 = vadd.f32 %v2002_v34, %v6237_v23 }
 0x173   : >> { %v2828_v28 = vpop.f32.mrf.mxu0 }
 0x174   : >> { %v2866_v46 = vadd.f32 %v2826_v1, %v2616_v50 }
 0x176   : >> { %v2886_v38 = vmul.f32 %v6492_v17, %v2866_v46 }
 0x177   : >> { %v2200_v48 = vpop.f32.mrf.mxu2 }
 0x178   : >> { %v2239_v21 = vadd.f32 %v2200_v48, %v2041_v14  ;;  %v2906_v56 = vadd.f32 %v6498_v8, %v2886_v38 }
 0x179   : >> { %v2578_v60 = vpop.f32.mrf.mxu3  ;;  %v2005_v5 = vpop.f32.mrf.mxu1 }
 0x17a   : >> { %v2617_v15 = vadd.f32 %v2578_v60, %v2239_v21  ;;  %v2922_v20 = vmax.f32 %v2906_v56, 0.0  ;;  %v2042_v23 = vadd.f32 %v2005_v5, %v6259_v22 }
 0x17b   : >> { %v2831_v26 = vpop.f32.mrf.mxu0 }
 0x17c   : >> { %v2867_v10 = vadd.f32 %v2828_v28, %v2617_v15  ;;  %3112 = vmatmul.bf16.gmra.mxu2 %v5935_v11  ;;  %v2938_v63 = vpack.c.bf16 %v2922_v20, %v2922_v20 }
 0x17e   : >> { %v2887_v55 = vmul.f32 %v6492_v17, %v2867_v10  ;;  %v3220_v38 = vunpack.c.l.b16 %v2938_v63 }
 0x17f   : >> { %v2203_v31 = vpop.f32.mrf.mxu2 }
 0x180   : >> { %v2907_v29 = vadd.f32 %v6498_v8, %v2887_v55  ;;  %v2240_v42 = vadd.f32 %v2203_v31, %v2042_v23 }
 0x181   : >> { %v2581_v1 = vpop.f32.mrf.mxu3  ;;  %v2007_v53 = vpop.f32.mrf.mxu1 }
 0x182   : >> { %v2923_v41 = vmax.f32 %v2907_v29, 0.0  ;;  %v2618_v4 = vadd.f32 %v2581_v1, %v2240_v42  ;;  %v2043_v48 = vadd.f32 %v2007_v53, %v6277_v39 }
 0x183   : >> { %v2833_v34 = vpop.f32.mrf.mxu0 }
 0x184   : >> { %v2939_v50 = vpack.c.bf16 %v2923_v41, %v2923_v41  ;;  %v4911_v28 = vpack.c.bf16 %v2923_v41, %v2922_v20  ;;  %v2868_v46 = vadd.f32 %v2831_v26, %v2618_v4  ;;  %v4906_v26 = vld [vmem:[#allocation10 + $0x38] sm:$0xff] }
 0x185   : >> { %3497 = vmatpush.bf16.msrb.mxu0 %v4906_v26 }
 0x186   : >> { %v3221_v14 = vunpack.c.l.b16 %v2939_v50  ;;  %4912 = vst [vmem:[%s6512_s15] sm:$0xff] %v4911_v28   ;;  %v2888_v22 = vmul.f32 %v6492_v17, %v2868_v46 }
 0x187   : >> { %v2205_v21 = vpop.f32.mrf.mxu2 }
 0x188   : >> { %v2241_v60 = vadd.f32 %v2205_v21, %v2043_v48  ;;  %v3236_v56 = vpack.c.b16 %v3221_v14, %v3220_v38  ;;  %v2908_v10 = vadd.f32 %v6498_v8, %v2888_v22 }
 0x189   : >> { %v2583_v5 = vpop.f32.mrf.mxu3  ;;  %v2010_v15 = vpop.f32.mrf.mxu1 }
 0x18a   : >> { %v2619_v20 = vadd.f32 %v2583_v5, %v2241_v60  ;;  %3308 = vmatmul.bf16.vlgmr.msrb.gmra.mxu3 %v3236_v56  ;;  %v2924_v31 = vmax.f32 %v2908_v10, 0.0  ;;  %v2044_v39 = vadd.f32 %v2010_v15, %v6300_v19 }
 0x18b   : >> { %v2836_v55 = vpop.f32.mrf.mxu0 }
 0x18c   : >> { %v2869_v23 = vadd.f32 %v2833_v34, %v2619_v20  ;;  %3117 = vmatmul.bf16.gmra.mxu2 %v5967_v47  ;;  %v2940_v28 = vpack.c.bf16 %v2924_v31, %v2924_v31 }
 0x18e   : >> { %v2889_v29 = vmul.f32 %v6492_v17, %v2869_v23  ;;  %v3222_v21 = vunpack.c.l.b16 %v2940_v28  ;;  %v4905_v23 = vld [vmem:[#allocation10 + $0x30] sm:$0xff] }
 0x18f   : >> { %v2208_v42 = vpop.f32.mrf.mxu2  ;;  %3498 = vmatpush.bf16.msrb.mxu0 %v4905_v23  ;;  %v4904_v23 = vld [vmem:[#allocation10 + $0x28] sm:$0xff] }
 0x190   : >> { %v2909_v1 = vadd.f32 %v6498_v8, %v2889_v29  ;;  %v2242_v53 = vadd.f32 %v2208_v42, %v2044_v39 }
 0x191   : >> { %v2586_v63 = vpop.f32.mrf.mxu3  ;;  %v2012_v41 = vpop.f32.mrf.mxu1 }
 0x192   : >> { %v2925_v4 = vmax.f32 %v2909_v1, 0.0  ;;  %v2620_v50 = vadd.f32 %v2586_v63, %v2242_v53  ;;  %v2045_v48 = vadd.f32 %v2012_v41, %v6316_v9 }
 0x193   : >> { %v2838_v46 = vpop.f32.mrf.mxu0  ;;  %3499 = vmatpush.bf16.msrb.mxu0 %v4904_v23 }
 0x194   : >> { %v4916_v34 = vpack.c.bf16 %v2925_v4, %v2924_v31  ;;  %v2870_v38 = vadd.f32 %v2836_v55, %v2620_v50  ;;  %v2941_v14 = vpack.c.bf16 %v2925_v4, %v2925_v4 }
 0x196   : >> { %5052 = vst [vmem:[%s6512_s15 + $0x8] sm:$0xff] %v4916_v34   ;;  %v2890_v22 = vmul.f32 %v6492_v17, %v2870_v38  ;;  %v3223_v19 = vunpack.c.l.b16 %v2941_v14 }
 0x197   : >> { %v2210_v60 = vpop.f32.mrf.mxu2 }
 0x198   : >> { %v2243_v5 = vadd.f32 %v2210_v60, %v2045_v48  ;;  %v3237_v15 = vpack.c.b16 %v3223_v19, %v3222_v21  ;;  %v2910_v20 = vadd.f32 %v6498_v8, %v2890_v22 }
 0x199   : >> { %v2588_v56 = vpop.f32.mrf.mxu3  ;;  %v2015_v10 = vpop.f32.mrf.mxu1 }
 0x19a   : >> { %v2621_v26 = vadd.f32 %v2588_v56, %v2243_v5  ;;  %3313 = vmatmul.bf16.gmra.mxu3 %v3237_v15  ;;  %v2926_v29 = vmax.f32 %v2910_v20, 0.0  ;;  %v2046_v39 = vadd.f32 %v2015_v10, %v6337_v44  ;;  %v968_v10 = vadd.f32 %v6368_v58, %v6137_v52 }
 0x19b   : >> { %v2841_v31 = vpop.f32.mrf.mxu0 }
 0x19c   : >> { %v2871_v55 = vadd.f32 %v2838_v46, %v2621_v26  ;;  %3122 = vmatmul.bf16.gmra.mxu2 %v6001_v25  ;;  %v2942_v28 = vpack.c.bf16 %v2926_v29, %v2926_v29 }
 0x19e   : >> { %v2891_v9 = vmul.f32 %v6492_v17, %v2871_v55  ;;  %v3224_v21 = vunpack.c.l.b16 %v2942_v28  ;;  %v1223_v55 = vadd.f32 %v6386_v49, %v968_v10 }
 0x19f   : >> { %v2213_v42 = vpop.f32.mrf.mxu2 }
 0x1a0   : >> { %v2911_v1 = vadd.f32 %v6498_v8, %v2891_v9  ;;  %v2244_v53 = vadd.f32 %v2213_v42, %v2046_v39  ;;  %v1421_v52 = vadd.f32 %v6388_v40, %v1223_v55 }
 0x1a1   : >> { %v2591_v63 = vpop.f32.mrf.mxu3  ;;  %v2017_v41 = vpop.f32.mrf.mxu1 }
 0x1a2   : >> { %v2927_v4 = vmax.f32 %v2911_v1, 0.0  ;;  %v2622_v50 = vadd.f32 %v2591_v63, %v2244_v53  ;;  %v2047_v48 = vadd.f32 %v2017_v41, %v6356_v61 }
 0x1a3   : >> { %v2843_v34 = vpop.f32.mrf.mxu0 }
 0x1a4   : >> { %v4921_v46 = vpack.c.bf16 %v2927_v4, %v2926_v29  ;;  %v2872_v38 = vadd.f32 %v2841_v31, %v2622_v50  ;;  %v2943_v14 = vpack.c.bf16 %v2927_v4, %v2927_v4 }
 0x1a6   : >> { %5053 = vst [vmem:[%s6512_s15 + $0x10] sm:$0xff] %v4921_v46   ;;  %v2892_v22 = vmul.f32 %v6492_v17, %v2872_v38  ;;  %v3225_v44 = vunpack.c.l.b16 %v2943_v14  ;;  %v1799_v46 = vadd.f32 %v6375_v57, %v1421_v52  ;;  %v4903_v57 = vld [vmem:[#allocation10 + $0x20] sm:$0xff] }
 0x1a7   : >> { %v2215_v19 = vpop.f32.mrf.mxu2  ;;  %3500 = vmatpush.bf16.msrb.mxu0 %v4903_v57 }
 0x1a8   : >> { %v2245_v60 = vadd.f32 %v2215_v19, %v2047_v48  ;;  %v3238_v56 = vpack.c.b16 %v3225_v44, %v3224_v21  ;;  %v2912_v20 = vadd.f32 %v6498_v8, %v2892_v22 }
 0x1a9   : >> { %v2593_v5 = vpop.f32.mrf.mxu3  ;;  %v2020_v15 = vpop.f32.mrf.mxu1 }
 0x1aa   : >> { %v2623_v26 = vadd.f32 %v2593_v5, %v2245_v60  ;;  %3318 = vmatmul.bf16.gmra.mxu3 %v3238_v56  ;;  %v2928_v61 = vmax.f32 %v2912_v20, 0.0  ;;  %v2048_v39 = vadd.f32 %v2020_v15, %v6383_v37  ;;  %v973_v5 = vadd.f32 %v6415_v7, %v6184_v43 }
 0x1ab   : >> { %v2846_v31 = vpop.f32.mrf.mxu0 }
 0x1ac   : >> { %v2873_v29 = vadd.f32 %v2843_v34, %v2623_v26  ;;  %3127 = vmatmul.bf16.gmra.mxu2 %v6041_v13  ;;  %v2944_v4 = vpack.c.bf16 %v2928_v61, %v2928_v61  ;;  %v1225_v20 = vadd.f32 %v6429_v35, %v973_v5 }
 0x1ae   : >> { %v2893_v9 = vmul.f32 %v6492_v17, %v2873_v29  ;;  %v3226_v22 = vunpack.c.l.b16 %v2944_v4  ;;  %v1423_v43 = vadd.f32 %v6432_v36, %v1225_v20 }
 0x1af   : >> { %v2218_v42 = vpop.f32.mrf.mxu2 }
 0x1b0   : >> { %v2913_v58 = vadd.f32 %v6498_v8, %v2893_v9  ;;  %v2246_v1 = vadd.f32 %v2218_v42, %v2048_v39 }
 0x1b1   : >> { %v2596_v53 = vpop.f32.mrf.mxu3  ;;  %v2022_v63 = vpop.f32.mrf.mxu1 }
 0x1b2   : >> { %v2929_v41 = vmax.f32 %v2913_v58, 0.0  ;;  %v2624_v49 = vadd.f32 %v2596_v53, %v2246_v1  ;;  %v2049_v14 = vadd.f32 %v2022_v63, %v1799_v46  ;;  %v1801_v63 = vadd.f32 %v6425_v51, %v1423_v43  ;;  %v4902_v51 = vld [vmem:[#allocation10 + $0x18] sm:$0xff] }
 0x1b3   : >> { %v2848_v50 = vpop.f32.mrf.mxu0  ;;  %3501 = vmatpush.bf16.msrb.mxu0 %v4902_v51 }
 0x1b4   : >> { %v4926_v28 = vpack.c.bf16 %v2929_v41, %v2928_v61  ;;  %v2874_v34 = vadd.f32 %v2846_v31, %v2624_v49  ;;  %v2945_v38 = vpack.c.bf16 %v2929_v41, %v2929_v41 }
 0x1b6   : >> { %5054 = vst [vmem:[%s6512_s15 + $0x18] sm:$0xff] %v4926_v28   ;;  %v2894_v37 = vmul.f32 %v6492_v17, %v2874_v34  ;;  %v3227_v40 = vunpack.c.l.b16 %v2945_v38 }
 0x1b7   : >> { %v2220_v48 = vpop.f32.mrf.mxu2 }
 0x1b8   : >> { %v2247_v21 = vadd.f32 %v2220_v48, %v2049_v14  ;;  %v3239_v19 = vpack.c.b16 %v3227_v40, %v3226_v22  ;;  %v2914_v56 = vadd.f32 %v6498_v8, %v2894_v37  ;;  %v978_v37 = vadd.f32 %v6447_v33, %v6139_v6  ;;  %v4698_v40 = vld [vmem:[%s6999_s4 + $0x70] sm:$0xf]  ;;  %v4890_v48 = vld [vmem:[%s6999_s4 + $0x74] sm:$0xf0] }
 0x1b9   : >> { %v2598_v44 = vpop.f32.mrf.mxu3  ;;  %v2025_v60 = vpop.f32.mrf.mxu1 }
 0x1ba   : >> { %v2625_v15 = vadd.f32 %v2598_v44, %v2247_v21  ;;  %3323 = vmatmul.bf16.gmra.mxu3 %v3239_v19  ;;  %v2930_v23 = vmax.f32 %v2914_v56, 0.0  ;;  %v2050_v55 = vadd.f32 %v2025_v60, %v6427_v2  ;;  %v4699_v21 = vor.u32 %v4890_v48, %v4698_v40 }
 0x1bb   : >> { %v2851_v10 = vpop.f32.mrf.mxu0  ;;  %v1227_v44 = vadd.f32 %v6465_v24, %v978_v37  ;;  %v7030_v37 = vld [vmem:[#allocation19_spill] sm:$0xff] }
 0x1bc   : >> { %v2875_v26 = vadd.f32 %v2848_v50, %v2625_v15  ;;  %3132 = vmatmul.bf16.gmra.mxu2 %v6073_v0  ;;  %v2946_v52 = vpack.c.bf16 %v2930_v23, %v2930_v23  ;;  %3050 = vmatpush.bf16.msrb.mxu1 %v4699_v21 }
 0x1bd   : >> { %v1425_v15 = vadd.f32 %v6467_v32, %v1227_v44  ;;  %v4901_v32 = vld [vmem:[#allocation10 + $0x10] sm:$0xff] }
 0x1be   : >> { %v2895_v31 = vmul.f32 %v6492_v17, %v2875_v26  ;;  %v3228_v4 = vunpack.c.l.b16 %v2946_v52  ;;  %3502 = vmatpush.bf16.msrb.mxu0 %v4901_v32 }
 0x1bf   : >> { %v2223_v29 = vpop.f32.mrf.mxu2  ;;  %v1803_v43 = vadd.f32 %v6457_v54, %v1425_v15 }
 0x1c0   : >> { %v2915_v7 = vadd.f32 %v6498_v8, %v2895_v31  ;;  %v2248_v61 = vadd.f32 %v2223_v29, %v2050_v55 }
 0x1c1   : >> { %v2601_v9 = vpop.f32.mrf.mxu3  ;;  %v2027_v39 = vpop.f32.mrf.mxu1 }
 0x1c2   : >> { %v2931_v42 = vmax.f32 %v2915_v7, 0.0  ;;  %v2626_v35 = vadd.f32 %v2601_v9, %v2248_v61  ;;  %v2051_v49 = vadd.f32 %v2027_v39, %v1801_v63 }
 0x1c3   : >> { %v2853_v58 = vpop.f32.mrf.mxu0 }
 0x1c4   : >> { %v4931_v1 = vpack.c.bf16 %v2931_v42, %v2930_v23  ;;  %v2876_v53 = vadd.f32 %v2851_v10, %v2626_v35  ;;  %v2947_v41 = vpack.c.bf16 %v2931_v42, %v2931_v42  ;;  %v4690_v42 = vld [vmem:[%s6999_s4 + $0x60] sm:$0xf]  ;;  %v4888_v35 = vld [vmem:[%s6999_s4 + $0x64] sm:$0xf0] }
 0x1c6   : >> { %5055 = vst [vmem:[%s6512_s15 + $0x20] sm:$0xff] %v4931_v1   ;;  %v2896_v2 = vmul.f32 %v6492_v17, %v2876_v53  ;;  %v3229_v36 = vunpack.c.l.b16 %v2947_v41  ;;  %v4691_v1 = vor.u32 %v4888_v35, %v4690_v42  ;;  %v4899_v35 = vld [vmem:[#allocation10] sm:$0xff] }
 0x1c7   : >> { %v2225_v50 = vpop.f32.mrf.mxu2 }
 0x1c8   : >> { %v2249_v28 = vadd.f32 %v2225_v50, %v2051_v49  ;;  %v3240_v46 = vpack.c.b16 %v3229_v36, %v3228_v4  ;;  %v2916_v14 = vadd.f32 %v6498_v8, %v2896_v2  ;;  %3051 = vmatpush.bf16.msrb.mxu1 %v4691_v1  ;;  %v983_v2 = vadd.f32 %v6477_v27, %v6186_v62  ;;  %v4900_v36 = vld [vmem:[#allocation10 + $0x8] sm:$0xff] }
 0x1c9   : >> { %v2603_v34 = vpop.f32.mrf.mxu3  ;;  %v2030_v38 = vpop.f32.mrf.mxu1  ;;  %v4682_v50 = vld [vmem:[%s6999_s4 + $0x50] sm:$0xf]  ;;  %3503 = vmatpush.bf16.msrb.mxu0 %v4900_v36 }
 0x1ca   : >> { %v2627_v22 = vadd.f32 %v2603_v34, %v2249_v28  ;;  %3328 = vmatmul.bf16.gmra.mxu3 %v3240_v46  ;;  %v2932_v33 = vmax.f32 %v2916_v14, 0.0  ;;  %v2052_v5 = vadd.f32 %v2030_v38, %v6463_v59  ;;  %v4886_v28 = vld [vmem:[%s6999_s4 + $0x54] sm:$0xf0]  ;;  %v1229_v46 = vadd.f32 %v6483_v30, %v983_v2 }
 0x1cb   : >> { %v2856_v6 = vpop.f32.mrf.mxu0  ;;  %v4683_v34 = vor.u32 %v4886_v28, %v4682_v50  ;;  %v4882_v2 = vld [vmem:[%s6999_s4 + $0x34] sm:$0xf0]  ;;  %v4658_v50 = vld [vmem:[%s6999_s4 + $0x20] sm:$0xf]  ;;  %v4880_v28 = vld [vmem:[%s6999_s4 + $0x24] sm:$0xf0] }
 0x1cc   : >> { %v2877_v19 = vadd.f32 %v2853_v58, %v2627_v22  ;;  %3137 = vmatmul.bf16.gmra.mxu2 %v6110_v18  ;;  %v2948_v31 = vpack.c.bf16 %v2932_v33, %v2932_v33  ;;  %v1427_v51 = vadd.f32 %v6485_v45, %v1229_v46 }
 0x1cd   : >> { %3052 = vmatpush.bf16.msrb.mxu1 %v4683_v34  ;;  %3504 = vmatpush.bf16.msrb.mxu0 %v4899_v35  ;;  %v4659_v34 = vor.u32 %v4880_v28, %v4658_v50 }
 0x1ce   : >> { %v2897_v60 = vmul.f32 %v6492_v17, %v2877_v19  ;;  %v3230_v9 = vunpack.c.l.b16 %v2948_v31 }
 0x1cf   : >> { %v2228_v56 = vpop.f32.mrf.mxu2 }
 0x1d0   : >> { %v2917_v57 = vadd.f32 %v6498_v8, %v2897_v60  ;;  %v2250_v10 = vadd.f32 %v2228_v56, %v2052_v5  ;;  %v1805_v56 = vadd.f32 %v6479_v12, %v1427_v51  ;;  %v6636_v51 = vld [vmem:[%s7004_s9] ss:$0 sm:$0xff] }
 0x1d1   : >> { %v2606_v20 = vpop.f32.mrf.mxu3  ;;  %v2032_v24 = vpop.f32.mrf.mxu1 }
 0x1d2   : >> { %v2933_v26 = vmax.f32 %v2917_v57, 0.0  ;;  %v2628_v23 = vadd.f32 %v2606_v20, %v2250_v10  ;;  %v2053_v59 = vadd.f32 %v2032_v24, %v1803_v43 }
 0x1d3   : >> { %v2858_v52 = vpop.f32.mrf.mxu0 }
 0x1d4   : >> { %v4936_v55 = vpack.c.bf16 %v2933_v26, %v2932_v33  ;;  %v2878_v29 = vadd.f32 %v2856_v6, %v2628_v23  ;;  %v2949_v7 = vpack.c.bf16 %v2933_v26, %v2933_v26 }
 0x1d6   : >> { %5056 = vst [vmem:[%s6512_s15 + $0x28] sm:$0xff] %v4936_v55   ;;  %v2898_v61 = vmul.f32 %v6492_v17, %v2878_v29  ;;  %v3231_v39 = vunpack.c.l.b16 %v2949_v7 }
 0x1d7   : >> { %v2230_v58 = vpop.f32.mrf.mxu2 }
 0x1d8   : >> { %v2251_v54 = vadd.f32 %v2230_v58, %v2053_v59  ;;  %v3241_v63 = vpack.c.b16 %v3231_v39, %v3230_v9  ;;  %v2918_v49 = vadd.f32 %v6498_v8, %v2898_v61  ;;  %v4884_v58 = vld [vmem:[%s6999_s4 + $0x44] sm:$0xf0] }
 0x1d9   : >> { %v2608_v53 = vpop.f32.mrf.mxu3  ;;  %v2035_v41 = vpop.f32.mrf.mxu1 }
 0x1da   : >> { %v2629_v4 = vadd.f32 %v2608_v53, %v2251_v54  ;;  %3333 = vmatmul.bf16.gmra.mxu3 %v3241_v63  ;;  %v2934_v62 = vmax.f32 %v2918_v49, 0.0  ;;  %v2054_v14 = vadd.f32 %v2035_v41, %v6481_v16  ;;  %v4666_v41 = vld [vmem:[%s6999_s4 + $0x30] sm:$0xf] }
 0x1db   : >> { %v2861_v44 = vpop.f32.mrf.mxu0  ;;  %v4667_v49 = vor.u32 %v4882_v2, %v4666_v41 }
 0x1dc   : >> { %v2879_v38 = vadd.f32 %v2858_v52, %v2629_v4  ;;  %3142 = vmatmul.bf16.gmra.mxu2 %v7030_v37  ;;  %v2950_v6 = vpack.c.bf16 %v2934_v62, %v2934_v62  ;;  %v4674_v52 = vld [vmem:[%s6999_s4 + $0x40] sm:$0xf] }
 0x1dd   : >> { %v4675_v1 = vor.u32 %v4884_v58, %v4674_v52 }
 0x1de   : >> { %v2899_v27 = vmul.f32 %v6492_v17, %v2879_v38  ;;  %v3232_v10 = vunpack.c.l.b16 %v2950_v6  ;;  %v6624_v38 = vld [vmem:[%s7003_s8] ss:$0 sm:$0xff] }
 0x1df   : >> { %v2233_v22 = vpop.f32.mrf.mxu2  ;;  %3053 = vmatpush.bf16.msrb.mxu1 %v4675_v1 }
 0x1e0   : >> { %v2919_v40 = vadd.f32 %v6498_v8, %v2899_v27  ;;  %v2252_v48 = vadd.f32 %v2233_v22, %v2054_v14  ;;  %v4878_v27 = vld [vmem:[%s6999_s4 + $0x14] sm:$0xf0] }
 0x1e1   : >> { %v2611_v21 = vpop.f32.mrf.mxu3  ;;  %v2037_v33 = vpop.f32.mrf.mxu1 }
 0x1e2   : >> { %v2935_v30 = vmax.f32 %v2919_v40, 0.0  ;;  %v2630_v19 = vadd.f32 %v2611_v21, %v2252_v48  ;;  %v2055_v57 = vadd.f32 %v2037_v33, %v1805_v56  ;;  %v4642_v21 = vld [vmem:[%s6999_s4] sm:$0xf] }
 0x1e3   : >> { %v2863_v29 = vpop.f32.mrf.mxu0  ;;  %3054 = vmatpush.bf16.msrb.mxu1 %v4667_v49 }
 0x1e4   : >> { %v4941_v60 = vpack.c.bf16 %v2935_v30, %v2934_v62  ;;  %v2880_v5 = vadd.f32 %v2861_v44, %v2630_v19  ;;  %v2951_v15 = vpack.c.bf16 %v2935_v30, %v2935_v30  ;;  %v4650_v62 = vld [vmem:[%s6999_s4 + $0x10] sm:$0xf]  ;;  %v4876_v44 = vld [vmem:[%s6999_s4 + $0x4] sm:$0xf0] }
 0x1e5   : >> { %v4651_v14 = vor.u32 %v4878_v27, %v4650_v62  ;;  %v4643_v19 = vor.u32 %v4876_v44, %v4642_v21 }
 0x1e6   : >> { %5057 = vst [vmem:[%s6512_s15 + $0x30] sm:$0xff] %v4941_v60   ;;  %v2900_v16 = vmul.f32 %v6492_v17, %v2880_v5  ;;  %v3233_v45 = vunpack.c.l.b16 %v2951_v15 }
 0x1e7   : >> { %v2235_v20 = vpop.f32.mrf.mxu2  ;;  %3055 = vmatpush.bf16.msrb.mxu1 %v4659_v34 }
 0x1e8   : >> { %v2253_v24 = vadd.f32 %v2235_v20, %v2055_v57  ;;  %v3242_v26 = vpack.c.b16 %v3233_v45, %v3232_v10  ;;  %v2920_v31 = vadd.f32 %v6498_v8, %v2900_v16 }
 0x1e9   : >> { %v2613_v23 = vpop.f32.mrf.mxu3 }
 0x1ea   : >> { %v2631_v55 = vadd.f32 %v2613_v23, %v2253_v24  ;;  %3338 = vmatmul.bf16.gmra.mxu3 %v3242_v26  ;;  %v2936_v7 = vmax.f32 %v2920_v31, 0.0 }
 0x1eb   : >> { %3056 = vmatpush.bf16.msrb.mxu1 %v4651_v14 }
 0x1ec   : >> { %v2881_v43 = vadd.f32 %v2863_v29, %v2631_v55  ;;  %v2952_v39 = vpack.c.bf16 %v2936_v7, %v2936_v7 }
 0x1ee   : >> { %v2901_v12 = vmul.f32 %v6492_v17, %v2881_v43  ;;  %v3234_v54 = vunpack.c.l.b16 %v2952_v39 }
 0x1ef   : >> { %v3108_v61 = vpop.f32.mrf.mxu2  ;;  %3057 = vmatpush.bf16.msrb.mxu1 %v4643_v19 }
 0x1f0   : >> { %v2921_v59 = vadd.f32 %v6498_v8, %v2901_v12 }
 0x1f2   : >> { %v2937_v9 = vmax.f32 %v2921_v59, 0.0  ;;  %3058 = vmatmul.bf16.vlgmr.msrb.gmra.mxu1 %v5875_v3 }
 0x1f4   : >> { %v4946_v32 = vpack.c.bf16 %v2937_v9, %v2936_v7  ;;  %v2953_v42 = vpack.c.bf16 %v2937_v9, %v2937_v9 }
 0x1f6   : >> { %5058 = vst [vmem:[%s6512_s15 + $0x38] sm:$0xff] %v4946_v32   ;;  %v3235_v17 = vunpack.c.l.b16 %v2953_v42 }
 0x1f7   : >> { %v3110_v53 = vpop.f32.mrf.mxu2 }
 0x1f8   : >> { %v3243_v8 = vpack.c.b16 %v3235_v17, %v3234_v54 }
 0x1fa   : >> { %3343 = vmatmul.bf16.gmra.mxu3 %v3243_v8 }
 0x1ff   : >> { %v3113_v63 = vpop.f32.mrf.mxu2 }
 0x202   : >> { %3063 = vmatmul.bf16.gmra.mxu1 %v5935_v11 }
 0x207   : >> { %v3115_v36 = vpop.f32.mrf.mxu2 }
 0x20d   : >> { %v3309_v4 = vpop.f32.mrf.mxu3 }
 0x20e   : >> { %v3349_v46 = vadd.f32 %v3309_v4, %v3108_v61 }
 0x20f   : >> { %v3118_v30 = vpop.f32.mrf.mxu2 }
 0x210   : >> { %v3369_v22 = vmul.f32 %v6624_v38, %v3349_v46 }
 0x212   : >> { %v3389_v6 = vadd.f32 %v6636_v51, %v3369_v22  ;;  %3068 = vmatmul.bf16.gmra.mxu1 %v5967_v47 }
 0x214   : >> { %v3405_v5 = vmax.f32 %v3389_v6, 0.0 }
 0x215   : >> { %v3311_v40 = vpop.f32.mrf.mxu3 }
 0x216   : >> { %v3350_v48 = vadd.f32 %v3311_v40, %v3110_v53 }
 0x217   : >> { %v3120_v10 = vpop.f32.mrf.mxu2 }
 0x218   : >> { %v3370_v33 = vmul.f32 %v6624_v38, %v3350_v48 }
 0x21a   : >> { %v3390_v60 = vadd.f32 %v6636_v51, %v3370_v33 }
 0x21c   : >> { %v3406_v56 = vmax.f32 %v3390_v60, 0.0 }
 0x21d   : >> { %v3314_v15 = vpop.f32.mrf.mxu3 }
 0x21e   : >> { %v3421_v16 = vpack.c.bf16 %v3406_v56, %v3405_v5  ;;  %v3351_v57 = vadd.f32 %v3314_v15, %v3113_v63 }
 0x21f   : >> { %v3123_v55 = vpop.f32.mrf.mxu2 }
 0x220   : >> { %3505 = vmatmul.bf16.vlgmr.msrb.gmra.mxu0 %v3421_v16  ;;  %v3371_v45 = vmul.f32 %v6624_v38, %v3351_v57 }
 0x222   : >> { %v3391_v26 = vadd.f32 %v6636_v51, %v3371_v45  ;;  %3073 = vmatmul.bf16.gmra.mxu1 %v6001_v25 }
 0x224   : >> { %v3407_v29 = vmax.f32 %v3391_v26, 0.0 }
 0x225   : >> { %v3316_v20 = vpop.f32.mrf.mxu3 }
 0x226   : >> { %v3352_v24 = vadd.f32 %v3316_v20, %v3115_v36 }
 0x227   : >> { %v3125_v9 = vpop.f32.mrf.mxu2 }
 0x228   : >> { %v3372_v23 = vmul.f32 %v6624_v38, %v3352_v24 }
 0x22a   : >> { %v3392_v31 = vadd.f32 %v6636_v51, %v3372_v23 }
 0x22c   : >> { %v3408_v43 = vmax.f32 %v3392_v31, 0.0 }
 0x22d   : >> { %v3319_v3 = vpop.f32.mrf.mxu3 }
 0x22e   : >> { %v3422_v7 = vpack.c.bf16 %v3408_v43, %v3407_v29  ;;  %v3353_v12 = vadd.f32 %v3319_v3, %v3118_v30 }
 0x22f   : >> { %v3128_v54 = vpop.f32.mrf.mxu2 }
 0x230   : >> { %3510 = vmatmul.bf16.gmra.mxu0 %v3422_v7  ;;  %v3373_v61 = vmul.f32 %v6624_v38, %v3353_v12 }
 0x232   : >> { %v3393_v32 = vadd.f32 %v6636_v51, %v3373_v61  ;;  %3078 = vmatmul.bf16.gmra.mxu1 %v6041_v13 }
 0x234   : >> { %v3409_v52 = vmax.f32 %v3393_v32, 0.0 }
 0x235   : >> { %v3321_v59 = vpop.f32.mrf.mxu3 }
 0x236   : >> { %v3354_v39 = vadd.f32 %v3321_v59, %v3120_v10 }
 0x237   : >> { %v3130_v49 = vpop.f32.mrf.mxu2 }
 0x238   : >> { %v3374_v42 = vmul.f32 %v6624_v38, %v3354_v39 }
 0x23a   : >> { %v3394_v35 = vadd.f32 %v6636_v51, %v3374_v42 }
 0x23c   : >> { %v3410_v58 = vmax.f32 %v3394_v35, 0.0 }
 0x23d   : >> { %v3324_v11 = vpop.f32.mrf.mxu3 }
 0x23e   : >> { %v3423_v1 = vpack.c.bf16 %v3410_v58, %v3409_v52  ;;  %v3355_v17 = vadd.f32 %v3324_v11, %v3123_v55 }
 0x23f   : >> { %v3133_v46 = vpop.f32.mrf.mxu2 }
 0x240   : >> { %3515 = vmatmul.bf16.gmra.mxu0 %v3423_v1  ;;  %v3375_v8 = vmul.f32 %v6624_v38, %v3355_v17 }
 0x242   : >> { %v3395_v41 = vadd.f32 %v6636_v51, %v3375_v8  ;;  %3083 = vmatmul.bf16.gmra.mxu1 %v6073_v0 }
 0x244   : >> { %v3411_v36 = vmax.f32 %v3395_v41, 0.0 }
 0x245   : >> { %v3326_v53 = vpop.f32.mrf.mxu3 }
 0x246   : >> { %v3356_v63 = vadd.f32 %v3326_v53, %v3125_v9 }
 0x247   : >> { %v3135_v25 = vpop.f32.mrf.mxu2 }
 0x248   : >> { %v3376_v2 = vmul.f32 %v6624_v38, %v3356_v63 }
 0x24a   : >> { %v3396_v4 = vadd.f32 %v6636_v51, %v3376_v2 }
 0x24c   : >> { %v3412_v50 = vmax.f32 %v3396_v4, 0.0 }
 0x24d   : >> { %v3329_v47 = vpop.f32.mrf.mxu3 }
 0x24e   : >> { %v3424_v28 = vpack.c.bf16 %v3412_v50, %v3411_v36  ;;  %v3357_v34 = vadd.f32 %v3329_v47, %v3128_v54 }
 0x24f   : >> { %v3138_v56 = vpop.f32.mrf.mxu2 }
 0x250   : >> { %3520 = vmatmul.bf16.gmra.mxu0 %v3424_v28  ;;  %v3377_v62 = vmul.f32 %v6624_v38, %v3357_v34 }
 0x252   : >> { %v3397_v22 = vadd.f32 %v6636_v51, %v3377_v62  ;;  %3088 = vmatmul.bf16.gmra.mxu1 %v6110_v18 }
 0x254   : >> { %v3413_v21 = vmax.f32 %v3397_v22, 0.0 }
 0x255   : >> { %v3331_v27 = vpop.f32.mrf.mxu3 }
 0x256   : >> { %v3358_v14 = vadd.f32 %v3331_v27, %v3130_v49 }
 0x257   : >> { %v3140_v26 = vpop.f32.mrf.mxu2 }
 0x258   : >> { %v3378_v40 = vmul.f32 %v6624_v38, %v3358_v14 }
 0x25a   : >> { %v3398_v48 = vadd.f32 %v6636_v51, %v3378_v40 }
 0x25c   : >> { %v3414_v44 = vmax.f32 %v3398_v48, 0.0 }
 0x25d   : >> { %v3334_v30 = vpop.f32.mrf.mxu3 }
 0x25e   : >> { %v3425_v19 = vpack.c.bf16 %v3414_v44, %v3413_v21  ;;  %v3359_v6 = vadd.f32 %v3334_v30, %v3133_v46 }
 0x25f   : >> { %v3143_v7 = vpop.f32.mrf.mxu2 }
 0x260   : >> { %3525 = vmatmul.bf16.gmra.mxu0 %v3425_v19  ;;  %v3379_v33 = vmul.f32 %v6624_v38, %v3359_v6 }
 0x262   : >> { %v3399_v15 = vadd.f32 %v6636_v51, %v3379_v33  ;;  %3093 = vmatmul.bf16.gmra.mxu1 %v7030_v37 }
 0x264   : >> { %v3415_v10 = vmax.f32 %v3399_v15, 0.0 }
 0x265   : >> { %v3336_v60 = vpop.f32.mrf.mxu3 }
 0x266   : >> { %v3360_v5 = vadd.f32 %v3336_v60, %v3135_v25 }
 0x267   : >> { %v3145_v32 = vpop.f32.mrf.mxu2 }
 0x268   : >> { %v3380_v16 = vmul.f32 %v6624_v38, %v3360_v5 }
 0x26a   : >> { %v3400_v57 = vadd.f32 %v6636_v51, %v3380_v16 }
 0x26c   : >> { %v3416_v45 = vmax.f32 %v3400_v57, 0.0 }
 0x26d   : >> { %v3339_v13 = vpop.f32.mrf.mxu3 }
 0x26e   : >> { %v3426_v20 = vpack.c.bf16 %v3416_v45, %v3415_v10  ;;  %v3361_v24 = vadd.f32 %v3339_v13, %v3138_v56 }
 0x26f   : >> { %v6683_v8 = vpop.f32.mrf.mxu1 }
 0x270   : >> { %3530 = vmatmul.bf16.gmra.mxu0 %v3426_v20  ;;  %v3381_v23 = vmul.f32 %v6624_v38, %v3361_v24 }
 0x272   : >> { %v3401_v29 = vadd.f32 %v6636_v51, %v3381_v23 }
 0x274   : >> { %v3417_v12 = vmax.f32 %v3401_v29, 0.0 }
 0x275   : >> { %v3341_v31 = vpop.f32.mrf.mxu3 }
 0x276   : >> { %v3362_v55 = vadd.f32 %v3341_v31, %v3140_v26 }
 0x277   : >> { %v6685_v41 = vpop.f32.mrf.mxu1 }
 0x278   : >> { %v3382_v43 = vmul.f32 %v6624_v38, %v3362_v55 }
 0x27a   : >> { %v3402_v3 = vadd.f32 %v6636_v51, %v3382_v43 }
 0x27c   : >> { %v3418_v61 = vmax.f32 %v3402_v3, 0.0 }
 0x27d   : >> { %v3344_v0 = vpop.f32.mrf.mxu3 }
 0x27e   : >> { %v3427_v59 = vpack.c.bf16 %v3418_v61, %v3417_v12  ;;  %v3363_v9 = vadd.f32 %v3344_v0, %v3143_v7 }
 0x27f   : >> { %v6687_v49 = vpop.f32.mrf.mxu1 }
 0x280   : >> { %3535 = vmatmul.bf16.gmra.mxu0 %v3427_v59  ;;  %v3383_v39 = vmul.f32 %v6624_v38, %v3363_v9 }
 0x282   : >> { %v3403_v52 = vadd.f32 %v6636_v51, %v3383_v39 }
 0x284   : >> { %v3419_v1 = vmax.f32 %v3403_v52, 0.0 }
 0x285   : >> { %v3346_v42 = vpop.f32.mrf.mxu3 }
 0x286   : >> { %v3364_v35 = vadd.f32 %v3346_v42, %v3145_v32 }
 0x287   : >> { %v3066_v50 = vpop.f32.mrf.mxu1 }
 0x288   : >> { %v3384_v58 = vmul.f32 %v6624_v38, %v3364_v35  ;;  %v5191_v38 = vld [vmem:[%s7006_s11] ss:$0 sm:$0xff] }
 0x28a   : >> { %v3404_v11 = vadd.f32 %v6636_v51, %v3384_v58 }
 0x28c   : >> { %v3420_v54 = vmax.f32 %v3404_v11, 0.0 }
 0x28e   : >> { %v3428_v18 = vpack.c.bf16 %v3420_v54, %v3419_v1 }
 0x28f   : >> { %v3069_v62 = vpop.f32.mrf.mxu1 }
 0x290   : >> { %3540 = vmatmul.bf16.gmra.mxu0 %v3428_v18 }
 0x297   : >> { %v3071_v21 = vpop.f32.mrf.mxu1 }
 0x29d   : >> { %v3506_v17 = vpop.f32.mrf.mxu0 }
 0x29e   : >> { %v6692_v4 = vadd.f32 %v5191_v38, %v3506_v17  ;;  %v6748_v17 = vld [vmem:[%s7000_s5] ss:$0 sm:$0xff] }
 0x29f   : >> { %v3074_v25 = vpop.f32.mrf.mxu1 }
 0x2a5   : >> { %v3508_v53 = vpop.f32.mrf.mxu0 }
 0x2a6   : >> { %v6698_v28 = vadd.f32 %v5191_v38, %v3508_v53 }
 0x2a7   : >> { %v3076_v19 = vpop.f32.mrf.mxu1 }
 0x2ad   : >> { %v3511_v63 = vpop.f32.mrf.mxu0 }
 0x2ae   : >> { %v6704_v14 = vadd.f32 %v5191_v38, %v3511_v63 }
 0x2af   : >> { %v6710_v33 = vpop.f32.mrf.mxu1 }
 0x2b5   : >> { %v3513_v2 = vpop.f32.mrf.mxu0 }
 0x2b6   : >> { %v3514_v43 = vadd.f32 %v5191_v38, %v3513_v2 }
 0x2b7   : >> { %v6712_v56 = vpop.f32.mrf.mxu1 }
 0x2bd   : >> { %v3516_v51 = vpop.f32.mrf.mxu0 }
 0x2be   : >> { %v6694_v37 = vadd.f32 %v5191_v38, %v3516_v51  ;;  %v6757_v51 = vld [vmem:[%s7001_s6] ss:$0 sm:$0xff] }
 0x2bf   : >> { %v3084_v23 = vpop.f32.mrf.mxu1 }
 0x2c0   : >> { %v3546_v36 = vmax.f32 %v6692_v4, %v6694_v37 }
 0x2c5   : >> { %v3518_v47 = vpop.f32.mrf.mxu0 }
 0x2c6   : >> { %v6700_v34 = vadd.f32 %v5191_v38, %v3518_v47  ;;  %v3154_v47 = vmul.f32 %v6748_v17, %v6687_v49 }
 0x2c7   : >> { %v6732_v12 = vpop.f32.mrf.mxu1 }
 0x2c8   : >> { %v3547_v46 = vmax.f32 %v6698_v28, %v6700_v34 }
 0x2cd   : >> { %v3521_v27 = vpop.f32.mrf.mxu0 }
 0x2ce   : >> { %v6706_v22 = vadd.f32 %v5191_v38, %v3521_v27 }
 0x2cf   : >> { %v6743_v11 = vpop.f32.mrf.mxu1 }
 0x2d0   : >> { %v3548_v40 = vmax.f32 %v6704_v14, %v6706_v22 }
 0x2d5   : >> { %v3523_v48 = vpop.f32.mrf.mxu0 }
 0x2d6   : >> { %v6726_v29 = vadd.f32 %v5191_v38, %v3523_v48  ;;  %v3157_v48 = vmul.f32 %v6748_v17, %v3071_v21 }
 0x2d7   : >> { %v6750_v2 = vpop.f32.mrf.mxu1 }
 0x2d8   : >> { %v3549_v61 = vmax.f32 %v3514_v43, %v6726_v29 }
 0x2dd   : >> { %v3526_v44 = vpop.f32.mrf.mxu0 }
 0x2de   : >> { %v6714_v15 = vadd.f32 %v5191_v38, %v3526_v44  ;;  %v3159_v44 = vmul.f32 %v6748_v17, %v3076_v19 }
 0x2e0   : >> { %v3550_v45 = vmax.f32 %v3546_v36, %v6714_v15  ;;  %v3153_v36 = vmul.f32 %v6748_v17, %v6685_v41 }
 0x2e5   : >> { %v3528_v30 = vpop.f32.mrf.mxu0 }
 0x2e6   : >> { %v6716_v16 = vadd.f32 %v5191_v38, %v3528_v30 }
 0x2e8   : >> { %v3551_v13 = vmax.f32 %v3547_v46, %v6716_v16  ;;  %v3155_v46 = vmul.f32 %v6748_v17, %v3066_v50 }
 0x2ea   : >> { %v6789_v19 = vadd.f32 %v6757_v51, %v3155_v46 }
 0x2ed   : >> { %v3531_v6 = vpop.f32.mrf.mxu0 }
 0x2ee   : >> { %v6728_v3 = vadd.f32 %v5191_v38, %v3531_v6  ;;  %v6791_v6 = vld [vmem:[#allocation5] sm:$0x1] }
 0x2f0   : >> { %v3552_v9 = vmax.f32 %v3548_v40, %v6728_v3  ;;  %v3156_v40 = vmul.f32 %v6748_v17, %v3069_v62 }
 0x2f5   : >> { %v3533_v60 = vpop.f32.mrf.mxu0 }
 0x2f6   : >> { %v6730_v7 = vadd.f32 %v5191_v38, %v3533_v60  ;;  %v6794_v60 = vadd.f32 %v6757_v51, %v3156_v40 }
 0x2f8   : >> { %v3553_v39 = vmax.f32 %v3549_v61, %v6730_v7 }
 0x2fd   : >> { %v3536_v5 = vpop.f32.mrf.mxu0 }
 0x2fe   : >> { %v6718_v57 = vadd.f32 %v5191_v38, %v3536_v5  ;;  %v6805_v5 = vadd.f32 %v6757_v51, %v3159_v44 }
 0x300   : >> { %v3554_v24 = vmax.f32 %v3550_v45, %v6718_v57 }
 0x305   : >> { %v3538_v10 = vpop.f32.mrf.mxu0 }
 0x306   : >> { %v6722_v20 = vadd.f32 %v5191_v38, %v3538_v10 }
 0x308   : >> { %v3555_v26 = vmax.f32 %v3551_v13, %v6722_v20 }
 0x30a   : >> { %v3558_v31 = vmax.f32 %v3554_v24, %v3555_v26  ;;  %v3161_v24 = vmul.f32 %v6748_v17, %v6712_v56 }
 0x30d   : >> { %v3541_v55 = vpop.f32.mrf.mxu0 }
 0x30e   : >> { %v6735_v0 = vadd.f32 %v5191_v38, %v3541_v55 }
 0x310   : >> { %v3556_v42 = vmax.f32 %v3552_v9, %v6735_v0 }
 0x315   : >> { %v3543_v59 = vpop.f32.mrf.mxu0 }
 0x316   : >> { %v6739_v32 = vadd.f32 %v5191_v38, %v3543_v59  ;;  %v3152_v38 = vmul.f32 %v6748_v17, %v6683_v8  ;;  %v3158_v8 = vmul.f32 %v6748_v17, %v3074_v25  ;;  %v6818_v59 = vpop.f32.mrf.mxu1 }
 0x318   : >> { %v3557_v35 = vmax.f32 %v3553_v39, %v6739_v32  ;;  %v3172_v25 = vadd.f32 %v6757_v51, %v3152_v38  ;;  %v3163_v39 = vmul.f32 %v6748_v17, %v6732_v12 }
 0x31a   : >> { %v3559_v52 = vmax.f32 %v3556_v42, %v3557_v35  ;;  %v6830_v42 = vadd.f32 %v6757_v51, %v3161_v24 }
 0x31c   : >> { %v3560_v58 = vmax.f32 %v3558_v31, %v3559_v52 }
 0x31e   : >> { %v3561_v1 = vrot.slane %v3560_v58, 4 }
 0x320   : >> { %v3562_v54 = vmax.f32 %v3560_v58, %v3561_v1 }
 0x322   : >> { %v3563_v18 = vrot.slane %v3562_v54, 2 }
 0x324   : >> { %v3564_v53 = vmax.f32 %v3562_v54, %v3563_v18  ;;  %v6845_v18 = vadd.f32 %v6757_v51, %v3163_v39 }
 0x326   : >> { %v3565_v63 = vrot.slane %v3564_v53, 1 }
 0x328   : >> { %v6764_v27 = vmax.f32 %v3564_v53, %v3565_v63  ;;  %v3164_v63 = vmul.f32 %v6748_v17, %v6743_v11 }
 0x32a   : >> { %v3567_v30 = vsub.f32 %v6692_v4, %v6764_v27  ;;  %v3568_v41 = vsub.f32 %v6698_v28, %v6764_v27  ;;  %v3569_v49 = vsub.f32 %v6704_v14, %v6764_v27  ;;  %v3570_v50 = vsub.f32 %v3514_v43, %v6764_v27  ;;  %3707 = vst [vmem:[%s3706_s18] sm:$0x1] %v6764_v27 }
 0x32b   : >> { %v3571_v62 = vsub.f32 %v6694_v37, %v6764_v27  ;;  %v3572_v21 = vsub.f32 %v6700_v34, %v6764_v27  ;;  %v3573_v4 = vsub.f32 %v6706_v22, %v6764_v27  ;;  %v3173_v28 = vadd.f32 %v6757_v51, %v3153_v36 }
 0x32c   : >> { %v3174_v14 = vadd.f32 %v6757_v51, %v3154_v47  ;;  %v6797_v37 = vadd.f32 %v6757_v51, %v3157_v48  ;;  %v6800_v34 = vadd.f32 %v6757_v51, %v3158_v8  ;;  %v3160_v22 = vmul.f32 %v6748_v17, %v6710_v33 }
 0x32d   : >> { %v3583_v10 = vmul.f32 1.442695, %v3567_v30  ;;  %v3585_v45 = vmul.f32 1.442695, %v3568_v41  ;;  %v3587_v13 = vmul.f32 1.442695, %v3569_v49  ;;  %v3574_v26 = vsub.f32 %v6726_v29, %v6764_v27 }
 0x32e   : >> { %v3589_v31 = vmul.f32 1.442695, %v3570_v50  ;;  %v6813_v55 = vmax.f32 %v6791_v6, %v6764_v27  ;;  %v3162_v43 = vmul.f32 %v6748_v17, %v3084_v23  ;;  %v3575_v33 = vsub.f32 %v6714_v15, %v6764_v27  ;;  %v3096_v50 = vpop.f32.mrf.mxu1 }
 0x32f   : >> { %5194 = vpow2.f32 %v3583_v10  ;;  %v3591_v61 = vmul.f32 1.442695, %v3571_v62  ;;  %v6821_v9 = vadd.f32 %v6757_v51, %v3160_v22  ;;  %v3576_v56 = vsub.f32 %v6716_v16, %v6764_v27 }
 0x330   : >> { %5196 = vpow2.f32 %v3585_v45  ;;  %v3593_v29 = vmul.f32 1.442695, %v3572_v21  ;;  %v3577_v23 = vsub.f32 %v6728_v3, %v6764_v27  ;;  %v3595_v15 = vmul.f32 1.442695, %v3573_v4  ;;  %3721 = vst [vmem:[#allocation5] sm:$0x1] %v6813_v55 }
 0x331   : >> { %5198 = vpow2.f32 %v3587_v13  ;;  %v3578_v35 = vsub.f32 %v6730_v7, %v6764_v27  ;;  %v3597_v52 = vmul.f32 1.442695, %v3574_v26  ;;  %v6836_v16 = vadd.f32 %v6757_v51, %v3162_v43 }
 0x332   : >> { %5200 = vpow2.f32 %v3589_v31  ;;  %v3579_v12 = vsub.f32 %v6718_v57, %v6764_v27  ;;  %v3599_v3 = vmul.f32 1.442695, %v3575_v33  ;;  %v3580_v58 = vsub.f32 %v6722_v20, %v6764_v27 }
 0x333   : >> { %5202 = vpow2.f32 %v3591_v61  ;;  %v3581_v1 = vsub.f32 %v6735_v0, %v6764_v27  ;;  %v3601_v7 = vmul.f32 1.442695, %v3576_v56  ;;  %v3603_v53 = vmul.f32 1.442695, %v3577_v23 }
 0x334   : >> { %5204 = vpow2.f32 %v3593_v29  ;;  %v3582_v38 = vsub.f32 %v6739_v32, %v6764_v27  ;;  %v3605_v20 = vmul.f32 1.442695, %v3578_v35  ;;  %v3607_v0 = vmul.f32 1.442695, %v3579_v12 }
 0x335   : >> { %v5195_v54 = vpop.eup %5194  ;;  %5206 = vpow2.f32 %v3595_v15  ;;  %v3609_v8 = vmul.f32 1.442695, %v3580_v58  ;;  %v3611_v44 = vmul.f32 1.442695, %v3581_v1  ;;  %v3165_v4 = vmul.f32 %v6748_v17, %v6750_v2 }
 0x336   : >> { %v5197_v57 = vpop.eup %5196  ;;  %5208 = vpow2.f32 %v3597_v52  ;;  %v3656_v36 = vmul.f32 %v5195_v54, %v3172_v25  ;;  %v3613_v21 = vmul.f32 1.442695, %v3582_v38  ;;  %v3166_v2 = vmul.f32 %v6748_v17, %v6818_v59 }
 0x337   : >> { %v5199_v47 = vpop.eup %5198  ;;  %5210 = vpow2.f32 %v3599_v3  ;;  %v3615_v46 = vadd.f32 %v5197_v57, %v5195_v54  ;;  %v3657_v40 = vmul.f32 %v5197_v57, %v3173_v28 }
 0x338   : >> { %v5201_v48 = vpop.eup %5200  ;;  %5212 = vpow2.f32 %v3601_v7  ;;  %v3658_v30 = vmul.f32 %v5199_v47, %v3174_v14  ;;  %v3186_v39 = vadd.f32 %v6757_v51, %v3166_v2 }
 0x339   : >> { %v5203_v41 = vpop.eup %5202  ;;  %5214 = vpow2.f32 %v3603_v53  ;;  %v3616_v11 = vadd.f32 %v5199_v47, %v3615_v46  ;;  %v3659_v49 = vmul.f32 %v5201_v48, %v6789_v19  ;;  %v4951_v32 = vpack.c.bf16 %v3657_v40, %v3656_v36 }
 0x33a   : >> { %v5205_v62 = vpop.eup %5204  ;;  %5216 = vpow2.f32 %v3605_v20  ;;  %v3660_v25 = vmul.f32 %v5203_v41, %v6794_v60  ;;  %v3167_v60 = vmul.f32 %v6748_v17, %v3096_v50  ;;  %v3185_v17 = vadd.f32 %v6757_v51, %v3165_v4 }
 0x33b   : >> { %v5207_v28 = vpop.eup %5206  ;;  %5218 = vpow2.f32 %v3607_v0  ;;  %v3617_v22 = vadd.f32 %v5201_v48, %v3616_v11  ;;  %v3661_v14 = vmul.f32 %v5205_v62, %v6797_v37  ;;  %4952 = vst [vmem:[%s6858_s29] sm:$0xff] %v4951_v32   ;;  %v4956_v19 = vpack.c.bf16 %v3659_v49, %v3658_v30 }
 0x33c   : >> { %v5209_v10 = vpop.eup %5208  ;;  %5220 = vpow2.f32 %v3609_v8  ;;  %v3662_v45 = vmul.f32 %v5207_v28, %v6800_v34  ;;  %v3184_v34 = vadd.f32 %v6757_v51, %v3164_v63  ;;  %v3711_v0 = vsub.f32 %v6791_v6, %v6813_v55 }
 0x33d   : >> { %v5211_v13 = vpop.eup %5210  ;;  %5222 = vpow2.f32 %v3611_v44  ;;  %v3618_v37 = vadd.f32 %v5203_v41, %v3617_v22  ;;  %v3663_v24 = vmul.f32 %v5209_v10, %v6805_v5  ;;  %5059 = vst [vmem:[%s6858_s29 + $0x8] sm:$0xff] %v4956_v19   ;;  %v4961_v26 = vpack.c.bf16 %v3661_v14, %v3660_v25 }
 0x33e   : >> { %v5213_v31 = vpop.eup %5212  ;;  %5224 = vpow2.f32 %v3613_v21  ;;  %v3664_v43 = vmul.f32 %v5211_v13, %v6821_v9  ;;  %v3715_v40 = vsub.f32 %v6764_v27, %v6813_v55  ;;  %v3712_v8 = vmul.f32 1.442695, %v3711_v0 }
 0x33f   : >> { %v5215_v33 = vpop.eup %5214  ;;  %v3619_v61 = vadd.f32 %v5205_v62, %v3618_v37  ;;  %v3665_v59 = vmul.f32 %v5213_v31, %v6830_v42  ;;  %5060 = vst [vmem:[%s6858_s29 + $0x10] sm:$0xff] %v4961_v26   ;;  %v4966_v56 = vpack.c.bf16 %v3663_v24, %v3662_v45  ;;  %v3187_v42 = vadd.f32 %v6757_v51, %v3167_v60  ;;  %v3710_v62 = vld [vmem:[#allocation6] sm:$0x1] }
 0x340   : >> { %v5217_v29 = vpop.eup %5216  ;;  %v3666_v5 = vmul.f32 %v5215_v33, %v6836_v16  ;;  %v3716_v30 = vmul.f32 1.442695, %v3715_v40  ;;  %5226 = vpow2.f32 %v3712_v8 }
 0x341   : >> { %v5219_v23 = vpop.eup %5218  ;;  %v3620_v15 = vadd.f32 %v5207_v28, %v3619_v61  ;;  %v3667_v9 = vmul.f32 %v5217_v29, %v6845_v18  ;;  %v4971_v35 = vpack.c.bf16 %v3665_v59, %v3664_v43  ;;  %5061 = vst [vmem:[%s6858_s29 + $0x18] sm:$0xff] %v4966_v56  }
 0x342   : >> { %v5221_v52 = vpop.eup %5220  ;;  %v3668_v12 = vmul.f32 %v5219_v23, %v3184_v34  ;;  %5228 = vpow2.f32 %v3716_v30 }
 0x343   : >> { %v5223_v3 = vpop.eup %5222  ;;  %v3621_v58 = vadd.f32 %v5209_v10, %v3620_v15  ;;  %v4976_v1 = vpack.c.bf16 %v3667_v9, %v3666_v5  ;;  %v3669_v7 = vmul.f32 %v5221_v52, %v3185_v17  ;;  %5062 = vst [vmem:[%s6858_s29 + $0x20] sm:$0xff] %v4971_v35  }
 0x344   : >> { %v5225_v16 = vpop.eup %5224  ;;  %v3670_v54 = vmul.f32 %v5223_v3, %v3186_v39 }
 0x345   : >> { %v3622_v53 = vadd.f32 %v5211_v13, %v3621_v58  ;;  %5063 = vst [vmem:[%s6858_s29 + $0x28] sm:$0xff] %v4976_v1   ;;  %v4981_v63 = vpack.c.bf16 %v3669_v7, %v3668_v12  ;;  %v3671_v57 = vmul.f32 %v5225_v16, %v3187_v42 }
 0x346   : >> { %v5227_v50 = vpop.eup %5226 }
 0x347   : >> { %v3623_v18 = vadd.f32 %v5213_v31, %v3622_v53  ;;  %5064 = vst [vmem:[%s6858_s29 + $0x30] sm:$0xff] %v4981_v63   ;;  %v4986_v38 = vpack.c.bf16 %v3671_v57, %v3670_v54  ;;  %v3714_v25 = vmul.f32 %v5227_v50, %v3710_v62 }
 0x348   : >> { %v5229_v4 = vpop.eup %5228 }
 0x349   : >> { %v3624_v20 = vadd.f32 %v5215_v33, %v3623_v18  ;;  %5065 = vst [vmem:[%s6858_s29 + $0x38] sm:$0xff] %v4986_v38  }
 0x34b   : >> { %v3625_v51 = vadd.f32 %v5217_v29, %v3624_v20 }
 0x34d   : >> { %v3626_v36 = vadd.f32 %v5219_v23, %v3625_v51 }
 0x34f   : >> { %v3627_v47 = vadd.f32 %v5221_v52, %v3626_v36 }
 0x351   : >> { %v3628_v46 = vadd.f32 %v5223_v3, %v3627_v47 }
 0x353   : >> { %v3629_v48 = vadd.f32 %v5225_v16, %v3628_v46 }
 0x355   : >> { %v3630_v44 = vrot.slane %v3629_v48, 4 }
 0x357   : >> { %v3631_v41 = vadd.f32 %v3630_v44, %v3629_v48 }
 0x359   : >> { %v3632_v11 = vrot.slane %v3631_v41, 2 }
 0x35b   : >> { %v3633_v49 = vadd.f32 %v3632_v11, %v3631_v41 }
 0x35d   : >> { %v3634_v32 = vrot.slane %v3633_v49, 1 }
 0x35f   : >> { %v3635_v21 = vadd.f32 %v3634_v32, %v3633_v49 }
 0x361   : >> { %v3718_v6 = vmul.f32 %v5229_v4, %v3635_v21  ;;  %452 = sbr.rel (!%p450_p0) target bundleno = 38 (0x26), region = 144 }
 0x363   : >> { %v3719_v28 = vadd.f32 %v3718_v6, %v3714_v25 }
 0x365   : >> { %3720 = vst [vmem:[#allocation6] sm:$0x1] %v3719_v28 }
 0x366 LB: >> { %v3733_v27 = vld [vmem:[#allocation5] sm:$0x1]  ;;  %s4770_s16 = sshll.u32 %s5385_s20, 7  ;;  %s3731_s0 = scalar_lea.vmem [#allocation4], %s5385_s20  ;;  %s5385_s20 = sphi %s6888_s20, %s3727_s20  }
 0x367   : >> { %v3732_v22 = vld [vmem:[%s3731_s0] sm:$0x1]  ;;  %s3738_s1 = sshra.s32 %s4770_s16, 3  ;;  %s7032_s23 = scalar_lea.vmem [#allocation12], %s5537_s27 }
 0x368   : >> { %v3734_v14 = vsub.f32 %v3732_v22, %v3733_v27  ;;  %s4771_s26 = sshll.u32 %s3738_s1, 2  ;;  %s6921_s30 = scalar_lea.vmem %s7032_s23, %s4770_s16 [#allocation12] }
 0x369   : >> { %s6897_s19 = scalar_lea.vmem [#allocation2], %s4771_s26  ;;  %s6900_s17 = scalar_lea.vmem [#allocation3], %s4771_s26 }
 0x36a   : >> { %v3735_v19 = vmul.f32 1.442695, %v3734_v14  ;;  %v4989_v10 = vld [vmem:[%s6897_s19] sm:$0xff]   ;;  %v5073_v60 = vld [vmem:[%s6900_s17 + $0x8] sm:$0xff]   ;;  %v5074_v37 = vld [vmem:[%s6900_s17 + $0x10] sm:$0xff]   ;;  %s3727_s20 = sadd.s32 1, %s5385_s20  }
 0x36b   : >> { %v5021_v45 = vld [vmem:[%s6900_s17] sm:$0xff]   ;;  %v5066_v13 = vld [vmem:[%s6897_s19 + $0x8] sm:$0xff]   ;;  %v4990_v26 = vunpack.c.l.bf16 %v4989_v10  ;;  %v5067_v43 = vld [vmem:[%s6897_s19 + $0x10] sm:$0xff]   ;;  %v5026_v59 = vunpack.c.l.bf16 %v5073_v60  ;;  %v5027_v17 = vunpack.c.h.bf16 %v5073_v60  ;;  %v4991_v5 = vunpack.c.h.bf16 %v4989_v10  ;;  %p3724_p1 = scmp.ge.s32.totalorder %s3727_s20, 2  }
 0x36c   : >> { %v3729_v55 = vld [vmem:[#allocation6] sm:$0x1]  ;;  %v5022_v31 = vunpack.c.l.bf16 %v5021_v45  ;;  %v5075_v34 = vld [vmem:[%s6900_s17 + $0x18] sm:$0xff]   ;;  %v5023_v61 = vunpack.c.h.bf16 %v5021_v45  ;;  %v4994_v39 = vunpack.c.l.bf16 %v5066_v13  ;;  %v5030_v23 = vunpack.c.l.bf16 %v5074_v37  ;;  %v5077_v12 = vld [vmem:[%s6900_s17 + $0x28] sm:$0xff]   ;;  %s4907_s15 = sshll.u32 (%p3724_p1), %s5481_s25, 8  ;;  %s7033_s16 = scalar_lea.vmem (%p3724_p1), [#allocation12], %s5537_s27 }
 0x36d   : >> { %5235 = vrcp.f32 %v3729_v55  ;;  %v5068_v56 = vld [vmem:[%s6897_s19 + $0x18] sm:$0xff]   ;;  %v5076_v29 = vld [vmem:[%s6900_s17 + $0x20] sm:$0xff]   ;;  %v5031_v15 = vunpack.c.h.bf16 %v5074_v37  ;;  %v4995_v35 = vunpack.c.h.bf16 %v5066_v13  ;;  %v4998_v42 = vunpack.c.l.bf16 %v5067_v43  ;;  %v5078_v36 = vld [vmem:[%s6900_s17 + $0x30] sm:$0xff]   ;;  %s3870_s29 = scalar_lea.hbm (%p3724_p1), %s7007_s12, %s4907_s15  ;;  %s3871_s0 = sshll.u32 (%p3724_p1), %s7033_s16, 4  ;;  %s3872_s0 = int_to_ptr.vmem [resolvable:$true] %s3871_s0 }
 0x36e   : >> { %5237 = vpow2.f32 %v3735_v19  ;;  %v5034_v52 = vunpack.c.l.bf16 %v5075_v34  ;;  %v4999_v3 = vunpack.c.h.bf16 %v5067_v43  ;;  %v5002_v58 = vunpack.c.l.bf16 %v5068_v56  ;;  %v5069_v38 = vld [vmem:[%s6897_s19 + $0x20] sm:$0xff]   ;;  %v5070_v30 = vld [vmem:[%s6897_s19 + $0x28] sm:$0xff]   ;;  %v5079_v11 = vld [vmem:[%s6900_s17 + $0x38] sm:$0xff]   ;;  %s3873_s1 = sshll.u32 (%p3724_p1), %s3870_s29, 4  ;;  %s7034_s26 = sand.u32 (%p3724_p1), 1, %s5369_s22   ;;  %s3874_s1 = int_to_ptr.hbm [resolvable:$true] %s3873_s1 }
 0x36f   : >> { %v5035_v1 = vunpack.c.h.bf16 %v5075_v34  ;;  %v5038_v7 = vunpack.c.l.bf16 %v5076_v29  ;;  %v5039_v20 = vunpack.c.h.bf16 %v5076_v29  ;;  %v5042_v51 = vunpack.c.l.bf16 %v5077_v12  ;;  %v5071_v6 = vld [vmem:[%s6897_s19 + $0x30] sm:$0xff]   ;;  %s5313_s17 = sshra.s32 (%p3724_p1), %s3874_s1, 4  ;;  %s5314_s17 = int_to_ptr.hbm [resolvable:$true] %s5313_s17 }
 0x370   : >> { %v5003_v8 = vunpack.c.h.bf16 %v5068_v56  ;;  %v5043_v41 = vunpack.c.h.bf16 %v5077_v12  ;;  %v5006_v32 = vunpack.c.l.bf16 %v5069_v38  ;;  %v5046_v62 = vunpack.c.l.bf16 %v5078_v36  ;;  %s5315_s20 = scalar_lea.hbm (%p3724_p1), %s5314_s17, 256  ;;  %p5320_p7 = scmp.lt.s32.totalorder (%p3724_p1), %s5314_s17, %s7007_s12 }
 0x371   : >> { %v5007_v4 = vunpack.c.h.bf16 %v5069_v38  ;;  %v5047_v28 = vunpack.c.h.bf16 %v5078_v36  ;;  %v5010_v55 = vunpack.c.l.bf16 %v5070_v30  ;;  %v5050_v14 = vunpack.c.l.bf16 %v5079_v11  ;;  %p5316_p2 = scmp.ne.s32.totalorder (%p3724_p1), %s5314_s17, %s5315_s20 }
 0x372   : >> { %v5011_v10 = vunpack.c.h.bf16 %v5070_v30  ;;  %v5051_v60 = vunpack.c.h.bf16 %v5079_v11  ;;  %v5014_v37 = vunpack.c.l.bf16 %v5071_v6 }
 0x373   : >> { %v5236_v2 = vpop.eup %5235  ;;  %p5317_p3 = pnand (%p3724_p1), %p5316_p2, %p5498_p5 }
 0x374   : >> { %v5238_v24 = vpop.eup %5237 }
 0x375   : >> { %v3737_v33 = vmul.f32 %v5238_v24, %v5236_v2  ;;  %v5072_v2 = vld [vmem:[%s6897_s19 + $0x38] sm:$0xff]   ;;  %s3859_s19 = scalar_lea.sflag (%p3724_p1), [#allocation9], %s7034_s26  ;;  %p5318_p4 = pneg (%p3724_p1), %p5317_p3 }
 0x377   : >> { %v6910_v9 = vperm.slane %v3737_v33, 0  ;;  %v5018_v33 = vunpack.c.l.bf16 %v5072_v2 }
 0x379   : >> { %v3809_v16 = vmul.f32 %v5022_v31, %v6910_v9  ;;  %v3810_v54 = vmul.f32 %v5023_v61, %v6910_v9  ;;  %v3811_v53 = vmul.f32 %v5026_v59, %v6910_v9  ;;  %v3812_v63 = vmul.f32 %v5027_v17, %v6910_v9 }
 0x37a   : >> { %v3813_v57 = vmul.f32 %v5030_v23, %v6910_v9  ;;  %v3814_v18 = vmul.f32 %v5031_v15, %v6910_v9  ;;  %v3815_v40 = vmul.f32 %v5034_v52, %v6910_v9  ;;  %v3816_v44 = vmul.f32 %v5035_v1, %v6910_v9 }
 0x37b   : >> { %v3825_v47 = vadd.f32 %v4990_v26, %v3809_v16  ;;  %v3826_v0 = vadd.f32 %v4991_v5, %v3810_v54  ;;  %v3827_v46 = vadd.f32 %v4994_v39, %v3811_v53  ;;  %v3828_v48 = vadd.f32 %v4995_v35, %v3812_v63 }
 0x37c   : >> { %v3829_v49 = vadd.f32 %v4998_v42, %v3813_v57  ;;  %v3817_v50 = vmul.f32 %v5038_v7, %v6910_v9  ;;  %v3830_v21 = vadd.f32 %v4999_v3, %v3814_v18  ;;  %v3818_v25 = vmul.f32 %v5039_v20, %v6910_v9 }
 0x37d   : >> { %3842 = vst [vmem:[%s6921_s30] sm:$0xff] %v3825_v47  ;;  %v3831_v27 = vadd.f32 %v5002_v58, %v3815_v40  ;;  %v3819_v22 = vmul.f32 %v5042_v51, %v6910_v9  ;;  %v3832_v19 = vadd.f32 %v5003_v8, %v3816_v44  ;;  %v3820_v45 = vmul.f32 %v5043_v41, %v6910_v9 }
 0x37e   : >> { %3843 = vst [vmem:[%s6921_s30 + $0x8] sm:$0xff] %v3826_v0  ;;  %v3833_v13 = vadd.f32 %v5006_v32, %v3817_v50  ;;  %v3821_v24 = vmul.f32 %v5046_v62, %v6910_v9  ;;  %v3834_v26 = vadd.f32 %v5007_v4, %v3818_v25  ;;  %v5015_v31 = vunpack.c.h.bf16 %v5071_v6 }
 0x37f   : >> { %3844 = vst [vmem:[%s6921_s30 + $0x10] sm:$0xff] %v3827_v46  ;;  %v3822_v43 = vmul.f32 %v5047_v28, %v6910_v9  ;;  %v3835_v34 = vadd.f32 %v5010_v55, %v3819_v22  ;;  %v3823_v61 = vmul.f32 %v5050_v14, %v6910_v9  ;;  %v3836_v59 = vadd.f32 %v5011_v10, %v3820_v45 }
 0x380   : >> { %3845 = vst [vmem:[%s6921_s30 + $0x18] sm:$0xff] %v3828_v48  ;;  %v5019_v17 = vunpack.c.h.bf16 %v5072_v2  ;;  %v3824_v56 = vmul.f32 %v5051_v60, %v6910_v9  ;;  %v3837_v29 = vadd.f32 %v5014_v37, %v3821_v24 }
 0x381   : >> { %3846 = vst [vmem:[%s6921_s30 + $0x20] sm:$0xff] %v3829_v49  ;;  %v3838_v5 = vadd.f32 %v5015_v31, %v3822_v43  ;;  %v3839_v39 = vadd.f32 %v5018_v33, %v3823_v61 }
 0x382   : >> { %3847 = vst [vmem:[%s6921_s30 + $0x28] sm:$0xff] %v3830_v21  ;;  %v3840_v23 = vadd.f32 %v5019_v17, %v3824_v56 }
 0x383   : >> { %3848 = vst [vmem:[%s6921_s30 + $0x30] sm:$0xff] %v3831_v27 }
 0x384   : >> { %3849 = vst [vmem:[%s6921_s30 + $0x38] sm:$0xff] %v3832_v19 }
 0x385   : >> { %3850 = vst [vmem:[%s6921_s30 + $0x40] sm:$0xff] %v3833_v13 }
 0x386   : >> { %3851 = vst [vmem:[%s6921_s30 + $0x48] sm:$0xff] %v3834_v26 }
 0x387   : >> { %3852 = vst [vmem:[%s6921_s30 + $0x50] sm:$0xff] %v3835_v34 }
 0x388   : >> { %3853 = vst [vmem:[%s6921_s30 + $0x58] sm:$0xff] %v3836_v59  ;;  %3726 = sbr.rel (!%p3724_p1) target bundleno = 870 (0x366), region = 155 }
 0x389   : >> { %3854 = vst [vmem:[%s6921_s30 + $0x60] sm:$0xff] %v3837_v29 }
 0x38a   : >> { %3855 = vst [vmem:[%s6921_s30 + $0x68] sm:$0xff] %v3838_v5 }
 0x38b   : >> { %3856 = vst [vmem:[%s6921_s30 + $0x70] sm:$0xff] %v3839_v39 }
 0x38c   : >> { %3857 = vst [vmem:[%s6921_s30 + $0x78] sm:$0xff] %v3840_v23  ;;  %s5319_s30 = scalar_lea.hbm (%p3724_p1), %s7007_s12, 512 }
 0x38d   : > { %p5321_p8 = scmp.lt.s32.totalorder %s5319_s30, %s5315_s20 }
 0x38f   : > { %p5322_p9 = por %p5321_p8, %p5320_p7 }
 0x391   : > { %p5323_p10 = pnand %p5322_p9, %p5318_p4 }
 0x393   : > { %5326 = shalt.err (!%p5323_p10)
}
 0x394   : > { %s5393_s27 = smov 128   ;;  %s5394_s28 = smov 8  }
 0x395   : > { %5113 = dma.vmem_to_hbm [thread:$0]  (%p5498_p5), %s3872_s0, 4096, %s3874_s1, %s3859_s19, %s5393_s27, %s5393_s27, %s5394_s28  }
 0x396 PF: > { %p5130_p11 = scmp.ge.s32.totalorder %s5377_s24, 2  ;;  %s3888_s29 = sand.u32 1, %s5365_s21  }
 0x397   : > { %s3889_s16 = scalar_lea.sflag [#allocation9], %s3888_s29 }
 0x398   : > { %p5123_p12 = pnand %p5130_p11, %p5502_p6 }
 0x39a   : > { %p5124_p13 = pneg %p5123_p12 }
 0x39c   : > { %5360 = dma.done.wait (%p5124_p13), %s3889_s16, 4096  }
 0x39d   : > { %5362 = vsyncadd (%p5124_p13), %s3889_s16, 4294963200  ;;  %s7035_s24 = sld [smem:[#allocation17_spill]]  ;;  %s7038_s21 = smov %s5369_s22 }
 0x39e   : > { %s7036_s26 = sld [smem:[#allocation16_spill]] }
 0x39f   : > { %s7037_s23 = sld [smem:[#allocation18_spill]] }
 0x3a3   : > { %p24_p0 = scmp.ge.s32.totalorder %s7035_s24, 4  }
 0x3a4   : > { %s7039_s22 = smov %s7036_s26 }
 0x3a5   :  { %26 = sbr.rel (!%p24_p0) target bundleno = 8 (0x8), region = 166 }
 0x3aa   :  { %3895 = vsyncpa [#allocation8], 1 }
 0x3ab   :  { %3897 = vsyncpa [#allocation8 + $0x1], 1 }
 0x3ac   :  { %3898 = vsyncpa [#allocation11], 1 }
 0x3ad   :  { %3899 = vsyncpa [#allocation9], 1 }
 0x3ae   :  { %3901 = vsyncpa [#allocation9 + $0x1], 1 }

</bundles_post_ra>
